<compile_context>
chip_gen: v6e
topology: v6e:2x2x1
jax: 0.10.0
libtpu: 0.0.40
codegen_flags: <defaults>
</compile_context>

<pallas_src>
import functools

import jax
import jax.numpy as jnp
from jax.experimental import pallas as pl
from jax.experimental.pallas import tpu as pltpu


def _round_up(x, m):
    return ((x + m - 1) // m) * m


def _policy_kernel(obs_ref, w1_ref, b1_ref, w2_ref, b2_ref, w3_ref, b3_ref,
                   out_ref):
    """Fused 3-layer MLP per batch tile.

    Matmuls take bf16 operands (native MXU dtype on all generations) and
    accumulate in f32; bias adds / ReLU / tanh are done in f32.
    """
    x = obs_ref[...].astype(jnp.bfloat16)                         # (TB, S)

    # Layer 1: Linear + ReLU
    h = jnp.dot(x, w1_ref[...], preferred_element_type=jnp.float32)
    h = jnp.maximum(h + b1_ref[...], 0.0)                         # (TB, H) f32

    # Layer 2: Linear + ReLU
    h = jnp.dot(h.astype(jnp.bfloat16), w2_ref[...],
                preferred_element_type=jnp.float32)
    h = jnp.maximum(h + b2_ref[...], 0.0)                         # (TB, H) f32

    # Layer 3: Linear + Tanh (output activation)
    h = jnp.dot(h.astype(jnp.bfloat16), w3_ref[...],
                preferred_element_type=jnp.float32)
    out_ref[...] = jnp.tanh(h + b3_ref[...]).astype(out_ref.dtype)  # (TB, A)


def prepare_params(params):
    """One-time parameter prep: bf16 matmul weights, f32 biases.

    Do this once at init, NOT per call, so the per-call path issues no
    extra cast HBM passes.
    """
    return {
        "w1": params["w1"].astype(jnp.bfloat16),
        "b1": params["b1"].astype(jnp.float32),
        "w2": params["w2"].astype(jnp.bfloat16),
        "b2": params["b2"].astype(jnp.float32),
        "w3": params["w3"].astype(jnp.bfloat16),
        "b3": params["b3"].astype(jnp.float32),
    }


@functools.partial(jax.jit, static_argnames=("block_b",))
def deterministic_policy_forward(obs, params, *, block_b=2048):
    """Pallas forward for DeterministicPolicy.

    obs: (B, state_dim) float32
    params: output of prepare_params(): w1 (S,H) bf16, b1 (1,H) f32,
            w2 (H,H) bf16, b2 (1,H) f32, w3 (H,A) bf16, b3 (1,A) f32
    returns: (B, act_dim) float32 in (-1, 1)
    """
    w1, b1 = params["w1"], params["b1"]
    w2, b2 = params["w2"], params["b2"]
    w3, b3 = params["w3"], params["b3"]

    B, S = obs.shape
    H = w1.shape[1]
    A = w3.shape[1]

    # ---- batch tiling ----------------------------------------------------
    if B <= block_b:
        # Single tile covering the full (possibly odd-sized) batch: block
        # dims equal full array dims, so no padding and no per-step overhead.
        tb = B
    else:
        # Multiple steps: round the tile to 128 rows (clean sublane packing
        # for the bf16 MXU operands); a few zero-padded rows are cheap.
        n_steps = pl.cdiv(B, block_b)
        tb = _round_up(pl.cdiv(B, n_steps), 128)
    B_pad = _round_up(B, tb)
    grid = (B_pad // tb,)

    if B_pad != B:
        obs = jnp.pad(obs, ((0, B_pad - B), (0, 0)))

    # ---- advisory cost estimate for XLA's scheduler ------------------------
    flops = 2 * B_pad * (S * H + H * H + H * A)
    bytes_accessed = (B_pad * S * 4                      # obs (f32)
                      + (S * H + H * H + H * A) * 2      # weights (bf16)
                      + (2 * H + A) * 4                  # biases (f32)
                      + B_pad * A * 4)                   # output (f32)
    cost = pl.CostEstimate(flops=flops,
                           transcendentals=B_pad * A,    # tanh
                           bytes_accessed=bytes_accessed)

    # Weights/biases are small -> resident in VMEM (constant block index);
    # only the batch dim is tiled.
    full2 = lambda shape: pl.BlockSpec(shape, lambda i: (0, 0))

    out = pl.pallas_call(
        _policy_kernel,
        out_shape=jax.ShapeDtypeStruct((B_pad, A), jnp.float32),
        grid_spec=pltpu.PrefetchScalarGridSpec(
            num_scalar_prefetch=0,
            grid=grid,
            in_specs=[
                pl.BlockSpec((tb, S), lambda i: (i, 0)),    # obs tile (f32)
                full2((S, H)), full2((1, H)),               # layer 1
                full2((H, H)), full2((1, H)),               # layer 2
                full2((H, A)), full2((1, A)),               # layer 3
            ],
            out_specs=pl.BlockSpec((tb, A), lambda i: (i, 0)),
        ),
        compiler_params=pltpu.CompilerParams(
            dimension_semantics=("parallel",)),
        cost_estimate=cost,
    )(obs, w1, b1, w2, b2, w3, b3)

    if B_pad != B:
        out = out[:B]
    return out


def init_params(key, state_dim, act_dim, hidden_dim):
    """Deterministic synthetic parameter init (shapes match the nn.Module)."""
    ks = jax.random.split(key, 6)
    scale = 0.1
    return {
        "w1": scale * jax.random.normal(ks[0], (state_dim, hidden_dim), jnp.float32),
        "b1": scale * jax.random.normal(ks[1], (1, hidden_dim), jnp.float32),
        "w2": scale * jax.random.normal(ks[2], (hidden_dim, hidden_dim), jnp.float32),
        "b2": scale * jax.random.normal(ks[3], (1, hidden_dim), jnp.float32),
        "w3": scale * jax.random.normal(ks[4], (hidden_dim, act_dim), jnp.float32),
        "b3": scale * jax.random.normal(ks[5], (1, act_dim), jnp.float32),
    }


def reference_forward(obs, params):
    """Pure-JAX reference mirroring the kernel's bf16-operand / f32-accum math."""
    bf = lambda a: a.astype(jnp.bfloat16).astype(jnp.float32)
    h = jnp.maximum(bf(obs) @ bf(params["w1"]) + params["b1"], 0.0)
    h = jnp.maximum(bf(h) @ bf(params["w2"]) + params["b2"], 0.0)
    return jnp.tanh(bf(h) @ bf(params["w3"]) + params["b3"])


if __name__ == "__main__":
    state_dim, act_dim, hidden_dim = 16, 8, 32
    batch = 1000            # not a multiple of 8 -> exercises full-dim block path
    max_action = 1.0        # stored by the module; forward() does not apply it

    key = jax.random.PRNGKey(0)
    k_obs, k_par = jax.random.split(key)
    obs = jax.random.normal(k_obs, (batch, state_dim), jnp.float32)
    params = init_params(k_par, state_dim, act_dim, hidden_dim)
    prepped = prepare_params(params)   # one-time bf16/f32 cast, not per call

    out = deterministic_policy_forward(obs, prepped)
    out = jax.block_until_ready(out)

    ref = reference_forward(obs, params)
    assert out.shape == (batch, act_dim)
    assert jnp.allclose(out, ref, atol=5e-3, rtol=5e-3), "mismatch vs reference"

    print("KERNEL_OK")
</pallas_src>

<mosaic_0001>
module attributes {stable_mosaic.version = 11 : i64} {
  func.func @_policy_kernel(%arg0: i32, %arg1: memref<1000x16xf32, #tpu.memory_space<vmem>>, %arg2: memref<16x32xbf16, #tpu.memory_space<vmem>>, %arg3: memref<1x32xf32, #tpu.memory_space<vmem>>, %arg4: memref<32x32xbf16, #tpu.memory_space<vmem>>, %arg5: memref<1x32xf32, #tpu.memory_space<vmem>>, %arg6: memref<32x8xbf16, #tpu.memory_space<vmem>>, %arg7: memref<1x8xf32, #tpu.memory_space<vmem>>, %arg8: memref<1000x8xf32, #tpu.memory_space<vmem>>) attributes {dimension_semantics = [#tpu.dimension_semantics<parallel>], iteration_bounds = array<i64: 1>, scalar_prefetch = 0 : i64, scratch_operands = 0 : i64, tpu.core_type = #tpu.core_type<tc>, window_params = [{transform_indices = @transform_0, window_bounds = array<i64: 1000, 16>}, {pipeline_mode = #tpu.pipeline_mode<synchronous>, transform_indices = @transform_1, window_bounds = array<i64: 16, 32>}, {pipeline_mode = #tpu.pipeline_mode<synchronous>, transform_indices = @transform_2, window_bounds = array<i64: 1, 32>}, {pipeline_mode = #tpu.pipeline_mode<synchronous>, transform_indices = @transform_3, window_bounds = array<i64: 32, 32>}, {pipeline_mode = #tpu.pipeline_mode<synchronous>, transform_indices = @transform_4, window_bounds = array<i64: 1, 32>}, {pipeline_mode = #tpu.pipeline_mode<synchronous>, transform_indices = @transform_5, window_bounds = array<i64: 32, 8>}, {pipeline_mode = #tpu.pipeline_mode<synchronous>, transform_indices = @transform_6, window_bounds = array<i64: 1, 8>}, {transform_indices = @transform_7, window_bounds = array<i64: 1000, 8>}]} {
    %c0 = arith.constant 0 : index
    %c0_0 = arith.constant 0 : index
    %0 = vector.load %arg1[%c0, %c0_0] : memref<1000x16xf32, #tpu.memory_space<vmem>>, vector<1000x16xf32>
    %1 = arith.truncf %0 : vector<1000x16xf32> to vector<1000x16xbf16>
    %c0_1 = arith.constant 0 : index
    %c0_2 = arith.constant 0 : index
    %2 = vector.load %arg2[%c0_1, %c0_2] : memref<16x32xbf16, #tpu.memory_space<vmem>>, vector<16x32xbf16>
    %cst = arith.constant dense<0.000000e+00> : vector<1000x32xf32>
    %3 = tpu.matmul %1, %2, %cst {dimension_numbers = #tpu.dot_dimension_numbers<[1], [0], [0], [1], [0, 0, 1, 1], [], []>} : vector<1000x16xbf16>, vector<16x32xbf16>, vector<1000x32xf32> -> vector<1000x32xf32>
    %c0_3 = arith.constant 0 : index
    %c0_4 = arith.constant 0 : index
    %4 = vector.load %arg3[%c0_3, %c0_4] : memref<1x32xf32, #tpu.memory_space<vmem>>, vector<1x32xf32>
    %5 = vector.broadcast %4 : vector<1x32xf32> to vector<1000x32xf32>
    %6 = arith.addf %3, %5 : vector<1000x32xf32>
    %cst_5 = arith.constant 0.000000e+00 : f32
    %7 = vector.broadcast %cst_5 : f32 to vector<1000x32xf32>
    %8 = arith.maximumf %6, %7 : vector<1000x32xf32>
    %9 = arith.truncf %8 : vector<1000x32xf32> to vector<1000x32xbf16>
    %c0_6 = arith.constant 0 : index
    %c0_7 = arith.constant 0 : index
    %10 = vector.load %arg4[%c0_6, %c0_7] : memref<32x32xbf16, #tpu.memory_space<vmem>>, vector<32x32xbf16>
    %cst_8 = arith.constant dense<0.000000e+00> : vector<1000x32xf32>
    %11 = tpu.matmul %9, %10, %cst_8 {dimension_numbers = #tpu.dot_dimension_numbers<[1], [0], [0], [1], [0, 0, 1, 1], [], []>} : vector<1000x32xbf16>, vector<32x32xbf16>, vector<1000x32xf32> -> vector<1000x32xf32>
    %c0_9 = arith.constant 0 : index
    %c0_10 = arith.constant 0 : index
    %12 = vector.load %arg5[%c0_9, %c0_10] : memref<1x32xf32, #tpu.memory_space<vmem>>, vector<1x32xf32>
    %13 = vector.broadcast %12 : vector<1x32xf32> to vector<1000x32xf32>
    %14 = arith.addf %11, %13 : vector<1000x32xf32>
    %cst_11 = arith.constant 0.000000e+00 : f32
    %15 = vector.broadcast %cst_11 : f32 to vector<1000x32xf32>
    %16 = arith.maximumf %14, %15 : vector<1000x32xf32>
    %17 = arith.truncf %16 : vector<1000x32xf32> to vector<1000x32xbf16>
    %c0_12 = arith.constant 0 : index
    %c0_13 = arith.constant 0 : index
    %18 = vector.load %arg6[%c0_12, %c0_13] : memref<32x8xbf16, #tpu.memory_space<vmem>>, vector<32x8xbf16>
    %cst_14 = arith.constant dense<0.000000e+00> : vector<1000x8xf32>
    %19 = tpu.matmul %17, %18, %cst_14 {dimension_numbers = #tpu.dot_dimension_numbers<[1], [0], [0], [1], [0, 0, 1, 1], [], []>} : vector<1000x32xbf16>, vector<32x8xbf16>, vector<1000x8xf32> -> vector<1000x8xf32>
    %c0_15 = arith.constant 0 : index
    %c0_16 = arith.constant 0 : index
    %20 = vector.load %arg7[%c0_15, %c0_16] : memref<1x8xf32, #tpu.memory_space<vmem>>, vector<1x8xf32>
    %21 = vector.broadcast %20 : vector<1x8xf32> to vector<1000x8xf32>
    %22 = arith.addf %19, %21 : vector<1000x8xf32>
    %23 = math.tanh %22 : vector<1000x8xf32>
    %c0_17 = arith.constant 0 : index
    %c0_18 = arith.constant 0 : index
    %24 = vector.load %arg8[%c0_17, %c0_18] : memref<1000x8xf32, #tpu.memory_space<vmem>>, vector<1000x8xf32>
    tpu.vector_store %arg8[%c0_17, %c0_18], %23 {strides = array<i32>} : memref<1000x8xf32, #tpu.memory_space<vmem>>, vector<1000x8xf32>,
    return
  }
  func.func @transform_0(%arg0: i32) -> (i32, i32) {
    %c0_i32 = arith.constant 0 : i32
    %c0_i32_0 = arith.constant 0 : i32
    return %arg0, %c0_i32 : i32, i32
  }
  func.func @transform_1(%arg0: i32) -> (i32, i32) {
    %c0_i32 = arith.constant 0 : i32
    %c0_i32_0 = arith.constant 0 : i32
    %c0_i32_1 = arith.constant 0 : i32
    return %c0_i32, %c0_i32_0 : i32, i32
  }
  func.func @transform_2(%arg0: i32) -> (i32, i32) {
    %c0_i32 = arith.constant 0 : i32
    %c0_i32_0 = arith.constant 0 : i32
    %c0_i32_1 = arith.constant 0 : i32
    return %c0_i32, %c0_i32_0 : i32, i32
  }
  func.func @transform_3(%arg0: i32) -> (i32, i32) {
    %c0_i32 = arith.constant 0 : i32
    %c0_i32_0 = arith.constant 0 : i32
    %c0_i32_1 = arith.constant 0 : i32
    return %c0_i32, %c0_i32_0 : i32, i32
  }
  func.func @transform_4(%arg0: i32) -> (i32, i32) {
    %c0_i32 = arith.constant 0 : i32
    %c0_i32_0 = arith.constant 0 : i32
    %c0_i32_1 = arith.constant 0 : i32
    return %c0_i32, %c0_i32_0 : i32, i32
  }
  func.func @transform_5(%arg0: i32) -> (i32, i32) {
    %c0_i32 = arith.constant 0 : i32
    %c0_i32_0 = arith.constant 0 : i32
    %c0_i32_1 = arith.constant 0 : i32
    return %c0_i32, %c0_i32_0 : i32, i32
  }
  func.func @transform_6(%arg0: i32) -> (i32, i32) {
    %c0_i32 = arith.constant 0 : i32
    %c0_i32_0 = arith.constant 0 : i32
    %c0_i32_1 = arith.constant 0 : i32
    return %c0_i32, %c0_i32_0 : i32, i32
  }
  func.func @transform_7(%arg0: i32) -> (i32, i32) {
    %c0_i32 = arith.constant 0 : i32
    %c0_i32_0 = arith.constant 0 : i32
    return %arg0, %c0_i32 : i32, i32
  }
}

</mosaic_0001>

<bundles_post_ra>
// kernel: deterministic_policy_forward.1
= control target key start
LH: loop header
LB: loop body
LE: loop exit
PB: predicated region body
PF: predicated region fallthrough
CT: control target
= control target key end

     0   :  { %v4506_v0 = vmov 0.0   ;;  %vm4507_vm0 = vmmov 0   ;;  %vm230_vm1 = vcmask 130048   ;;  %vm1167_vm2 = vcmask 261120   ;;  %s6713_s1 = inlined_call_operand.vmem [shape: bf16[16,32], index: 1, kind: input, shape index: {}]   ;;  %s6714_s0 = inlined_call_operand.vmem [shape: f32[1000,16], index: 0, kind: input, shape index: {}]   ;;  %s6715_s3 = inlined_call_operand.vmem [shape: bf16[32,32], index: 3, kind: input, shape index: {}]   ;;  %s6716_s5 = inlined_call_operand.vmem [shape: bf16[32,8], index: 5, kind: input, shape index: {}]   ;;  %s6717_s2 = inlined_call_operand.vmem [shape: f32[1,32], index: 2, kind: input, shape index: {}]   ;;  %s6718_s4 = inlined_call_operand.vmem [shape: f32[1,32], index: 4, kind: input, shape index: {}]   ;;  %s6719_s6 = inlined_call_operand.vmem [shape: f32[1,8], index: 6, kind: input, shape index: {}]   ;;  %s6720_s7 = inlined_call_operand.vmem [shape: f32[1000,8], index: 7, kind: output, shape index: {}]  }
   0x1   :  { %4241 = vmatprep.subr.bf16.mxu1 %v4506_v0  ;;  %v4245_v1 = vld [vmem:[%s6713_s1] sm:$0xff]   ;;  %3605 = vmatprep.mubr.msk.bf16.mxu1 %vm4507_vm0, %v4506_v0  ;;  %v92_v3 = vld [vmem:[%s6714_s0 + $0x208] sm:$0xff]  ;;  %v93_v8 = vld [vmem:[%s6714_s0 + $0x210] sm:$0xff]  ;;  %vm2954_vm3 = vcmask 64512  }
   0x2   :  { %v91_v2 = vld [vmem:[%s6714_s0 + $0x200] sm:$0xff]  ;;  %3475 = vmatprep.subr.bf16.mxu0 %v4506_v0  ;;  %3477 = vmatprep.mubr.msk.bf16.mxu0 %vm4507_vm0, %v4506_v0  ;;  %v4246_v5 = vld [vmem:[%s6715_s3 + $0x8] sm:$0xff]   ;;  %v94_v9 = vld [vmem:[%s6714_s0 + $0x218] sm:$0xff] }
   0x3   :  { %4242 = vmatpush3.bf16.msra.mxu1 %v4245_v1  ;;  %v184_v4 = vpack.c.bf16 %v92_v3, %v91_v2  ;;  %3476 = vmatpush3.bf16.msra.mxu0 %v4245_v1  ;;  %v27_v6 = vld [vmem:[%s6714_s0] sm:$0xff]  ;;  %v28_v7 = vld [vmem:[%s6714_s0 + $0x8] sm:$0xff]  ;;  %v185_v11 = vpack.c.bf16 %v94_v9, %v93_v8  ;;  %v29_v12 = vld [vmem:[%s6714_s0 + $0x10] sm:$0xff] }
   0x4   :  { %3729 = vmatprep.subr.bf16.mxu1 %v4506_v0  ;;  %3985 = vmatprep.subr.bf16.mxu0 %v4506_v0  ;;  %v152_v10 = vpack.c.bf16 %v28_v7, %v27_v6  ;;  %v30_v13 = vld [vmem:[%s6714_s0 + $0x18] sm:$0xff]  ;;  %v95_v15 = vld [vmem:[%s6714_s0 + $0x220] sm:$0xff]  ;;  %v96_v16 = vld [vmem:[%s6714_s0 + $0x228] sm:$0xff] }
   0x5   :  { %v153_v14 = vpack.c.bf16 %v30_v13, %v29_v12  ;;  %v186_v17 = vpack.c.bf16 %v96_v16, %v95_v15  ;;  %v31_v18 = vld [vmem:[%s6714_s0 + $0x20] sm:$0xff]  ;;  %v32_v19 = vld [vmem:[%s6714_s0 + $0x28] sm:$0xff]  ;;  %v97_v22 = vld [vmem:[%s6714_s0 + $0x230] sm:$0xff] }
   0x6   :  { %3606 = vmatmul.mubr.msk.bf16.vlgmr.msra.gmra.mxu1 %vm230_vm1, %v184_v4  ;;  %3478 = vmatmul.mubr.msk.bf16.vlgmr.msra.gmra.mxu0 %vm230_vm1, %v152_v10  ;;  %v154_v20 = vpack.c.bf16 %v32_v19, %v31_v18  ;;  %v4247_v21 = vld [vmem:[%s6715_s3] sm:$0xff]   ;;  %v98_v23 = vld [vmem:[%s6714_s0 + $0x238] sm:$0xff]  ;;  %v33_v25 = vld [vmem:[%s6714_s0 + $0x30] sm:$0xff] }
   0x7   :  { %3730 = vmatpush3.bf16.msra.mxu1 %v4246_v5  ;;  %3609 = vmatprep.mubr.msk.bf16.mxu1 %vm4507_vm0, %v4506_v0  ;;  %v187_v24 = vpack.c.bf16 %v98_v23, %v97_v22  ;;  %v34_v26 = vld [vmem:[%s6714_s0 + $0x38] sm:$0xff]  ;;  %v99_v28 = vld [vmem:[%s6714_s0 + $0x240] sm:$0xff]  ;;  %v100_v29 = vld [vmem:[%s6714_s0 + $0x248] sm:$0xff] }
   0x8   :  { %3731 = vmatprep.subr.bf16.mxu1 %v4506_v0  ;;  %3481 = vmatprep.mubr.msk.bf16.mxu0 %vm4507_vm0, %v4506_v0  ;;  %v155_v27 = vpack.c.bf16 %v34_v26, %v33_v25  ;;  %v188_v30 = vpack.c.bf16 %v100_v29, %v99_v28  ;;  %v35_v31 = vld [vmem:[%s6714_s0 + $0x40] sm:$0xff]  ;;  %v36_v32 = vld [vmem:[%s6714_s0 + $0x48] sm:$0xff]  ;;  %v101_v34 = vld [vmem:[%s6714_s0 + $0x250] sm:$0xff] }
   0x9   :  { %v156_v33 = vpack.c.bf16 %v36_v32, %v35_v31  ;;  %v102_v35 = vld [vmem:[%s6714_s0 + $0x258] sm:$0xff]  ;;  %v37_v37 = vld [vmem:[%s6714_s0 + $0x50] sm:$0xff]  ;;  %v103_v40 = vld [vmem:[%s6714_s0 + $0x260] sm:$0xff] }
   0xa   :  { %v189_v36 = vpack.c.bf16 %v102_v35, %v101_v34  ;;  %v38_v38 = vld [vmem:[%s6714_s0 + $0x58] sm:$0xff]  ;;  %v104_v41 = vld [vmem:[%s6714_s0 + $0x268] sm:$0xff]  ;;  %v39_v43 = vld [vmem:[%s6714_s0 + $0x60] sm:$0xff] }
   0xb   :  { %3732 = vmatpush3.bf16.msra.mxu1 %v4247_v21  ;;  %v157_v39 = vpack.c.bf16 %v38_v38, %v37_v37  ;;  %v190_v42 = vpack.c.bf16 %v104_v41, %v103_v40  ;;  %v40_v44 = vld [vmem:[%s6714_s0 + $0x68] sm:$0xff]  ;;  %v105_v46 = vld [vmem:[%s6714_s0 + $0x270] sm:$0xff]  ;;  %v106_v47 = vld [vmem:[%s6714_s0 + $0x278] sm:$0xff] }
   0xc   :  { %v158_v45 = vpack.c.bf16 %v40_v44, %v39_v43  ;;  %v191_v48 = vpack.c.bf16 %v106_v47, %v105_v46  ;;  %v41_v49 = vld [vmem:[%s6714_s0 + $0x70] sm:$0xff]  ;;  %v42_v50 = vld [vmem:[%s6714_s0 + $0x78] sm:$0xff]  ;;  %v107_v52 = vld [vmem:[%s6714_s0 + $0x280] sm:$0xff] }
   0xd   :  { %v159_v51 = vpack.c.bf16 %v42_v50, %v41_v49  ;;  %v108_v53 = vld [vmem:[%s6714_s0 + $0x288] sm:$0xff]  ;;  %v43_v55 = vld [vmem:[%s6714_s0 + $0x80] sm:$0xff]  ;;  %v109_v58 = vld [vmem:[%s6714_s0 + $0x290] sm:$0xff] }
   0xe   :  { %3610 = vmatmul.mubr.msk.bf16.gmra.mxu1 %vm230_vm1, %v185_v11  ;;  %3482 = vmatmul.mubr.msk.bf16.gmra.mxu0 %vm230_vm1, %v153_v14  ;;  %v192_v54 = vpack.c.bf16 %v108_v53, %v107_v52  ;;  %v44_v56 = vld [vmem:[%s6714_s0 + $0x88] sm:$0xff]  ;;  %v110_v59 = vld [vmem:[%s6714_s0 + $0x298] sm:$0xff]  ;;  %v45_v61 = vld [vmem:[%s6714_s0 + $0x90] sm:$0xff] }
   0xf   :  { %3613 = vmatprep.mubr.msk.bf16.mxu1 %vm4507_vm0, %v4506_v0  ;;  %3485 = vmatprep.mubr.msk.bf16.mxu0 %vm4507_vm0, %v4506_v0  ;;  %v160_v57 = vpack.c.bf16 %v44_v56, %v43_v55  ;;  %v193_v60 = vpack.c.bf16 %v110_v59, %v109_v58  ;;  %v46_v62 = vld [vmem:[%s6714_s0 + $0x98] sm:$0xff]  ;;  %v111_v1 = vld [vmem:[%s6714_s0 + $0x2a0] sm:$0xff]  ;;  %v112_v2 = vld [vmem:[%s6714_s0 + $0x2a8] sm:$0xff] }
  0x10   :  { %v161_v63 = vpack.c.bf16 %v46_v62, %v45_v61  ;;  %v4248_v3 = vld [vmem:[%s6716_s5 + $0x8] sm:$0xff]   ;;  %v194_v4 = vpack.c.bf16 %v112_v2, %v111_v1  ;;  %v47_v5 = vld [vmem:[%s6714_s0 + $0xa0] sm:$0xff]  ;;  %v113_v8 = vld [vmem:[%s6714_s0 + $0x2b0] sm:$0xff] }
  0x11   :  { %v48_v6 = vld [vmem:[%s6714_s0 + $0xa8] sm:$0xff]  ;;  %3986 = vmatpush3.bf16.msra.mxu0 %v4248_v3  ;;  %v114_v9 = vld [vmem:[%s6714_s0 + $0x2b8] sm:$0xff]  ;;  %v49_v11 = vld [vmem:[%s6714_s0 + $0xb0] sm:$0xff] }
  0x12   :  { %3987 = vmatprep.subr.bf16.mxu0 %v4506_v0  ;;  %v162_v7 = vpack.c.bf16 %v48_v6, %v47_v5  ;;  %v195_v10 = vpack.c.bf16 %v114_v9, %v113_v8  ;;  %v50_v12 = vld [vmem:[%s6714_s0 + $0xb8] sm:$0xff]  ;;  %v115_v14 = vld [vmem:[%s6714_s0 + $0x2c0] sm:$0xff]  ;;  %v116_v15 = vld [vmem:[%s6714_s0 + $0x2c8] sm:$0xff] }
  0x13   :  { %v163_v13 = vpack.c.bf16 %v50_v12, %v49_v11  ;;  %v196_v16 = vpack.c.bf16 %v116_v15, %v115_v14  ;;  %v52_v18 = vld [vmem:[%s6714_s0 + $0xc8] sm:$0xff]  ;;  %v118_v21 = vld [vmem:[%s6714_s0 + $0x2d8] sm:$0xff]  ;;  %v53_v23 = vld [vmem:[%s6714_s0 + $0xd0] sm:$0xff] }
  0x14   :  { %v119_v26 = vld [vmem:[%s6714_s0 + $0x2e0] sm:$0xff]  ;;  %v121_v32 = vld [vmem:[%s6714_s0 + $0x2f0] sm:$0xff]  ;;  %v68_v3 = vld [vmem:[%s6714_s0 + $0x148] sm:$0xff] }
  0x15   :  { %v55_v29 = vld [vmem:[%s6714_s0 + $0xe0] sm:$0xff]  ;;  %v57_v35 = vld [vmem:[%s6714_s0 + $0xf0] sm:$0xff]  ;;  %v134_v6 = vld [vmem:[%s6714_s0 + $0x358] sm:$0xff] }
  0x16   :  { %3614 = vmatmul.mubr.msk.bf16.gmra.mxu1 %vm230_vm1, %v186_v17  ;;  %3486 = vmatmul.mubr.msk.bf16.gmra.mxu0 %vm230_vm1, %v154_v20  ;;  %v51_v17 = vld [vmem:[%s6714_s0 + $0xc0] sm:$0xff]  ;;  %v117_v20 = vld [vmem:[%s6714_s0 + $0x2d0] sm:$0xff]  ;;  %v70_v9 = vld [vmem:[%s6714_s0 + $0x158] sm:$0xff] }
  0x17   :  { %3617 = vmatprep.mubr.msk.bf16.mxu1 %vm4507_vm0, %v4506_v0  ;;  %3489 = vmatprep.mubr.msk.bf16.mxu0 %vm4507_vm0, %v4506_v0  ;;  %v164_v19 = vpack.c.bf16 %v52_v18, %v51_v17  ;;  %v197_v22 = vpack.c.bf16 %v118_v21, %v117_v20  ;;  %v123_v38 = vld [vmem:[%s6714_s0 + $0x300] sm:$0xff]  ;;  %v125_v44 = vld [vmem:[%s6714_s0 + $0x310] sm:$0xff]  ;;  %v136_v12 = vld [vmem:[%s6714_s0 + $0x368] sm:$0xff] }
  0x18   :  { %v59_v41 = vld [vmem:[%s6714_s0 + $0x100] sm:$0xff]  ;;  %v61_v47 = vld [vmem:[%s6714_s0 + $0x110] sm:$0xff]  ;;  %v72_v15 = vld [vmem:[%s6714_s0 + $0x168] sm:$0xff] }
  0x19   :  { %v127_v50 = vld [vmem:[%s6714_s0 + $0x320] sm:$0xff]  ;;  %v129_v56 = vld [vmem:[%s6714_s0 + $0x330] sm:$0xff]  ;;  %v138_v18 = vld [vmem:[%s6714_s0 + $0x378] sm:$0xff] }
  0x1a   :  { %v63_v53 = vld [vmem:[%s6714_s0 + $0x120] sm:$0xff]  ;;  %v65_v59 = vld [vmem:[%s6714_s0 + $0x130] sm:$0xff]  ;;  %v74_v21 = vld [vmem:[%s6714_s0 + $0x178] sm:$0xff] }
  0x1b   :  { %v131_v62 = vld [vmem:[%s6714_s0 + $0x340] sm:$0xff]  ;;  %v133_v5 = vld [vmem:[%s6714_s0 + $0x350] sm:$0xff] }
  0x1c   :  { %v67_v2 = vld [vmem:[%s6714_s0 + $0x140] sm:$0xff]  ;;  %v69_v8 = vld [vmem:[%s6714_s0 + $0x150] sm:$0xff] }
  0x1d   :  { %v135_v11 = vld [vmem:[%s6714_s0 + $0x360] sm:$0xff]  ;;  %v137_v17 = vld [vmem:[%s6714_s0 + $0x370] sm:$0xff] }
  0x1e   :  { %3618 = vmatmul.mubr.msk.bf16.gmra.mxu1 %vm230_vm1, %v187_v24  ;;  %3490 = vmatmul.mubr.msk.bf16.gmra.mxu0 %vm230_vm1, %v155_v27  ;;  %v54_v24 = vld [vmem:[%s6714_s0 + $0xd8] sm:$0xff]  ;;  %v120_v27 = vld [vmem:[%s6714_s0 + $0x2e8] sm:$0xff]  ;;  %v71_v14 = vld [vmem:[%s6714_s0 + $0x160] sm:$0xff] }
  0x1f   :  { %3621 = vmatprep.mubr.msk.bf16.mxu1 %vm4507_vm0, %v4506_v0  ;;  %3493 = vmatprep.mubr.msk.bf16.mxu0 %vm4507_vm0, %v4506_v0  ;;  %v165_v25 = vpack.c.bf16 %v54_v24, %v53_v23  ;;  %v198_v28 = vpack.c.bf16 %v120_v27, %v119_v26  ;;  %v73_v20 = vld [vmem:[%s6714_s0 + $0x170] sm:$0xff]  ;;  %v139_v23 = vld [vmem:[%s6714_s0 + $0x380] sm:$0xff]  ;;  %v140_v24 = vld [vmem:[%s6714_s0 + $0x388] sm:$0xff] }
  0x20   :  { %v75_v26 = vld [vmem:[%s6714_s0 + $0x180] sm:$0xff]  ;;  %v76_v27 = vld [vmem:[%s6714_s0 + $0x188] sm:$0xff] }
  0x26   :  { %3622 = vmatmul.mubr.msk.bf16.gmra.mxu1 %vm230_vm1, %v188_v30  ;;  %3494 = vmatmul.mubr.msk.bf16.gmra.mxu0 %vm230_vm1, %v156_v33  ;;  %v56_v30 = vld [vmem:[%s6714_s0 + $0xe8] sm:$0xff]  ;;  %v122_v33 = vld [vmem:[%s6714_s0 + $0x2f8] sm:$0xff] }
  0x27   :  { %3625 = vmatprep.mubr.msk.bf16.mxu1 %vm4507_vm0, %v4506_v0  ;;  %3497 = vmatprep.mubr.msk.bf16.mxu0 %vm4507_vm0, %v4506_v0  ;;  %v166_v31 = vpack.c.bf16 %v56_v30, %v55_v29  ;;  %v199_v34 = vpack.c.bf16 %v122_v33, %v121_v32  ;;  %v5017_v29 = vld [vmem:[%s6717_s2] ss:$0 sm:$0xff]  ;;  %v142_v32 = vld [vmem:[%s6714_s0 + $0x398] sm:$0xff] }
  0x2e   :  { %3626 = vmatmul.mubr.msk.bf16.gmra.mxu1 %vm230_vm1, %v189_v36  ;;  %3498 = vmatmul.mubr.msk.bf16.gmra.mxu0 %vm230_vm1, %v157_v39  ;;  %v58_v36 = vld [vmem:[%s6714_s0 + $0xf8] sm:$0xff]  ;;  %v124_v39 = vld [vmem:[%s6714_s0 + $0x308] sm:$0xff] }
  0x2f   :  { %3629 = vmatprep.mubr.msk.bf16.mxu1 %vm4507_vm0, %v4506_v0  ;;  %3501 = vmatprep.mubr.msk.bf16.mxu0 %vm4507_vm0, %v4506_v0  ;;  %v167_v37 = vpack.c.bf16 %v58_v36, %v57_v35  ;;  %v200_v40 = vpack.c.bf16 %v124_v39, %v123_v38  ;;  %v77_v38 = vld [vmem:[%s6714_s0 + $0x190] sm:$0xff]  ;;  %v78_v39 = vld [vmem:[%s6714_s0 + $0x198] sm:$0xff] }
  0x36   :  { %3630 = vmatmul.mubr.msk.bf16.gmra.mxu1 %vm230_vm1, %v190_v42  ;;  %3502 = vmatmul.mubr.msk.bf16.gmra.mxu0 %vm230_vm1, %v158_v45  ;;  %v60_v42 = vld [vmem:[%s6714_s0 + $0x108] sm:$0xff]  ;;  %v126_v45 = vld [vmem:[%s6714_s0 + $0x318] sm:$0xff] }
  0x37   :  { %3633 = vmatprep.mubr.msk.bf16.mxu1 %vm4507_vm0, %v4506_v0  ;;  %3505 = vmatprep.mubr.msk.bf16.mxu0 %vm4507_vm0, %v4506_v0  ;;  %v168_v43 = vpack.c.bf16 %v60_v42, %v59_v41  ;;  %v201_v46 = vpack.c.bf16 %v126_v45, %v125_v44 }
  0x3e   :  { %3634 = vmatmul.mubr.msk.bf16.gmra.mxu1 %vm230_vm1, %v191_v48  ;;  %3506 = vmatmul.mubr.msk.bf16.gmra.mxu0 %vm230_vm1, %v159_v51  ;;  %v62_v48 = vld [vmem:[%s6714_s0 + $0x118] sm:$0xff]  ;;  %v128_v51 = vld [vmem:[%s6714_s0 + $0x328] sm:$0xff] }
  0x3f   :  { %3637 = vmatprep.mubr.msk.bf16.mxu1 %vm4507_vm0, %v4506_v0  ;;  %3509 = vmatprep.mubr.msk.bf16.mxu0 %vm4507_vm0, %v4506_v0  ;;  %v169_v49 = vpack.c.bf16 %v62_v48, %v61_v47  ;;  %v202_v52 = vpack.c.bf16 %v128_v51, %v127_v50  ;;  %v144_v50 = vld [vmem:[%s6714_s0 + $0x3a8] sm:$0xff] }
  0x46   :  { %3638 = vmatmul.mubr.msk.bf16.gmra.mxu1 %vm230_vm1, %v192_v54  ;;  %3510 = vmatmul.mubr.msk.bf16.gmra.mxu0 %vm230_vm1, %v160_v57  ;;  %v64_v54 = vld [vmem:[%s6714_s0 + $0x128] sm:$0xff]  ;;  %v130_v57 = vld [vmem:[%s6714_s0 + $0x338] sm:$0xff] }
  0x47   :  { %3641 = vmatprep.mubr.msk.bf16.mxu1 %vm4507_vm0, %v4506_v0  ;;  %3513 = vmatprep.mubr.msk.bf16.mxu0 %vm4507_vm0, %v4506_v0  ;;  %v170_v55 = vpack.c.bf16 %v64_v54, %v63_v53  ;;  %v203_v58 = vpack.c.bf16 %v130_v57, %v129_v56 }
  0x4e   :  { %3642 = vmatmul.mubr.msk.bf16.gmra.mxu1 %vm230_vm1, %v193_v60  ;;  %3514 = vmatmul.mubr.msk.bf16.gmra.mxu0 %vm230_vm1, %v161_v63  ;;  %v66_v60 = vld [vmem:[%s6714_s0 + $0x138] sm:$0xff]  ;;  %v132_v63 = vld [vmem:[%s6714_s0 + $0x348] sm:$0xff] }
  0x4f   :  { %3645 = vmatprep.mubr.msk.bf16.mxu1 %vm4507_vm0, %v4506_v0  ;;  %3517 = vmatprep.mubr.msk.bf16.mxu0 %vm4507_vm0, %v4506_v0  ;;  %v171_v61 = vpack.c.bf16 %v66_v60, %v65_v59  ;;  %v204_v1 = vpack.c.bf16 %v132_v63, %v131_v62  ;;  %v80_v59 = vld [vmem:[%s6714_s0 + $0x1a8] sm:$0xff] }
  0x56   :  { %3646 = vmatmul.mubr.msk.bf16.gmra.mxu1 %vm230_vm1, %v194_v4  ;;  %3518 = vmatmul.mubr.msk.bf16.gmra.mxu0 %vm230_vm1, %v162_v7  ;;  %v172_v4 = vpack.c.bf16 %v68_v3, %v67_v2  ;;  %v205_v7 = vpack.c.bf16 %v134_v6, %v133_v5  ;;  %v145_v6 = vld [vmem:[%s6714_s0 + $0x3b0] sm:$0xff] }
  0x57   :  { %3649 = vmatprep.mubr.msk.bf16.mxu1 %vm4507_vm0, %v4506_v0  ;;  %3521 = vmatprep.mubr.msk.bf16.mxu0 %vm4507_vm0, %v4506_v0 }
  0x5e   :  { %3650 = vmatmul.mubr.msk.bf16.gmra.mxu1 %vm230_vm1, %v195_v10  ;;  %3522 = vmatmul.mubr.msk.bf16.gmra.mxu0 %vm230_vm1, %v163_v13  ;;  %v173_v10 = vpack.c.bf16 %v70_v9, %v69_v8  ;;  %v206_v13 = vpack.c.bf16 %v136_v12, %v135_v11 }
  0x5f   :  { %3653 = vmatprep.mubr.msk.bf16.mxu1 %vm4507_vm0, %v4506_v0  ;;  %3525 = vmatprep.mubr.msk.bf16.mxu0 %vm4507_vm0, %v4506_v0 }
  0x66   :  { %3654 = vmatmul.mubr.msk.bf16.gmra.mxu1 %vm230_vm1, %v196_v16  ;;  %3526 = vmatmul.mubr.msk.bf16.gmra.mxu0 %vm230_vm1, %v164_v19  ;;  %v174_v16 = vpack.c.bf16 %v72_v15, %v71_v14  ;;  %v207_v19 = vpack.c.bf16 %v138_v18, %v137_v17  ;;  %v81_v14 = vld [vmem:[%s6714_s0 + $0x1b0] sm:$0xff]  ;;  %v82_v15 = vld [vmem:[%s6714_s0 + $0x1b8] sm:$0xff] }
  0x67   :  { %3657 = vmatprep.mubr.msk.bf16.mxu1 %vm4507_vm0, %v4506_v0  ;;  %3529 = vmatprep.mubr.msk.bf16.mxu0 %vm4507_vm0, %v4506_v0 }
  0x6e   :  { %3658 = vmatmul.mubr.msk.bf16.gmra.mxu1 %vm230_vm1, %v197_v22  ;;  %3530 = vmatmul.mubr.msk.bf16.gmra.mxu0 %vm230_vm1, %v165_v25  ;;  %v175_v22 = vpack.c.bf16 %v74_v21, %v73_v20  ;;  %v208_v25 = vpack.c.bf16 %v140_v24, %v139_v23 }
  0x6f   :  { %3661 = vmatprep.mubr.msk.bf16.mxu1 %vm4507_vm0, %v4506_v0  ;;  %3533 = vmatprep.mubr.msk.bf16.mxu0 %vm4507_vm0, %v4506_v0 }
  0x76   :  { %3662 = vmatmul.mubr.msk.bf16.gmra.mxu1 %vm230_vm1, %v198_v28  ;;  %3534 = vmatmul.mubr.msk.bf16.gmra.mxu0 %vm230_vm1, %v166_v31  ;;  %v176_v28 = vpack.c.bf16 %v76_v27, %v75_v26  ;;  %v141_v31 = vld [vmem:[%s6714_s0 + $0x390] sm:$0xff]  ;;  %v148_v26 = vld [vmem:[%s6714_s0 + $0x3c8] sm:$0xff] }
  0x77   :  { %3665 = vmatprep.mubr.msk.bf16.mxu1 %vm4507_vm0, %v4506_v0  ;;  %3537 = vmatprep.mubr.msk.bf16.mxu0 %vm4507_vm0, %v4506_v0 }
  0x7e   :  { %3666 = vmatmul.mubr.msk.bf16.gmra.mxu1 %vm230_vm1, %v199_v34  ;;  %3538 = vmatmul.mubr.msk.bf16.gmra.mxu0 %vm230_vm1, %v167_v37  ;;  %v209_v37 = vpack.c.bf16 %v142_v32, %v141_v31 }
  0x7f   :  { %3669 = vmatprep.mubr.msk.bf16.mxu1 %vm4507_vm0, %v4506_v0  ;;  %3541 = vmatprep.mubr.msk.bf16.mxu0 %vm4507_vm0, %v4506_v0 }
  0x86   :  { %3670 = vmatmul.mubr.msk.bf16.gmra.mxu1 %vm230_vm1, %v200_v40  ;;  %3542 = vmatmul.mubr.msk.bf16.gmra.mxu0 %vm230_vm1, %v168_v43 }
  0x87   :  { %3673 = vmatprep.mubr.msk.bf16.mxu1 %vm4507_vm0, %v4506_v0  ;;  %3545 = vmatprep.mubr.msk.bf16.mxu0 %vm4507_vm0, %v4506_v0 }
  0x8e   :  { %3674 = vmatmul.mubr.msk.bf16.gmra.mxu1 %vm230_vm1, %v201_v46  ;;  %3546 = vmatmul.mubr.msk.bf16.gmra.mxu0 %vm230_vm1, %v169_v49  ;;  %v177_v46 = vpack.c.bf16 %v78_v39, %v77_v38  ;;  %v143_v49 = vld [vmem:[%s6714_s0 + $0x3a0] sm:$0xff] }
  0x8f   :  { %3677 = vmatprep.mubr.msk.bf16.mxu1 %vm4507_vm0, %v4506_v0  ;;  %3549 = vmatprep.mubr.msk.bf16.mxu0 %vm4507_vm0, %v4506_v0  ;;  %v210_v57 = vpack.c.bf16 %v144_v50, %v143_v49  ;;  %v150_v49 = vld [vmem:[%s6714_s0 + $0x3d8] sm:$0xff] }
  0x96   :  { %3678 = vmatmul.mubr.msk.bf16.gmra.mxu1 %vm230_vm1, %v202_v52  ;;  %3550 = vmatmul.mubr.msk.bf16.gmra.mxu0 %vm230_vm1, %v170_v55  ;;  %v4249_v52 = vld [vmem:[%s6716_s5] sm:$0xff]  }
  0x97   :  { %3681 = vmatprep.mubr.msk.bf16.mxu1 %vm4507_vm0, %v4506_v0  ;;  %3553 = vmatprep.mubr.msk.bf16.mxu0 %vm4507_vm0, %v4506_v0 }
  0x98   :  { %3988 = vmatpush3.bf16.msra.mxu0 %v4249_v52 }
  0x9e   :  { %3682 = vmatmul.mubr.msk.bf16.gmra.mxu1 %vm230_vm1, %v203_v58  ;;  %3554 = vmatmul.mubr.msk.bf16.gmra.mxu0 %vm230_vm1, %v171_v61  ;;  %v79_v58 = vld [vmem:[%s6714_s0 + $0x1a0] sm:$0xff] }
  0x9f   :  { %3685 = vmatprep.mubr.msk.bf16.mxu1 %vm4507_vm0, %v4506_v0  ;;  %3557 = vmatprep.mubr.msk.bf16.mxu0 %vm4507_vm0, %v4506_v0  ;;  %v178_v3 = vpack.c.bf16 %v80_v59, %v79_v58  ;;  %v86_v58 = vld [vmem:[%s6714_s0 + $0x1d8] sm:$0xff] }
  0xa6   :  { %3686 = vmatmul.mubr.msk.bf16.gmra.mxu1 %vm230_vm1, %v204_v1  ;;  %3558 = vmatmul.mubr.msk.bf16.gmra.mxu0 %vm230_vm1, %v172_v4 }
  0xa7   :  { %3689 = vmatprep.mubr.msk.bf16.mxu1 %vm4507_vm0, %v4506_v0  ;;  %3561 = vmatprep.mubr.msk.bf16.mxu0 %vm4507_vm0, %v4506_v0 }
  0xae   :  { %3690 = vmatmul.mubr.msk.bf16.gmra.mxu1 %vm230_vm1, %v205_v7  ;;  %3562 = vmatmul.mubr.msk.bf16.gmra.mxu0 %vm230_vm1, %v173_v10  ;;  %v146_v7 = vld [vmem:[%s6714_s0 + $0x3b8] sm:$0xff] }
  0xaf   :  { %3693 = vmatprep.mubr.msk.bf16.mxu1 %vm4507_vm0, %v4506_v0  ;;  %3565 = vmatprep.mubr.msk.bf16.mxu0 %vm4507_vm0, %v4506_v0 }
  0xb6   :  { %3694 = vmatmul.mubr.msk.bf16.gmra.mxu1 %vm230_vm1, %v206_v13  ;;  %3566 = vmatmul.mubr.msk.bf16.gmra.mxu0 %vm230_vm1, %v174_v16  ;;  %v211_v13 = vpack.c.bf16 %v146_v7, %v145_v6  ;;  %v151_v7 = vld [vmem:[%s6714_s0 + $0x3e0] sm:$0xff] }
  0xb7   :  { %3697 = vmatprep.mubr.msk.bf16.mxu1 %vm4507_vm0, %v4506_v0  ;;  %3569 = vmatprep.mubr.msk.bf16.mxu0 %vm4507_vm0, %v4506_v0 }
  0xbe   :  { %3698 = vmatmul.mubr.msk.bf16.gmra.mxu1 %vm230_vm1, %v207_v19  ;;  %3570 = vmatmul.mubr.msk.bf16.gmra.mxu0 %vm230_vm1, %v175_v22  ;;  %v179_v22 = vpack.c.bf16 %v82_v15, %v81_v14  ;;  %v214_v14 = vpack.c.bf16 %v151_v7, %v151_v7  ;;  %v87_v15 = vld [vmem:[%s6714_s0 + $0x1e0] sm:$0xff] }
  0xbf   :  { %3701 = vmatprep.mubr.msk.bf16.mxu1 %vm4507_vm0, %v4506_v0  ;;  %3573 = vmatprep.mubr.msk.bf16.mxu0 %vm4507_vm0, %v4506_v0 }
  0xc6   :  { %v710_v30 = vpop.f32.mrf.mxu1  ;;  %3702 = vmatmul.mubr.msk.bf16.gmra.mxu1 %vm230_vm1, %v208_v25  ;;  %v5029_v35 = vpop.f32.mrf.mxu0  ;;  %3574 = vmatmul.mubr.msk.bf16.gmra.mxu0 %vm230_vm1, %v176_v28  ;;  %v147_v25 = vld [vmem:[%s6714_s0 + $0x3c0] sm:$0xff] }
  0xc7   :  { %3705 = vmatprep.mubr.msk.bf16.mxu1 %vm4507_vm0, %v4506_v0  ;;  %v711_v34 = vadd.f32 %v5017_v29, %v710_v30  ;;  %3577 = vmatprep.mubr.msk.bf16.mxu0 %vm4507_vm0, %v4506_v0 }
  0xc8   :  { %v3607_v33 = vpop.f32.mrf.mxu1  ;;  %v3479_v41 = vpop.f32.mrf.mxu0 }
  0xc9   :  { %v1020_v43 = vmax.f32 %v711_v34, 0.0  ;;  %v212_v33 = vpack.c.bf16 %v148_v26, %v147_v25  ;;  %v83_v34 = vld [vmem:[%s6714_s0 + $0x1c0] sm:$0xff] }
  0xca   :  { %v713_v36 = vpop.f32.mrf.mxu1  ;;  %v5041_v45 = vpop.f32.mrf.mxu0 }
  0xcb   :  { %v714_v40 = vadd.f32 %v5017_v29, %v713_v36  ;;  %v84_v36 = vld [vmem:[%s6714_s0 + $0x1c8] sm:$0xff] }
  0xcc   :  { %v3608_v42 = vpop.f32.mrf.mxu1  ;;  %v3480_v51 = vpop.f32.mrf.mxu0 }
  0xcd   :  { %v1021_v44 = vmax.f32 %v714_v40, 0.0 }
  0xce   :  { %v718_v47 = vpop.f32.mrf.mxu1  ;;  %3706 = vmatmul.mubr.msk.bf16.gmra.mxu1 %vm230_vm1, %v209_v37  ;;  %v5058_v55 = vpop.f32.mrf.mxu0  ;;  %3578 = vmatmul.mubr.msk.bf16.gmra.mxu0 %vm230_vm1, %v177_v46 }
  0xcf   :  { %v5044_v48 = vpack.c.bf16 %v1021_v44, %v1020_v43  ;;  %3709 = vmatprep.mubr.msk.bf16.mxu1 %vm4507_vm0, %v4506_v0  ;;  %v719_v54 = vadd.f32 %v5017_v29, %v718_v47  ;;  %3581 = vmatprep.mubr.msk.bf16.mxu0 %vm4507_vm0, %v4506_v0  ;;  %v180_v43 = vpack.c.bf16 %v84_v36, %v83_v34  ;;  %v149_v47 = vld [vmem:[%s6714_s0 + $0x3d0] sm:$0xff] }
  0xd0   :  { %v3611_v53 = vpop.f32.mrf.mxu1  ;;  %v3483_v61 = vpop.f32.mrf.mxu0 }
  0xd1   :  { %v1022_v63 = vmax.f32 %v719_v54, 0.0 }
  0xd2   :  { %v721_v56 = vpop.f32.mrf.mxu1  ;;  %v5070_v2 = vpop.f32.mrf.mxu0 }
  0xd3   :  { %v722_v60 = vadd.f32 %v5017_v29, %v721_v56  ;;  %v213_v56 = vpack.c.bf16 %v150_v49, %v149_v47  ;;  %v466_v47 = vadd.f32 %v5017_v29, %v5070_v2 }
  0xd4   :  { %v3612_v62 = vpop.f32.mrf.mxu1  ;;  %v3484_v8 = vpop.f32.mrf.mxu0 }
  0xd5   :  { %v1023_v1 = vmax.f32 %v722_v60, 0.0 }
  0xd6   :  { %v726_v4 = vpop.f32.mrf.mxu1  ;;  %3710 = vmatmul.mubr.msk.bf16.gmra.mxu1 %vm230_vm1, %v210_v57  ;;  %v5084_v11 = vpop.f32.mrf.mxu0  ;;  %3582 = vmatmul.mubr.msk.bf16.gmra.mxu0 %vm230_vm1, %v178_v3  ;;  %v85_v57 = vld [vmem:[%s6714_s0 + $0x1d0] sm:$0xff] }
  0xd7   :  { %v5073_v5 = vpack.c.bf16 %v1023_v1, %v1022_v63  ;;  %3713 = vmatprep.mubr.msk.bf16.mxu1 %vm4507_vm0, %v4506_v0  ;;  %v727_v10 = vadd.f32 %v5017_v29, %v726_v4  ;;  %3585 = vmatprep.mubr.msk.bf16.mxu0 %vm4507_vm0, %v4506_v0  ;;  %v181_v3 = vpack.c.bf16 %v86_v58, %v85_v57 }
  0xd8   :  { %v3615_v9 = vpop.f32.mrf.mxu1  ;;  %v3487_v17 = vpop.f32.mrf.mxu0  ;;  %v471_v7 = vadd.f32 %v5017_v29, %v5084_v11 }
  0xd9   :  { %v1024_v19 = vmax.f32 %v727_v10, 0.0 }
  0xda   :  { %v729_v12 = vpop.f32.mrf.mxu1  ;;  %v5096_v21 = vpop.f32.mrf.mxu0 }
  0xdb   :  { %v730_v16 = vadd.f32 %v5017_v29, %v729_v12 }
  0xdc   :  { %v3616_v18 = vpop.f32.mrf.mxu1  ;;  %v3488_v27 = vpop.f32.mrf.mxu0 }
  0xdd   :  { %v1025_v20 = vmax.f32 %v730_v16, 0.0  ;;  %v88_v16 = vld [vmem:[%s6714_s0 + $0x1e8] sm:$0xff] }
  0xde   :  { %v734_v23 = vpop.f32.mrf.mxu1  ;;  %3714 = vmatmul.mubr.msk.bf16.gmra.mxu1 %vm230_vm1, %v211_v13  ;;  %v5110_v31 = vpop.f32.mrf.mxu0  ;;  %3586 = vmatmul.mubr.msk.bf16.gmra.mxu0 %vm230_vm1, %v179_v22  ;;  %v182_v27 = vpack.c.bf16 %v88_v16, %v87_v15 }
  0xdf   :  { %v5099_v24 = vpack.c.bf16 %v1025_v20, %v1024_v19  ;;  %3717 = vmatprep.mubr.msk.bf16.mxu1 %vm4507_vm0, %v4506_v0  ;;  %v735_v30 = vadd.f32 %v5017_v29, %v734_v23  ;;  %3589 = vmatprep.mubr.msk.bf16.mxu0 %vm4507_vm0, %v4506_v0  ;;  %v455_v19 = vadd.f32 %v5017_v29, %v5029_v35 }
  0xe0   :  { %v3619_v28 = vpop.f32.mrf.mxu1  ;;  %v3491_v38 = vpop.f32.mrf.mxu0  ;;  %v458_v20 = vadd.f32 %v5017_v29, %v5041_v45 }
  0xe1   :  { %v1026_v40 = vmax.f32 %v735_v30, 0.0  ;;  %v89_v38 = vld [vmem:[%s6714_s0 + $0x1f0] sm:$0xff] }
  0xe2   :  { %v737_v32 = vpop.f32.mrf.mxu1  ;;  %v5122_v42 = vpop.f32.mrf.mxu0  ;;  %v957_v35 = vmax.f32 %v458_v20, 0.0 }
  0xe3   :  { %v738_v37 = vadd.f32 %v5017_v29, %v737_v32 }
  0xe4   :  { %v3620_v39 = vpop.f32.mrf.mxu1  ;;  %v3492_v50 = vpop.f32.mrf.mxu0 }
  0xe5   :  { %v1027_v41 = vmax.f32 %v738_v37, 0.0  ;;  %v90_v39 = vld [vmem:[%s6714_s0 + $0x1f8] sm:$0xff] }
  0xe6   :  { %v742_v44 = vpop.f32.mrf.mxu1  ;;  %3718 = vmatmul.mubr.msk.bf16.gmra.mxu1 %vm230_vm1, %v212_v33  ;;  %v5136_v53 = vpop.f32.mrf.mxu0  ;;  %3590 = vmatmul.mubr.msk.bf16.gmra.mxu0 %vm230_vm1, %v180_v43  ;;  %v956_v33 = vmax.f32 %v455_v19, 0.0 }
  0xe7   :  { %v5125_v46 = vpack.c.bf16 %v1027_v41, %v1026_v40  ;;  %3721 = vmatprep.mubr.msk.bf16.mxu1 %vm4507_vm0, %v4506_v0  ;;  %v743_v52 = vadd.f32 %v5017_v29, %v742_v44  ;;  %3593 = vmatprep.mubr.msk.bf16.mxu0 %vm4507_vm0, %v4506_v0  ;;  %v463_v44 = vadd.f32 %v5017_v29, %v5058_v55  ;;  %v959_v55 = vmax.f32 %v466_v47, 0.0 }
  0xe8   :  { %v3623_v51 = vpop.f32.mrf.mxu1  ;;  %v3495_v60 = vpop.f32.mrf.mxu0  ;;  %v1081_v43 = vpack.c.bf16 %v957_v35, %v956_v33 }
  0xe9   :  { %v1028_v62 = vmax.f32 %v743_v52, 0.0 }
  0xea   :  { %v745_v54 = vpop.f32.mrf.mxu1  ;;  %v5148_v1 = vpop.f32.mrf.mxu0 }
  0xeb   :  { %v746_v59 = vadd.f32 %v5017_v29, %v745_v54  ;;  %v183_v54 = vpack.c.bf16 %v90_v39, %v89_v38 }
  0xec   :  { %v3624_v61 = vpop.f32.mrf.mxu1  ;;  %v3496_v8 = vpop.f32.mrf.mxu0 }
  0xed   :  { %v1029_v63 = vmax.f32 %v746_v59, 0.0  ;;  %v958_v59 = vmax.f32 %v463_v44, 0.0  ;;  %v474_v8 = vadd.f32 %v5017_v29, %v5096_v21 }
  0xee   :  { %v750_v4 = vpop.f32.mrf.mxu1  ;;  %3722 = vmatmul.mubr.msk.bf16.gmra.mxu1 %vm230_vm1, %v213_v56  ;;  %v5159_v12 = vpop.f32.mrf.mxu0  ;;  %3594 = vmatmul.mubr.msk.bf16.gmra.mxu0 %vm230_vm1, %v181_v3 }
  0xef   :  { %v5151_v6 = vpack.c.bf16 %v1029_v63, %v1028_v62  ;;  %3725 = vmatprep.mubr.msk.bf16.mxu1 %vm4507_vm0, %v4506_v0  ;;  %v751_v10 = vadd.f32 %v5017_v29, %v750_v4  ;;  %3597 = vmatprep.mubr.msk.bf16.mxu0 %vm4507_vm0, %v4506_v0  ;;  %v1082_v4 = vpack.c.bf16 %v959_v55, %v958_v59  ;;  %v961_v19 = vmax.f32 %v474_v8, 0.0 }
  0xf0   :  { %v3627_v9 = vpop.f32.mrf.mxu1  ;;  %v3499_v18 = vpop.f32.mrf.mxu0 }
  0xf1   :  { %v1030_v23 = vmax.f32 %v751_v10, 0.0  ;;  %v960_v18 = vmax.f32 %v471_v7, 0.0 }
  0xf2   :  { %v753_v13 = vpop.f32.mrf.mxu1  ;;  %v5175_v26 = vpop.f32.mrf.mxu0 }
  0xf3   :  { %v754_v17 = vadd.f32 %v5017_v29, %v753_v13 }
  0xf4   :  { %v3628_v22 = vpop.f32.mrf.mxu1  ;;  %v3500_v32 = vpop.f32.mrf.mxu0 }
  0xf5   :  { %v1031_v25 = vmax.f32 %v754_v17, 0.0  ;;  %v482_v32 = vadd.f32 %v5017_v29, %v5122_v42 }
  0xf6   :  { %v758_v28 = vpop.f32.mrf.mxu1  ;;  %3726 = vmatmul.mubr.msk.bf16.gmra.mxu1 %vm230_vm1, %v214_v14  ;;  %v5183_v36 = vpop.f32.mrf.mxu0  ;;  %3598 = vmatmul.mubr.msk.bf16.gmra.mxu0 %vm230_vm1, %v182_v27  ;;  %v1083_v27 = vpack.c.bf16 %v961_v19, %v960_v18 }
  0xf7   :  { %v5178_v30 = vpack.c.bf16 %v1031_v25, %v1030_v23  ;;  %3733 = vmatprep.mubr.msk.bf16.mxu1 %vm4507_vm0, %v4506_v0  ;;  %v759_v45 = vadd.f32 %v5017_v29, %v758_v28  ;;  %3601 = vmatprep.mubr.msk.bf16.mxu0 %vm4507_vm0, %v4506_v0  ;;  %v479_v28 = vadd.f32 %v5017_v29, %v5110_v31 }
  0xf8   :  { %v3631_v34 = vpop.f32.mrf.mxu1  ;;  %v3503_v41 = vpop.f32.mrf.mxu0 }
  0xf9   :  { %v1032_v50 = vmax.f32 %v759_v45, 0.0  ;;  %v963_v41 = vmax.f32 %v482_v32, 0.0 }
  0xfa   :  { %v761_v37 = vpop.f32.mrf.mxu1  ;;  %v5199_v52 = vpop.f32.mrf.mxu0 }
  0xfb   :  { %v762_v40 = vadd.f32 %v5017_v29, %v761_v37 }
  0xfc   :  { %v3632_v49 = vpop.f32.mrf.mxu1  ;;  %v3504_v58 = vpop.f32.mrf.mxu0 }
  0xfd   :  { %v1033_v51 = vmax.f32 %v762_v40, 0.0  ;;  %v962_v40 = vmax.f32 %v479_v28, 0.0 }
  0xfe   :  { %v766_v56 = vpop.f32.mrf.mxu1  ;;  %3734 = vmatmul.mubr.msk.bf16.vlgmr.msra.gmra.mxu1 %vm1167_vm2, %v1081_v43  ;;  %v5207_v61 = vpop.f32.mrf.mxu0  ;;  %3602 = vmatmul.mubr.msk.bf16.gmra.mxu0 %vm230_vm1, %v183_v54  ;;  %v490_v54 = vadd.f32 %v5017_v29, %v5148_v1 }
  0xff   :  { %v5202_v57 = vpack.c.bf16 %v1033_v51, %v1032_v50  ;;  %3737 = vmatprep.mubr.msk.bf16.mxu1 %vm4507_vm0, %v4506_v0  ;;  %v767_v2 = vadd.f32 %v5017_v29, %v766_v56  ;;  %3989 = vmatprep.mubr.msk.bf16.mxu0 %vm4507_vm0, %v4506_v0  ;;  %v1084_v50 = vpack.c.bf16 %v963_v41, %v962_v40 }
 0x100   :  { %v3635_v60 = vpop.f32.mrf.mxu1  ;;  %v3507_v3 = vpop.f32.mrf.mxu0  ;;  %v487_v51 = vadd.f32 %v5017_v29, %v5136_v53 }
 0x101   :  { %v1034_v10 = vmax.f32 %v767_v2, 0.0  ;;  %v965_v3 = vmax.f32 %v490_v54, 0.0 }
 0x102   :  { %v769_v62 = vpop.f32.mrf.mxu1  ;;  %v5217_v14 = vpop.f32.mrf.mxu0 }
 0x103   :  { %v770_v63 = vadd.f32 %v5017_v29, %v769_v62 }
 0x104   :  { %v3636_v9 = vpop.f32.mrf.mxu1  ;;  %v3508_v17 = vpop.f32.mrf.mxu0 }
 0x105   :  { %v1035_v13 = vmax.f32 %v770_v63, 0.0  ;;  %v964_v63 = vmax.f32 %v487_v51, 0.0 }
 0x106   :  { %v774_v15 = vpop.f32.mrf.mxu1  ;;  %3738 = vmatmul.mubr.msk.bf16.gmra.mxu1 %vm1167_vm2, %v1082_v4  ;;  %v5225_v21 = vpop.f32.mrf.mxu0 }
 0x107   :  { %v5220_v16 = vpack.c.bf16 %v1035_v13, %v1034_v10  ;;  %3741 = vmatprep.mubr.msk.bf16.mxu1 %vm4507_vm0, %v4506_v0  ;;  %v775_v20 = vadd.f32 %v5017_v29, %v774_v15  ;;  %v1085_v10 = vpack.c.bf16 %v965_v3, %v964_v63  ;;  %v495_v13 = vadd.f32 %v5017_v29, %v5159_v12 }
 0x108   :  { %v3639_v11 = vpop.f32.mrf.mxu1  ;;  %v3511_v25 = vpop.f32.mrf.mxu0  ;;  %v498_v15 = vadd.f32 %v5017_v29, %v5175_v26  ;;  %v514_v63 = vadd.f32 %v5017_v29, %v5217_v14 }
 0x109   :  { %v1036_v35 = vmax.f32 %v775_v20, 0.0  ;;  %v966_v25 = vmax.f32 %v495_v13, 0.0 }
 0x10a   :  { %v777_v22 = vpop.f32.mrf.mxu1  ;;  %v5232_v45 = vpop.f32.mrf.mxu0 }
 0x10b   :  { %v778_v23 = vadd.f32 %v5017_v29, %v777_v22 }
 0x10c   :  { %v3640_v33 = vpop.f32.mrf.mxu1  ;;  %v3512_v39 = vpop.f32.mrf.mxu0 }
 0x10d   :  { %v1037_v34 = vmax.f32 %v778_v23, 0.0  ;;  %v506_v39 = vadd.f32 %v5017_v29, %v5199_v52 }
 0x10e   :  { %v782_v37 = vpop.f32.mrf.mxu1  ;;  %3742 = vmatmul.mubr.msk.bf16.gmra.mxu1 %vm1167_vm2, %v1083_v27  ;;  %v5240_v42 = vpop.f32.mrf.mxu0  ;;  %v967_v27 = vmax.f32 %v498_v15, 0.0  ;;  %v971_v15 = vmax.f32 %v514_v63, 0.0 }
 0x10f   :  { %v5235_v38 = vpack.c.bf16 %v1037_v34, %v1036_v35  ;;  %3745 = vmatprep.mubr.msk.bf16.mxu1 %vm4507_vm0, %v4506_v0  ;;  %v783_v43 = vadd.f32 %v5017_v29, %v782_v37  ;;  %v503_v37 = vadd.f32 %v5017_v29, %v5183_v36  ;;  %v969_v51 = vmax.f32 %v506_v39, 0.0 }
 0x110   :  { %v3643_v31 = vpop.f32.mrf.mxu1  ;;  %v3515_v49 = vpop.f32.mrf.mxu0  ;;  %v1086_v34 = vpack.c.bf16 %v967_v27, %v966_v25  ;;  %v519_v25 = vadd.f32 %v5017_v29, %v5225_v21  ;;  %v522_v27 = vadd.f32 %v5017_v29, %v5232_v45 }
 0x111   :  { %v1038_v58 = vmax.f32 %v783_v43, 0.0 }
 0x112   :  { %v785_v44 = vpop.f32.mrf.mxu1  ;;  %v5247_v55 = vpop.f32.mrf.mxu0  ;;  %v972_v39 = vmax.f32 %v519_v25, 0.0 }
 0x113   :  { %v786_v47 = vadd.f32 %v5017_v29, %v785_v44 }
 0x114   :  { %v3644_v56 = vpop.f32.mrf.mxu1  ;;  %v3516_v62 = vpop.f32.mrf.mxu0 }
 0x115   :  { %v1039_v59 = vmax.f32 %v786_v47, 0.0  ;;  %v511_v62 = vadd.f32 %v5017_v29, %v5207_v61 }
 0x116   :  { %v790_v60 = vpop.f32.mrf.mxu1  ;;  %3746 = vmatmul.mubr.msk.bf16.gmra.mxu1 %vm1167_vm2, %v1084_v50  ;;  %v5255_v1 = vpop.f32.mrf.mxu0  ;;  %v968_v50 = vmax.f32 %v503_v37, 0.0 }
 0x117   :  { %v5250_v2 = vpack.c.bf16 %v1039_v59, %v1038_v58  ;;  %3749 = vmatprep.mubr.msk.bf16.mxu1 %vm4507_vm0, %v4506_v0  ;;  %v791_v4 = vadd.f32 %v5017_v29, %v790_v60  ;;  %v970_v13 = vmax.f32 %v511_v62, 0.0 }
 0x118   :  { %v3647_v53 = vpop.f32.mrf.mxu1  ;;  %v3519_v9 = vpop.f32.mrf.mxu0  ;;  %v1087_v60 = vpack.c.bf16 %v969_v51, %v968_v50  ;;  %v527_v51 = vadd.f32 %v5017_v29, %v5240_v42 }
 0x119   :  { %v1040_v18 = vmax.f32 %v791_v4, 0.0 }
 0x11a   :  { %v793_v7 = vpop.f32.mrf.mxu1  ;;  %v5262_v11 = vpop.f32.mrf.mxu0 }
 0x11b   :  { %v794_v8 = vadd.f32 %v5017_v29, %v793_v7 }
 0x11c   :  { %v3648_v17 = vpop.f32.mrf.mxu1  ;;  %v3520_v23 = vpop.f32.mrf.mxu0 }
 0x11d   :  { %v1041_v19 = vmax.f32 %v794_v8, 0.0  ;;  %v1088_v23 = vpack.c.bf16 %v971_v15, %v970_v13 }
 0x11e   :  { %v798_v20 = vpop.f32.mrf.mxu1  ;;  %3750 = vmatmul.mubr.msk.bf16.gmra.mxu1 %vm1167_vm2, %v1085_v10  ;;  %v5270_v26 = vpop.f32.mrf.mxu0 }
 0x11f   :  { %v5265_v22 = vpack.c.bf16 %v1041_v19, %v1040_v18  ;;  %3753 = vmatprep.mubr.msk.bf16.mxu1 %vm4507_vm0, %v4506_v0  ;;  %v799_v28 = vadd.f32 %v5017_v29, %v798_v20 }
 0x120   :  { %v3651_v12 = vpop.f32.mrf.mxu1  ;;  %v3523_v35 = vpop.f32.mrf.mxu0 }
 0x121   :  { %v1042_v41 = vmax.f32 %v799_v28, 0.0 }
 0x122   :  { %v801_v32 = vpop.f32.mrf.mxu1  ;;  %v5277_v43 = vpop.f32.mrf.mxu0 }
 0x123   :  { %v802_v33 = vadd.f32 %v5017_v29, %v801_v32 }
 0x124   :  { %v3652_v40 = vpop.f32.mrf.mxu1  ;;  %v3524_v49 = vpop.f32.mrf.mxu0 }
 0x125   :  { %v1043_v31 = vmax.f32 %v802_v33, 0.0  ;;  %v973_v40 = vmax.f32 %v522_v27, 0.0 }
 0x126   :  { %v806_v44 = vpop.f32.mrf.mxu1  ;;  %3754 = vmatmul.mubr.msk.bf16.gmra.mxu1 %vm1167_vm2, %v1086_v34  ;;  %v5285_v52 = vpop.f32.mrf.mxu0 }
 0x127   :  { %v5280_v47 = vpack.c.bf16 %v1043_v31, %v1042_v41  ;;  %3757 = vmatprep.mubr.msk.bf16.mxu1 %vm4507_vm0, %v4506_v0  ;;  %v807_v54 = vadd.f32 %v5017_v29, %v806_v44  ;;  %v1089_v50 = vpack.c.bf16 %v973_v40, %v972_v39 }
 0x128   :  { %v3655_v36 = vpop.f32.mrf.mxu1  ;;  %v3527_v59 = vpop.f32.mrf.mxu0 }
 0x129   :  { %v1044_v53 = vmax.f32 %v807_v54, 0.0  ;;  %v530_v36 = vadd.f32 %v5017_v29, %v5247_v55 }
 0x12a   :  { %v809_v56 = vpop.f32.mrf.mxu1  ;;  %v5292_v7 = vpop.f32.mrf.mxu0 }
 0x12b   :  { %v810_v58 = vadd.f32 %v5017_v29, %v809_v56 }
 0x12c   :  { %v3656_v3 = vpop.f32.mrf.mxu1  ;;  %v3528_v10 = vpop.f32.mrf.mxu0 }
 0x12d   :  { %v1045_v4 = vmax.f32 %v810_v58, 0.0  ;;  %v974_v3 = vmax.f32 %v527_v51, 0.0 }
 0x12e   :  { %v814_v8 = vpop.f32.mrf.mxu1  ;;  %3758 = vmatmul.mubr.msk.bf16.gmra.mxu1 %vm1167_vm2, %v1087_v60  ;;  %v5300_v14 = vpop.f32.mrf.mxu0 }
 0x12f   :  { %v5295_v9 = vpack.c.bf16 %v1045_v4, %v1044_v53  ;;  %3761 = vmatprep.mubr.msk.bf16.mxu1 %vm4507_vm0, %v4506_v0  ;;  %v815_v17 = vadd.f32 %v5017_v29, %v814_v8  ;;  %v975_v53 = vmax.f32 %v530_v36, 0.0 }
 0x130   :  { %v3659_v61 = vpop.f32.mrf.mxu1  ;;  %v3531_v20 = vpop.f32.mrf.mxu0 }
 0x131   :  { %v1046_v28 = vmax.f32 %v815_v17, 0.0  ;;  %v1090_v15 = vpack.c.bf16 %v975_v53, %v974_v3  ;;  %v535_v61 = vadd.f32 %v5017_v29, %v5255_v1  ;;  %v538_v17 = vadd.f32 %v5017_v29, %v5262_v11 }
 0x132   :  { %v817_v18 = vpop.f32.mrf.mxu1  ;;  %v5307_v33 = vpop.f32.mrf.mxu0 }
 0x133   :  { %v818_v19 = vadd.f32 %v5017_v29, %v817_v18 }
 0x134   :  { %v3660_v12 = vpop.f32.mrf.mxu1  ;;  %v3532_v37 = vpop.f32.mrf.mxu0 }
 0x135   :  { %v1047_v32 = vmax.f32 %v818_v19, 0.0 }
 0x136   :  { %v822_v35 = vpop.f32.mrf.mxu1  ;;  %3762 = vmatmul.mubr.msk.bf16.gmra.mxu1 %vm1167_vm2, %v1088_v23  ;;  %v5315_v45 = vpop.f32.mrf.mxu0 }
 0x137   :  { %v5310_v34 = vpack.c.bf16 %v1047_v32, %v1046_v28  ;;  %3765 = vmatprep.mubr.msk.bf16.mxu1 %vm4507_vm0, %v4506_v0  ;;  %v823_v41 = vadd.f32 %v5017_v29, %v822_v35  ;;  %v976_v28 = vmax.f32 %v535_v61, 0.0  ;;  %v977_v32 = vmax.f32 %v538_v17, 0.0 }
 0x138   :  { %v3663_v21 = vpop.f32.mrf.mxu1  ;;  %v3535_v49 = vpop.f32.mrf.mxu0 }
 0x139   :  { %v1048_v56 = vmax.f32 %v823_v41, 0.0  ;;  %v1091_v21 = vpack.c.bf16 %v977_v32, %v976_v28  ;;  %v543_v41 = vadd.f32 %v5017_v29, %v5270_v26 }
 0x13a   :  { %v825_v31 = vpop.f32.mrf.mxu1  ;;  %v5322_v59 = vpop.f32.mrf.mxu0 }
 0x13b   :  { %v826_v44 = vadd.f32 %v5017_v29, %v825_v31  ;;  %v546_v31 = vadd.f32 %v5017_v29, %v5277_v43 }
 0x13c   :  { %v3664_v54 = vpop.f32.mrf.mxu1  ;;  %v3536_v63 = vpop.f32.mrf.mxu0 }
 0x13d   :  { %v1049_v58 = vmax.f32 %v826_v44, 0.0 }
 0x13e   :  { %v830_v60 = vpop.f32.mrf.mxu1  ;;  %3766 = vmatmul.mubr.msk.bf16.gmra.mxu1 %vm1167_vm2, %v1089_v50  ;;  %v5330_v55 = vpop.f32.mrf.mxu0 }
 0x13f   :  { %v5325_v62 = vpack.c.bf16 %v1049_v58, %v1048_v56  ;;  %3769 = vmatprep.mubr.msk.bf16.mxu1 %vm4507_vm0, %v4506_v0  ;;  %v831_v4 = vadd.f32 %v5017_v29, %v830_v60  ;;  %v978_v58 = vmax.f32 %v543_v41, 0.0  ;;  %v979_v60 = vmax.f32 %v546_v31, 0.0 }
 0x140   :  { %v3667_v42 = vpop.f32.mrf.mxu1  ;;  %v3539_v13 = vpop.f32.mrf.mxu0 }
 0x141   :  { %v1050_v19 = vmax.f32 %v831_v4, 0.0  ;;  %v1092_v4 = vpack.c.bf16 %v979_v60, %v978_v58 }
 0x142   :  { %v833_v8 = vpop.f32.mrf.mxu1  ;;  %v5337_v23 = vpop.f32.mrf.mxu0 }
 0x143   :  { %v834_v10 = vadd.f32 %v5017_v29, %v833_v8  ;;  %v551_v8 = vadd.f32 %v5017_v29, %v5285_v52 }
 0x144   :  { %v3668_v18 = vpop.f32.mrf.mxu1  ;;  %v3540_v12 = vpop.f32.mrf.mxu0 }
 0x145   :  { %v1051_v20 = vmax.f32 %v834_v10, 0.0  ;;  %v554_v10 = vadd.f32 %v5017_v29, %v5292_v7 }
 0x146   :  { %v838_v25 = vpop.f32.mrf.mxu1  ;;  %3770 = vmatmul.mubr.msk.bf16.gmra.mxu1 %vm1167_vm2, %v1090_v15  ;;  %v5345_v11 = vpop.f32.mrf.mxu0 }
 0x147   :  { %v5340_v27 = vpack.c.bf16 %v1051_v20, %v1050_v19  ;;  %3773 = vmatprep.mubr.msk.bf16.mxu1 %vm4507_vm0, %v4506_v0  ;;  %v839_v35 = vadd.f32 %v5017_v29, %v838_v25  ;;  %v980_v25 = vmax.f32 %v551_v8, 0.0  ;;  %v981_v12 = vmax.f32 %v554_v10, 0.0 }
 0x148   :  { %v3671_v1 = vpop.f32.mrf.mxu1  ;;  %v3543_v40 = vpop.f32.mrf.mxu0 }
 0x149   :  { %v1052_v49 = vmax.f32 %v839_v35, 0.0  ;;  %v562_v40 = vadd.f32 %v5017_v29, %v5307_v33 }
 0x14a   :  { %v841_v37 = vpop.f32.mrf.mxu1  ;;  %v5352_v51 = vpop.f32.mrf.mxu0 }
 0x14b   :  { %v842_v39 = vadd.f32 %v5017_v29, %v841_v37  ;;  %v1093_v37 = vpack.c.bf16 %v981_v12, %v980_v25  ;;  %v983_v58 = vmax.f32 %v562_v40, 0.0 }
 0x14c   :  { %v3672_v44 = vpop.f32.mrf.mxu1  ;;  %v3544_v56 = vpop.f32.mrf.mxu0 }
 0x14d   :  { %v1053_v50 = vmax.f32 %v842_v39, 0.0  ;;  %v559_v39 = vadd.f32 %v5017_v29, %v5300_v14 }
 0x14e   :  { %v846_v36 = vpop.f32.mrf.mxu1  ;;  %3774 = vmatmul.mubr.msk.bf16.gmra.mxu1 %vm1167_vm2, %v1091_v21  ;;  %v5360_v43 = vpop.f32.mrf.mxu0 }
 0x14f   :  { %v5355_v54 = vpack.c.bf16 %v1053_v50, %v1052_v49  ;;  %3777 = vmatprep.mubr.msk.bf16.mxu1 %vm4507_vm0, %v4506_v0  ;;  %v847_v63 = vadd.f32 %v5017_v29, %v846_v36  ;;  %v982_v56 = vmax.f32 %v559_v39, 0.0  ;;  %v578_v39 = vadd.f32 %v5017_v29, %v5337_v23 }
 0x150   :  { %v3675_v26 = vpop.f32.mrf.mxu1  ;;  %v3547_v42 = vpop.f32.mrf.mxu0 }
 0x151   :  { %v1054_v15 = vmax.f32 %v847_v63, 0.0  ;;  %v567_v42 = vadd.f32 %v5017_v29, %v5315_v45 }
 0x152   :  { %v849_v3 = vpop.f32.mrf.mxu1  ;;  %v5367_v17 = vpop.f32.mrf.mxu0 }
 0x153   :  { %v850_v53 = vadd.f32 %v5017_v29, %v849_v3  ;;  %v984_v25 = vmax.f32 %v567_v42, 0.0  ;;  %v583_v42 = vadd.f32 %v5017_v29, %v5345_v11 }
 0x154   :  { %v3676_v13 = vpop.f32.mrf.mxu1  ;;  %v3548_v20 = vpop.f32.mrf.mxu0 }
 0x155   :  { %v1055_v61 = vmax.f32 %v850_v53, 0.0  ;;  %v1094_v53 = vpack.c.bf16 %v983_v58, %v982_v56 }
 0x156   :  { %v854_v18 = vpop.f32.mrf.mxu1  ;;  %3778 = vmatmul.mubr.msk.bf16.gmra.mxu1 %vm1167_vm2, %v1092_v4  ;;  %v5375_v7 = vpop.f32.mrf.mxu0  ;;  %v570_v4 = vadd.f32 %v5017_v29, %v5322_v59 }
 0x157   :  { %v5370_v19 = vpack.c.bf16 %v1055_v61, %v1054_v15  ;;  %3781 = vmatprep.mubr.msk.bf16.mxu1 %vm4507_vm0, %v4506_v0  ;;  %v855_v28 = vadd.f32 %v5017_v29, %v854_v18 }
 0x158   :  { %v3679_v52 = vpop.f32.mrf.mxu1  ;;  %v3551_v35 = vpop.f32.mrf.mxu0  ;;  %v985_v12 = vmax.f32 %v570_v4, 0.0  ;;  %v586_v4 = vadd.f32 %v5017_v29, %v5352_v51 }
 0x159   :  { %v1056_v41 = vmax.f32 %v855_v28, 0.0 }
 0x15a   :  { %v857_v32 = vpop.f32.mrf.mxu1  ;;  %v5382_v44 = vpop.f32.mrf.mxu0  ;;  %v1095_v35 = vpack.c.bf16 %v985_v12, %v984_v25 }
 0x15b   :  { %v858_v1 = vadd.f32 %v5017_v29, %v857_v32 }
 0x15c   :  { %v3680_v21 = vpop.f32.mrf.mxu1  ;;  %v3552_v36 = vpop.f32.mrf.mxu0 }
 0x15d   :  { %v1057_v31 = vmax.f32 %v858_v1, 0.0 }
 0x15e   :  { %v862_v49 = vpop.f32.mrf.mxu1  ;;  %3782 = vmatmul.mubr.msk.bf16.gmra.mxu1 %vm1167_vm2, %v1093_v37  ;;  %v5390_v33 = vpop.f32.mrf.mxu0  ;;  %v575_v37 = vadd.f32 %v5017_v29, %v5330_v55 }
 0x15f   :  { %v5385_v50 = vpack.c.bf16 %v1057_v31, %v1056_v41  ;;  %3785 = vmatprep.mubr.msk.bf16.mxu1 %vm4507_vm0, %v4506_v0  ;;  %v863_v60 = vadd.f32 %v5017_v29, %v862_v49 }
 0x160   :  { %v3683_v14 = vpop.f32.mrf.mxu1  ;;  %v3555_v3 = vpop.f32.mrf.mxu0  ;;  %v986_v58 = vmax.f32 %v575_v37, 0.0 }
 0x161   :  { %v1058_v10 = vmax.f32 %v863_v60, 0.0  ;;  %v987_v14 = vmax.f32 %v578_v39, 0.0  ;;  %v591_v39 = vadd.f32 %v5017_v29, %v5360_v43 }
 0x162   :  { %v865_v26 = vpop.f32.mrf.mxu1  ;;  %v5397_v15 = vpop.f32.mrf.mxu0 }
 0x163   :  { %v866_v63 = vadd.f32 %v5017_v29, %v865_v26 }
 0x164   :  { %v3684_v8 = vpop.f32.mrf.mxu1  ;;  %v3556_v20 = vpop.f32.mrf.mxu0 }
 0x165   :  { %v1059_v13 = vmax.f32 %v866_v63, 0.0 }
 0x166   :  { %v870_v61 = vpop.f32.mrf.mxu1  ;;  %3786 = vmatmul.mubr.msk.bf16.gmra.mxu1 %vm1167_vm2, %v1094_v53  ;;  %v5405_v59 = vpop.f32.mrf.mxu0  ;;  %v1096_v53 = vpack.c.bf16 %v987_v14, %v986_v58 }
 0x167   :  { %v5400_v18 = vpack.c.bf16 %v1059_v13, %v1058_v10  ;;  %3789 = vmatprep.mubr.msk.bf16.mxu1 %vm4507_vm0, %v4506_v0  ;;  %v871_v52 = vadd.f32 %v5017_v29, %v870_v61 }
 0x168   :  { %v3687_v45 = vpop.f32.mrf.mxu1  ;;  %v3559_v1 = vpop.f32.mrf.mxu0 }
 0x169   :  { %v1060_v21 = vmax.f32 %v871_v52, 0.0  ;;  %v988_v45 = vmax.f32 %v583_v42, 0.0  ;;  %v989_v52 = vmax.f32 %v586_v4, 0.0 }
 0x16a   :  { %v873_v28 = vpop.f32.mrf.mxu1  ;;  %v5412_v31 = vpop.f32.mrf.mxu0 }
 0x16b   :  { %v874_v32 = vadd.f32 %v5017_v29, %v873_v28  ;;  %v1097_v37 = vpack.c.bf16 %v989_v52, %v988_v45 }
 0x16c   :  { %v3688_v40 = vpop.f32.mrf.mxu1  ;;  %v3560_v56 = vpop.f32.mrf.mxu0 }
 0x16d   :  { %v1061_v41 = vmax.f32 %v874_v32, 0.0  ;;  %v594_v40 = vadd.f32 %v5017_v29, %v5367_v17 }
 0x16e   :  { %v878_v49 = vpop.f32.mrf.mxu1  ;;  %3790 = vmatmul.mubr.msk.bf16.gmra.mxu1 %vm1167_vm2, %v1095_v35  ;;  %v5420_v23 = vpop.f32.mrf.mxu0 }
 0x16f   :  { %v5415_v36 = vpack.c.bf16 %v1061_v41, %v1060_v21  ;;  %3793 = vmatprep.mubr.msk.bf16.mxu1 %vm4507_vm0, %v4506_v0  ;;  %v879_v60 = vadd.f32 %v5017_v29, %v878_v49 }
 0x170   :  { %v3691_v55 = vpop.f32.mrf.mxu1  ;;  %v3563_v3 = vpop.f32.mrf.mxu0 }
 0x171   :  { %v1062_v10 = vmax.f32 %v879_v60, 0.0  ;;  %v990_v60 = vmax.f32 %v591_v39, 0.0 }
 0x172   :  { %v881_v26 = vpop.f32.mrf.mxu1  ;;  %v5427_v61 = vpop.f32.mrf.mxu0 }
 0x173   :  { %v882_v63 = vadd.f32 %v5017_v29, %v881_v26  ;;  %v991_v26 = vmax.f32 %v594_v40, 0.0 }
 0x174   :  { %v3692_v8 = vpop.f32.mrf.mxu1  ;;  %v3564_v12 = vpop.f32.mrf.mxu0 }
 0x175   :  { %v1063_v13 = vmax.f32 %v882_v63, 0.0  ;;  %v1098_v4 = vpack.c.bf16 %v991_v26, %v990_v60  ;;  %v599_v8 = vadd.f32 %v5017_v29, %v5375_v7 }
 0x176   :  { %v886_v20 = vpop.f32.mrf.mxu1  ;;  %3794 = vmatmul.mubr.msk.bf16.gmra.mxu1 %vm1167_vm2, %v1096_v53  ;;  %v5435_v51 = vpop.f32.mrf.mxu0 }
 0x177   :  { %v5430_v25 = vpack.c.bf16 %v1063_v13, %v1062_v10  ;;  %3797 = vmatprep.mubr.msk.bf16.mxu1 %vm4507_vm0, %v4506_v0  ;;  %v887_v28 = vadd.f32 %v5017_v29, %v886_v20  ;;  %v602_v10 = vadd.f32 %v5017_v29, %v5382_v44 }
 0x178   :  { %v3695_v11 = vpop.f32.mrf.mxu1  ;;  %v3567_v35 = vpop.f32.mrf.mxu0 }
 0x179   :  { %v1064_v41 = vmax.f32 %v887_v28, 0.0 }
 0x17a   :  { %v889_v32 = vpop.f32.mrf.mxu1  ;;  %v5442_v56 = vpop.f32.mrf.mxu0 }
 0x17b   :  { %v890_v1 = vadd.f32 %v5017_v29, %v889_v32  ;;  %v992_v32 = vmax.f32 %v599_v8, 0.0 }
 0x17c   :  { %v3696_v21 = vpop.f32.mrf.mxu1  ;;  %v3568_v55 = vpop.f32.mrf.mxu0 }
 0x17d   :  { %v1065_v49 = vmax.f32 %v890_v1, 0.0  ;;  %v993_v1 = vmax.f32 %v602_v10, 0.0 }
 0x17e   :  { %v894_v58 = vpop.f32.mrf.mxu1  ;;  %3798 = vmatmul.mubr.msk.bf16.gmra.mxu1 %vm1167_vm2, %v1097_v37  ;;  %v5450_v17 = vpop.f32.mrf.mxu0 }
 0x17f   :  { %v5445_v14 = vpack.c.bf16 %v1065_v49, %v1064_v41  ;;  %3801 = vmatprep.mubr.msk.bf16.mxu1 %vm4507_vm0, %v4506_v0  ;;  %v895_v63 = vadd.f32 %v5017_v29, %v894_v58  ;;  %v1099_v21 = vpack.c.bf16 %v993_v1, %v992_v32 }
 0x180   :  { %v3699_v43 = vpop.f32.mrf.mxu1  ;;  %v3571_v42 = vpop.f32.mrf.mxu0 }
 0x181   :  { %v1066_v20 = vmax.f32 %v895_v63, 0.0 }
 0x182   :  { %v897_v3 = vpop.f32.mrf.mxu1  ;;  %v5457_v45 = vpop.f32.mrf.mxu0 }
 0x183   :  { %v898_v53 = vadd.f32 %v5017_v29, %v897_v3  ;;  %v5467_v29 = vld [vmem:[%s6717_s2] ss:$0 sm:$0xff] }
 0x184   :  { %v3700_v13 = vpop.f32.mrf.mxu1  ;;  %v3572_v28 = vpop.f32.mrf.mxu0  ;;  %v607_v41 = vadd.f32 %v5467_v29, %v5390_v33  ;;  %v610_v49 = vadd.f32 %v5467_v29, %v5397_v15 }
 0x185   :  { %v1067_v12 = vmax.f32 %v898_v53, 0.0 }
 0x186   :  { %v902_v52 = vpop.f32.mrf.mxu1  ;;  %3802 = vmatmul.mubr.msk.bf16.gmra.mxu1 %vm1167_vm2, %v1098_v4  ;;  %v5470_v35 = vpop.f32.mrf.mxu0  ;;  %v994_v53 = vmax.f32 %v607_v41, 0.0  ;;  %v995_v42 = vmax.f32 %v610_v49, 0.0 }
 0x187   :  { %v5460_v11 = vpack.c.bf16 %v1067_v12, %v1066_v20  ;;  %3805 = vmatprep.mubr.msk.bf16.mxu1 %vm4507_vm0, %v4506_v0  ;;  %v903_v44 = vadd.f32 %v5467_v29, %v902_v52  ;;  %v615_v12 = vadd.f32 %v5467_v29, %v5405_v59  ;;  %v618_v52 = vadd.f32 %v5467_v29, %v5412_v31 }
 0x188   :  { %v3703_v7 = vpop.f32.mrf.mxu1  ;;  %v3575_v40 = vpop.f32.mrf.mxu0  ;;  %v1100_v20 = vpack.c.bf16 %v995_v42, %v994_v53 }
 0x189   :  { %v1068_v55 = vmax.f32 %v903_v44, 0.0  ;;  %v996_v40 = vmax.f32 %v615_v12, 0.0 }
 0x18a   :  { %v905_v37 = vpop.f32.mrf.mxu1  ;;  %v5477_v26 = vpop.f32.mrf.mxu0 }
 0x18b   :  { %v906_v39 = vadd.f32 %v5467_v29, %v905_v37 }
 0x18c   :  { %v3704_v58 = vpop.f32.mrf.mxu1  ;;  %v3576_v3 = vpop.f32.mrf.mxu0 }
 0x18d   :  { %v1069_v60 = vmax.f32 %v906_v39, 0.0  ;;  %v626_v3 = vadd.f32 %v5467_v29, %v5427_v61 }
 0x18e   :  { %v910_v43 = vpop.f32.mrf.mxu1  ;;  %3806 = vmatmul.mubr.msk.bf16.gmra.mxu1 %vm1167_vm2, %v1099_v21  ;;  %v5485_v15 = vpop.f32.mrf.mxu0  ;;  %v997_v21 = vmax.f32 %v618_v52, 0.0 }
 0x18f   :  { %v5480_v63 = vpack.c.bf16 %v1069_v60, %v1068_v55  ;;  %3809 = vmatprep.mubr.msk.bf16.mxu1 %vm4507_vm0, %v4506_v0  ;;  %v911_v4 = vadd.f32 %v5467_v29, %v910_v43  ;;  %v623_v43 = vadd.f32 %v5467_v29, %v5420_v23  ;;  %v999_v12 = vmax.f32 %v626_v3, 0.0 }
 0x190   :  { %v3707_v33 = vpop.f32.mrf.mxu1  ;;  %v3579_v13 = vpop.f32.mrf.mxu0  ;;  %v1101_v60 = vpack.c.bf16 %v997_v21, %v996_v40  ;;  %v634_v40 = vadd.f32 %v5467_v29, %v5442_v56 }
 0x191   :  { %v1070_v32 = vmax.f32 %v911_v4, 0.0 }
 0x192   :  { %v913_v8 = vpop.f32.mrf.mxu1  ;;  %v5492_v7 = vpop.f32.mrf.mxu0  ;;  %v1001_v3 = vmax.f32 %v634_v40, 0.0 }
 0x193   :  { %v914_v10 = vadd.f32 %v5467_v29, %v913_v8 }
 0x194   :  { %v3708_v28 = vpop.f32.mrf.mxu1  ;;  %v3580_v39 = vpop.f32.mrf.mxu0 }
 0x195   :  { %v1071_v1 = vmax.f32 %v914_v10, 0.0  ;;  %v631_v39 = vadd.f32 %v5467_v29, %v5435_v51 }
 0x196   :  { %v918_v44 = vpop.f32.mrf.mxu1  ;;  %3810 = vmatmul.mubr.msk.bf16.gmra.mxu1 %vm1167_vm2, %v1100_v20  ;;  %v5500_v31 = vpop.f32.mrf.mxu0  ;;  %v998_v20 = vmax.f32 %v623_v43, 0.0 }
 0x197   :  { %v5495_v37 = vpack.c.bf16 %v1071_v1, %v1070_v32  ;;  %3813 = vmatprep.mubr.msk.bf16.mxu1 %vm4507_vm0, %v4506_v0  ;;  %v919_v41 = vadd.f32 %v5467_v29, %v918_v44  ;;  %v1000_v43 = vmax.f32 %v631_v39, 0.0 }
 0x198   :  { %v3711_v59 = vpop.f32.mrf.mxu1  ;;  %v3583_v55 = vpop.f32.mrf.mxu0  ;;  %v1102_v44 = vpack.c.bf16 %v999_v12, %v998_v20  ;;  %v639_v20 = vadd.f32 %v5467_v29, %v5450_v17  ;;  %v642_v12 = vadd.f32 %v5467_v29, %v5457_v45 }
 0x199   :  { %v1072_v42 = vmax.f32 %v919_v41, 0.0 }
 0x19a   :  { %v921_v49 = vpop.f32.mrf.mxu1  ;;  %v5507_v4 = vpop.f32.mrf.mxu0  ;;  %v1002_v40 = vmax.f32 %v639_v20, 0.0 }
 0x19b   :  { %v922_v58 = vadd.f32 %v5467_v29, %v921_v49 }
 0x19c   :  { %v3712_v53 = vpop.f32.mrf.mxu1  ;;  %v3584_v13 = vpop.f32.mrf.mxu0 }
 0x19d   :  { %v1073_v33 = vmax.f32 %v922_v58, 0.0  ;;  %v1103_v13 = vpack.c.bf16 %v1001_v3, %v1000_v43  ;;  %v647_v3 = vadd.f32 %v5467_v29, %v5470_v35 }
 0x19e   :  { %v926_v8 = vpop.f32.mrf.mxu1  ;;  %3814 = vmatmul.mubr.msk.bf16.gmra.mxu1 %vm1167_vm2, %v1101_v60  ;;  %v5515_v61 = vpop.f32.mrf.mxu0 }
 0x19f   :  { %v5510_v10 = vpack.c.bf16 %v1073_v33, %v1072_v42  ;;  %3817 = vmatprep.mubr.msk.bf16.mxu1 %vm4507_vm0, %v4506_v0  ;;  %v927_v52 = vadd.f32 %v5467_v29, %v926_v8 }
 0x1a0   :  { %v3715_v23 = vpop.f32.mrf.mxu1  ;;  %v3587_v1 = vpop.f32.mrf.mxu0 }
 0x1a1   :  { %v1074_v59 = vmax.f32 %v927_v52, 0.0 }
 0x1a2   :  { %v929_v28 = vpop.f32.mrf.mxu1  ;;  %v5522_v49 = vpop.f32.mrf.mxu0 }
 0x1a3   :  { %v930_v32 = vadd.f32 %v5467_v29, %v929_v28 }
 0x1a4   :  { %v3716_v21 = vpop.f32.mrf.mxu1  ;;  %v3588_v60 = vpop.f32.mrf.mxu0 }
 0x1a5   :  { %v1075_v41 = vmax.f32 %v930_v32, 0.0  ;;  %v1003_v21 = vmax.f32 %v642_v12, 0.0 }
 0x1a6   :  { %v934_v58 = vpop.f32.mrf.mxu1  ;;  %3818 = vmatmul.mubr.msk.bf16.gmra.mxu1 %vm1167_vm2, %v1102_v44  ;;  %v5530_v56 = vpop.f32.mrf.mxu0 }
 0x1a7   :  { %v5525_v55 = vpack.c.bf16 %v1075_v41, %v1074_v59  ;;  %3821 = vmatprep.mubr.msk.bf16.mxu1 %vm4507_vm0, %v4506_v0  ;;  %v935_v53 = vadd.f32 %v5467_v29, %v934_v58  ;;  %v1104_v43 = vpack.c.bf16 %v1003_v21, %v1002_v40  ;;  %v655_v40 = vadd.f32 %v5467_v29, %v5485_v15 }
 0x1a8   :  { %v3719_v51 = vpop.f32.mrf.mxu1  ;;  %v3591_v8 = vpop.f32.mrf.mxu0  ;;  %v658_v21 = vadd.f32 %v5467_v29, %v5492_v7 }
 0x1a9   :  { %v1076_v52 = vmax.f32 %v935_v53, 0.0  ;;  %v650_v51 = vadd.f32 %v5467_v29, %v5477_v26 }
 0x1aa   :  { %v937_v42 = vpop.f32.mrf.mxu1  ;;  %v5537_v32 = vpop.f32.mrf.mxu0  ;;  %v1007_v15 = vmax.f32 %v658_v21, 0.0 }
 0x1ab   :  { %v938_v33 = vadd.f32 %v5467_v29, %v937_v42  ;;  %v1005_v35 = vmax.f32 %v650_v51, 0.0 }
 0x1ac   :  { %v3720_v23 = vpop.f32.mrf.mxu1  ;;  %v3592_v39 = vpop.f32.mrf.mxu0 }
 0x1ad   :  { %v1077_v28 = vmax.f32 %v938_v33, 0.0  ;;  %v1004_v23 = vmax.f32 %v647_v3, 0.0 }
 0x1ae   :  { %v942_v1 = vpop.f32.mrf.mxu1  ;;  %3822 = vmatmul.mubr.msk.bf16.gmra.mxu1 %vm1167_vm2, %v1103_v13  ;;  %v5545_v45 = vpop.f32.mrf.mxu0 }
 0x1af   :  { %v5540_v44 = vpack.c.bf16 %v1077_v28, %v1076_v52  ;;  %3825 = vmatprep.mubr.msk.bf16.mxu1 %vm4507_vm0, %v4506_v0  ;;  %v943_v59 = vadd.f32 %v5467_v29, %v942_v1  ;;  %v1105_v39 = vpack.c.bf16 %v1005_v35, %v1004_v23  ;;  %v663_v23 = vadd.f32 %v5467_v29, %v5500_v31 }
 0x1b0   :  { %v3723_v17 = vpop.f32.mrf.mxu1  ;;  %v3595_v60 = vpop.f32.mrf.mxu0  ;;  %v666_v35 = vadd.f32 %v5467_v29, %v5507_v4 }
 0x1b1   :  { %v1078_v42 = vmax.f32 %v943_v59, 0.0 }
 0x1b2   :  { %v945_v41 = vpop.f32.mrf.mxu1  ;;  %v5552_v8 = vpop.f32.mrf.mxu0 }
 0x1b3   :  { %v946_v58 = vadd.f32 %v5467_v29, %v945_v41  ;;  %v5572_v41 = vld [vmem:[%s6718_s4] ss:$0 sm:$0xff] }
 0x1b4   :  { %v3724_v53 = vpop.f32.mrf.mxu1  ;;  %v3596_v12 = vpop.f32.mrf.mxu0 }
 0x1b5   :  { %v1079_v33 = vmax.f32 %v946_v58, 0.0 }
 0x1b6   :  { %v5554_v13 = vpop.f32.mrf.mxu1  ;;  %3826 = vmatmul.mubr.msk.bf16.gmra.mxu1 %vm1167_vm2, %v1104_v43  ;;  %v5561_v28 = vpop.f32.mrf.mxu0  ;;  %v1006_v43 = vmax.f32 %v655_v40, 0.0 }
 0x1b7   :  { %v5557_v20 = vpack.c.bf16 %v1079_v33, %v1078_v42  ;;  %3829 = vmatprep.mubr.msk.bf16.mxu1 %vm4507_vm0, %v4506_v0 }
 0x1b8   :  { %v3727_v52 = vpop.f32.mrf.mxu1  ;;  %v3599_v1 = vpop.f32.mrf.mxu0  ;;  %v1106_v12 = vpack.c.bf16 %v1007_v15, %v1006_v43 }
 0x1ba   :  { %v953_v26 = vpop.f32.mrf.mxu1  ;;  %v5567_v59 = vpop.f32.mrf.mxu0 }
 0x1bc   :  { %v3728_v17 = vpop.f32.mrf.mxu1  ;;  %v3600_v60 = vpop.f32.mrf.mxu0 }
 0x1bd   :  { %v1009_v60 = vmax.f32 %v666_v35, 0.0 }
 0x1be   :  { %v1391_v58 = vpop.f32.mrf.mxu1  ;;  %3830 = vmatmul.mubr.msk.bf16.gmra.mxu1 %vm1167_vm2, %v1105_v39  ;;  %v5578_v51 = vpop.f32.mrf.mxu0 }
 0x1bf   :  { %3833 = vmatprep.mubr.msk.bf16.mxu1 %vm4507_vm0, %v4506_v0  ;;  %v1392_v7 = vadd.f32 %v5572_v41, %v1391_v58  ;;  %v1008_v58 = vmax.f32 %v663_v23, 0.0 }
 0x1c0   :  { %v3735_v3 = vpop.f32.mrf.mxu1  ;;  %v3603_v33 = vpop.f32.mrf.mxu0 }
 0x1c1   :  { %v1893_v26 = vmax.f32 %v1392_v7, 0.0  ;;  %v1107_v3 = vpack.c.bf16 %v1009_v60, %v1008_v58  ;;  %v671_v7 = vadd.f32 %v5467_v29, %v5515_v61  ;;  %v682_v58 = vadd.f32 %v5467_v29, %v5537_v32 }
 0x1c2   :  { %v1394_v53 = vpop.f32.mrf.mxu1  ;;  %v5585_v39 = vpop.f32.mrf.mxu0 }
 0x1c3   :  { %v1395_v42 = vadd.f32 %v5572_v41, %v1394_v53  ;;  %v674_v53 = vadd.f32 %v5467_v29, %v5522_v49 }
 0x1c4   :  { %v3736_v52 = vpop.f32.mrf.mxu1  ;;  %v3604_v17 = vpop.f32.mrf.mxu0 }
 0x1c5   :  { %v1894_v1 = vmax.f32 %v1395_v42, 0.0  ;;  %v1010_v52 = vmax.f32 %v671_v7, 0.0  ;;  %v679_v17 = vadd.f32 %v5467_v29, %v5530_v56  ;;  %v1013_v7 = vmax.f32 %v682_v58, 0.0 }
 0x1c6   :  { %v1399_v40 = vpop.f32.mrf.mxu1  ;;  %3834 = vmatmul.mubr.msk.bf16.gmra.mxu1 %vm1167_vm2, %v1106_v12 }
 0x1c7   :  { %v2018_v21 = vpack.c.bf16 %v1894_v1, %v1893_v26  ;;  %3837 = vmatprep.mubr.msk.bf16.mxu1 %vm4507_vm0, %v4506_v0  ;;  %v1400_v31 = vadd.f32 %v5572_v41, %v1399_v40  ;;  %v1011_v26 = vmax.f32 %v674_v53, 0.0 }
 0x1c8   :  { %v3739_v43 = vpop.f32.mrf.mxu1 }
 0x1c9   :  { %3990 = vmatmul.mubr.msk.bf16.vlgmr.msra.gmra.mxu0 %vm1167_vm2, %v2018_v21  ;;  %v1895_v33 = vmax.f32 %v1400_v31, 0.0  ;;  %v1108_v21 = vpack.c.bf16 %v1011_v26, %v1010_v52 }
 0x1ca   :  { %v1402_v4 = vpop.f32.mrf.mxu1  ;;  %3993 = vmatprep.mubr.msk.bf16.mxu0 %vm4507_vm0, %v4506_v0 }
 0x1cb   :  { %v1403_v15 = vadd.f32 %v5572_v41, %v1402_v4 }
 0x1cc   :  { %v3740_v42 = vpop.f32.mrf.mxu1 }
 0x1cd   :  { %v1896_v12 = vmax.f32 %v1403_v15, 0.0 }
 0x1ce   :  { %v1407_v23 = vpop.f32.mrf.mxu1  ;;  %3838 = vmatmul.mubr.msk.bf16.gmra.mxu1 %vm1167_vm2, %v1107_v3  ;;  %v1012_v3 = vmax.f32 %v679_v17, 0.0 }
 0x1cf   :  { %v2019_v35 = vpack.c.bf16 %v1896_v12, %v1895_v33  ;;  %3841 = vmatprep.mubr.msk.bf16.mxu1 %vm4507_vm0, %v4506_v0  ;;  %v1408_v40 = vadd.f32 %v5572_v41, %v1407_v23  ;;  %v687_v12 = vadd.f32 %v5467_v29, %v5545_v45  ;;  %v690_v23 = vadd.f32 %v5467_v29, %v5552_v8 }
 0x1d0   :  { %v3743_v1 = vpop.f32.mrf.mxu1  ;;  %v1109_v33 = vpack.c.bf16 %v1013_v7, %v1012_v3 }
 0x1d1   :  { %3994 = vmatmul.mubr.msk.bf16.gmra.mxu0 %vm1167_vm2, %v2019_v35  ;;  %v1897_v43 = vmax.f32 %v1408_v40, 0.0 }
 0x1d2   :  { %v1410_v61 = vpop.f32.mrf.mxu1  ;;  %3997 = vmatprep.mubr.msk.bf16.mxu0 %vm4507_vm0, %v4506_v0 }
 0x1d3   :  { %v1411_v49 = vadd.f32 %v5572_v41, %v1410_v61  ;;  %v1014_v61 = vmax.f32 %v687_v12, 0.0  ;;  %v703_v12 = vadd.f32 %v5467_v29, %v5578_v51 }
 0x1d4   :  { %v3744_v60 = vpop.f32.mrf.mxu1 }
 0x1d5   :  { %v1898_v31 = vmax.f32 %v1411_v49, 0.0  ;;  %v1015_v49 = vmax.f32 %v690_v23, 0.0  ;;  %v695_v60 = vadd.f32 %v5467_v29, %v5561_v28  ;;  %v706_v23 = vadd.f32 %v5467_v29, %v5585_v39 }
 0x1d6   :  { %v1415_v4 = vpop.f32.mrf.mxu1  ;;  %3842 = vmatmul.mubr.msk.bf16.gmra.mxu1 %vm1167_vm2, %v1108_v21 }
 0x1d7   :  { %v2020_v15 = vpack.c.bf16 %v1898_v31, %v1897_v43  ;;  %3845 = vmatprep.mubr.msk.bf16.mxu1 %vm4507_vm0, %v4506_v0  ;;  %v1416_v42 = vadd.f32 %v5572_v41, %v1415_v4  ;;  %v1110_v58 = vpack.c.bf16 %v1015_v49, %v1014_v61  ;;  %v698_v43 = vadd.f32 %v5467_v29, %v5567_v59 }
 0x1d8   :  { %v3747_v53 = vpop.f32.mrf.mxu1  ;;  %v1018_v61 = vmax.f32 %v703_v12, 0.0  ;;  %v1019_v49 = vmax.f32 %v706_v23, 0.0 }
 0x1d9   :  { %3998 = vmatmul.mubr.msk.bf16.gmra.mxu0 %vm1167_vm2, %v2020_v15  ;;  %v1899_v52 = vmax.f32 %v1416_v42, 0.0  ;;  %v1016_v53 = vmax.f32 %v695_v60, 0.0  ;;  %v1017_v42 = vmax.f32 %v698_v43, 0.0 }
 0x1da   :  { %v1418_v56 = vpop.f32.mrf.mxu1  ;;  %4001 = vmatprep.mubr.msk.bf16.mxu0 %vm4507_vm0, %v4506_v0  ;;  %v1112_v39 = vpack.c.bf16 %v1019_v49, %v1018_v61 }
 0x1db   :  { %v1419_v32 = vadd.f32 %v5572_v41, %v1418_v56 }
 0x1dc   :  { %v3748_v35 = vpop.f32.mrf.mxu1 }
 0x1dd   :  { %v1900_v26 = vmax.f32 %v1419_v32, 0.0 }
 0x1de   :  { %v1423_v1 = vpop.f32.mrf.mxu1  ;;  %3846 = vmatmul.mubr.msk.bf16.gmra.mxu1 %vm1167_vm2, %v1109_v33  ;;  %v1111_v33 = vpack.c.bf16 %v1017_v42, %v1016_v53 }
 0x1df   :  { %v2021_v40 = vpack.c.bf16 %v1900_v26, %v1899_v52  ;;  %3849 = vmatprep.mubr.msk.bf16.mxu1 %vm4507_vm0, %v4506_v0  ;;  %v1424_v17 = vadd.f32 %v5572_v41, %v1423_v1 }
 0x1e0   :  { %v3751_v21 = vpop.f32.mrf.mxu1 }
 0x1e1   :  { %4002 = vmatmul.mubr.msk.bf16.gmra.mxu0 %vm1167_vm2, %v2021_v40  ;;  %v1901_v4 = vmax.f32 %v1424_v17, 0.0 }
 0x1e2   :  { %v1426_v45 = vpop.f32.mrf.mxu1  ;;  %4005 = vmatprep.mubr.msk.bf16.mxu0 %vm4507_vm0, %v4506_v0 }
 0x1e3   :  { %v1427_v8 = vadd.f32 %v5572_v41, %v1426_v45 }
 0x1e4   :  { %v3752_v31 = vpop.f32.mrf.mxu1 }
 0x1e5   :  { %v1902_v15 = vmax.f32 %v1427_v8, 0.0 }
 0x1e6   :  { %v1431_v3 = vpop.f32.mrf.mxu1  ;;  %3850 = vmatmul.mubr.msk.bf16.gmra.mxu1 %vm1167_vm2, %v1110_v58 }
 0x1e7   :  { %v2022_v7 = vpack.c.bf16 %v1902_v15, %v1901_v4  ;;  %3853 = vmatprep.mubr.msk.bf16.mxu1 %vm4507_vm0, %v4506_v0  ;;  %v1432_v32 = vadd.f32 %v5572_v41, %v1431_v3 }
 0x1e8   :  { %v3755_v56 = vpop.f32.mrf.mxu1 }
 0x1e9   :  { %4006 = vmatmul.mubr.msk.bf16.gmra.mxu0 %vm1167_vm2, %v2022_v7  ;;  %v1903_v52 = vmax.f32 %v1432_v32, 0.0 }
 0x1ea   :  { %v1434_v28 = vpop.f32.mrf.mxu1  ;;  %4009 = vmatprep.mubr.msk.bf16.mxu0 %vm4507_vm0, %v4506_v0 }
 0x1eb   :  { %v1435_v59 = vadd.f32 %v5572_v41, %v1434_v28 }
 0x1ec   :  { %v3756_v35 = vpop.f32.mrf.mxu1 }
 0x1ed   :  { %v1904_v26 = vmax.f32 %v1435_v59, 0.0 }
 0x1ee   :  { %v1439_v1 = vpop.f32.mrf.mxu1  ;;  %3854 = vmatmul.mubr.msk.bf16.gmra.mxu1 %vm1167_vm2, %v1111_v33 }
 0x1ef   :  { %v2023_v40 = vpack.c.bf16 %v1904_v26, %v1903_v52  ;;  %3857 = vmatprep.mubr.msk.bf16.mxu1 %vm4507_vm0, %v4506_v0  ;;  %v1440_v17 = vadd.f32 %v5572_v41, %v1439_v1 }
 0x1f0   :  { %v3759_v21 = vpop.f32.mrf.mxu1 }
 0x1f1   :  { %4010 = vmatmul.mubr.msk.bf16.gmra.mxu0 %vm1167_vm2, %v2023_v40  ;;  %v1905_v8 = vmax.f32 %v1440_v17, 0.0 }
 0x1f2   :  { %v1442_v51 = vpop.f32.mrf.mxu1  ;;  %4013 = vmatprep.mubr.msk.bf16.mxu0 %vm4507_vm0, %v4506_v0 }
 0x1f3   :  { %v1443_v29 = vadd.f32 %v5572_v41, %v1442_v51 }
 0x1f4   :  { %v3760_v45 = vpop.f32.mrf.mxu1 }
 0x1f5   :  { %v1906_v58 = vmax.f32 %v1443_v29, 0.0 }
 0x1f6   :  { %v1447_v60 = vpop.f32.mrf.mxu1  ;;  %3858 = vmatmul.mubr.msk.bf16.gmra.mxu1 %vm1167_vm2, %v1112_v39 }
 0x1f7   :  { %v2024_v43 = vpack.c.bf16 %v1906_v58, %v1905_v8  ;;  %3861 = vmatprep.mubr.msk.bf16.mxu1 %vm4507_vm0, %v4506_v0  ;;  %v1448_v4 = vadd.f32 %v5572_v41, %v1447_v60 }
 0x1f8   :  { %v3763_v31 = vpop.f32.mrf.mxu1 }
 0x1f9   :  { %4014 = vmatmul.mubr.msk.bf16.gmra.mxu0 %vm1167_vm2, %v2024_v43  ;;  %v1907_v53 = vmax.f32 %v1448_v4, 0.0 }
 0x1fa   :  { %v1450_v15 = vpop.f32.mrf.mxu1  ;;  %4017 = vmatprep.mubr.msk.bf16.mxu0 %vm4507_vm0, %v4506_v0 }
 0x1fb   :  { %v1451_v3 = vadd.f32 %v5572_v41, %v1450_v15 }
 0x1fc   :  { %v3764_v7 = vpop.f32.mrf.mxu1 }
 0x1fd   :  { %v1908_v42 = vmax.f32 %v1451_v3, 0.0 }
 0x1fe   :  { %v1455_v56 = vpop.f32.mrf.mxu1  ;;  %3862 = vmatmul.mubr.msk.bf16.gmra.mxu1 %vm1167_vm2, %v5044_v48 }
 0x1ff   :  { %v2025_v32 = vpack.c.bf16 %v1908_v42, %v1907_v53  ;;  %3865 = vmatprep.mubr.msk.bf16.mxu1 %vm4507_vm0, %v4506_v0  ;;  %v1456_v59 = vadd.f32 %v5572_v41, %v1455_v56 }
 0x200   :  { %v3767_v28 = vpop.f32.mrf.mxu1 }
 0x201   :  { %4018 = vmatmul.mubr.msk.bf16.gmra.mxu0 %vm1167_vm2, %v2025_v32  ;;  %v1909_v35 = vmax.f32 %v1456_v59, 0.0 }
 0x202   :  { %v1458_v33 = vpop.f32.mrf.mxu1  ;;  %4021 = vmatprep.mubr.msk.bf16.mxu0 %vm4507_vm0, %v4506_v0 }
 0x203   :  { %v1459_v12 = vadd.f32 %v5572_v41, %v1458_v33 }
 0x204   :  { %v3768_v23 = vpop.f32.mrf.mxu1 }
 0x205   :  { %v1910_v52 = vmax.f32 %v1459_v12, 0.0 }
 0x206   :  { %v1463_v26 = vpop.f32.mrf.mxu1  ;;  %3866 = vmatmul.mubr.msk.bf16.gmra.mxu1 %vm1167_vm2, %v5073_v5 }
 0x207   :  { %v2026_v48 = vpack.c.bf16 %v1910_v52, %v1909_v35  ;;  %3869 = vmatprep.mubr.msk.bf16.mxu1 %vm4507_vm0, %v4506_v0  ;;  %v1464_v40 = vadd.f32 %v5572_v41, %v1463_v26 }
 0x208   :  { %v3771_v1 = vpop.f32.mrf.mxu1 }
 0x209   :  { %4022 = vmatmul.mubr.msk.bf16.gmra.mxu0 %vm1167_vm2, %v2026_v48  ;;  %v1911_v17 = vmax.f32 %v1464_v40, 0.0 }
 0x20a   :  { %v1466_v61 = vpop.f32.mrf.mxu1  ;;  %4025 = vmatprep.mubr.msk.bf16.mxu0 %vm4507_vm0, %v4506_v0 }
 0x20b   :  { %v1467_v49 = vadd.f32 %v5572_v41, %v1466_v61 }
 0x20c   :  { %v3772_v21 = vpop.f32.mrf.mxu1 }
 0x20d   :  { %v1912_v51 = vmax.f32 %v1467_v49, 0.0 }
 0x20e   :  { %v1471_v29 = vpop.f32.mrf.mxu1  ;;  %3870 = vmatmul.mubr.msk.bf16.gmra.mxu1 %vm1167_vm2, %v5099_v24 }
 0x20f   :  { %v2027_v5 = vpack.c.bf16 %v1912_v51, %v1911_v17  ;;  %3873 = vmatprep.mubr.msk.bf16.mxu1 %vm4507_vm0, %v4506_v0  ;;  %v1472_v45 = vadd.f32 %v5572_v41, %v1471_v29 }
 0x210   :  { %v3775_v39 = vpop.f32.mrf.mxu1 }
 0x211   :  { %4026 = vmatmul.mubr.msk.bf16.gmra.mxu0 %vm1167_vm2, %v2027_v5  ;;  %v1913_v43 = vmax.f32 %v1472_v45, 0.0 }
 0x212   :  { %v1474_v8 = vpop.f32.mrf.mxu1  ;;  %4029 = vmatprep.mubr.msk.bf16.mxu0 %vm4507_vm0, %v4506_v0 }
 0x213   :  { %v1475_v58 = vadd.f32 %v5572_v41, %v1474_v8 }
 0x214   :  { %v3776_v60 = vpop.f32.mrf.mxu1 }
 0x215   :  { %v1914_v31 = vmax.f32 %v1475_v58, 0.0 }
 0x216   :  { %v1479_v4 = vpop.f32.mrf.mxu1  ;;  %3874 = vmatmul.mubr.msk.bf16.gmra.mxu1 %vm1167_vm2, %v5125_v46 }
 0x217   :  { %v2028_v24 = vpack.c.bf16 %v1914_v31, %v1913_v43  ;;  %3877 = vmatprep.mubr.msk.bf16.mxu1 %vm4507_vm0, %v4506_v0  ;;  %v1480_v3 = vadd.f32 %v5572_v41, %v1479_v4 }
 0x218   :  { %v3779_v15 = vpop.f32.mrf.mxu1 }
 0x219   :  { %4030 = vmatmul.mubr.msk.bf16.gmra.mxu0 %vm1167_vm2, %v2028_v24  ;;  %v1915_v56 = vmax.f32 %v1480_v3, 0.0 }
 0x21a   :  { %v1482_v7 = vpop.f32.mrf.mxu1  ;;  %4033 = vmatprep.mubr.msk.bf16.mxu0 %vm4507_vm0, %v4506_v0 }
 0x21b   :  { %v1483_v53 = vadd.f32 %v5572_v41, %v1482_v7 }
 0x21c   :  { %v3780_v42 = vpop.f32.mrf.mxu1 }
 0x21d   :  { %v1916_v32 = vmax.f32 %v1483_v53, 0.0 }
 0x21e   :  { %v1487_v28 = vpop.f32.mrf.mxu1  ;;  %3878 = vmatmul.mubr.msk.bf16.gmra.mxu1 %vm1167_vm2, %v5151_v6 }
 0x21f   :  { %v2029_v46 = vpack.c.bf16 %v1916_v32, %v1915_v56  ;;  %3881 = vmatprep.mubr.msk.bf16.mxu1 %vm4507_vm0, %v4506_v0  ;;  %v1488_v33 = vadd.f32 %v5572_v41, %v1487_v28 }
 0x220   :  { %v3783_v59 = vpop.f32.mrf.mxu1 }
 0x221   :  { %4034 = vmatmul.mubr.msk.bf16.gmra.mxu0 %vm1167_vm2, %v2029_v46  ;;  %v1917_v52 = vmax.f32 %v1488_v33, 0.0 }
 0x222   :  { %v1490_v12 = vpop.f32.mrf.mxu1  ;;  %4037 = vmatprep.mubr.msk.bf16.mxu0 %vm4507_vm0, %v4506_v0 }
 0x223   :  { %v1491_v23 = vadd.f32 %v5572_v41, %v1490_v12 }
 0x224   :  { %v3784_v35 = vpop.f32.mrf.mxu1 }
 0x225   :  { %v1918_v26 = vmax.f32 %v1491_v23, 0.0 }
 0x226   :  { %v1495_v48 = vpop.f32.mrf.mxu1  ;;  %3882 = vmatmul.mubr.msk.bf16.gmra.mxu1 %vm1167_vm2, %v5178_v30 }
 0x227   :  { %v2030_v6 = vpack.c.bf16 %v1918_v26, %v1917_v52  ;;  %3885 = vmatprep.mubr.msk.bf16.mxu1 %vm4507_vm0, %v4506_v0  ;;  %v1496_v40 = vadd.f32 %v5572_v41, %v1495_v48 }
 0x228   :  { %v3787_v1 = vpop.f32.mrf.mxu1 }
 0x229   :  { %4038 = vmatmul.mubr.msk.bf16.gmra.mxu0 %vm1167_vm2, %v2030_v6  ;;  %v1919_v17 = vmax.f32 %v1496_v40, 0.0 }
 0x22a   :  { %v1498_v61 = vpop.f32.mrf.mxu1  ;;  %4041 = vmatprep.mubr.msk.bf16.mxu0 %vm4507_vm0, %v4506_v0 }
 0x22b   :  { %v1499_v49 = vadd.f32 %v5572_v41, %v1498_v61 }
 0x22c   :  { %v3788_v21 = vpop.f32.mrf.mxu1 }
 0x22d   :  { %v1920_v51 = vmax.f32 %v1499_v49, 0.0 }
 0x22e   :  { %v1503_v29 = vpop.f32.mrf.mxu1  ;;  %3886 = vmatmul.mubr.msk.bf16.gmra.mxu1 %vm1167_vm2, %v5202_v57 }
 0x22f   :  { %v2031_v30 = vpack.c.bf16 %v1920_v51, %v1919_v17  ;;  %3889 = vmatprep.mubr.msk.bf16.mxu1 %vm4507_vm0, %v4506_v0  ;;  %v1504_v39 = vadd.f32 %v5572_v41, %v1503_v29 }
 0x230   :  { %v3791_v5 = vpop.f32.mrf.mxu1 }
 0x231   :  { %4042 = vmatmul.mubr.msk.bf16.gmra.mxu0 %vm1167_vm2, %v2031_v30  ;;  %v1921_v60 = vmax.f32 %v1504_v39, 0.0 }
 0x232   :  { %v1506_v45 = vpop.f32.mrf.mxu1  ;;  %4045 = vmatprep.mubr.msk.bf16.mxu0 %vm4507_vm0, %v4506_v0 }
 0x233   :  { %v1507_v8 = vadd.f32 %v5572_v41, %v1506_v45 }
 0x234   :  { %v3792_v58 = vpop.f32.mrf.mxu1 }
 0x235   :  { %v1922_v43 = vmax.f32 %v1507_v8, 0.0 }
 0x236   :  { %v1511_v31 = vpop.f32.mrf.mxu1  ;;  %3890 = vmatmul.mubr.msk.bf16.gmra.mxu1 %vm1167_vm2, %v5220_v16 }
 0x237   :  { %v2032_v57 = vpack.c.bf16 %v1922_v43, %v1921_v60  ;;  %3893 = vmatprep.mubr.msk.bf16.mxu1 %vm4507_vm0, %v4506_v0  ;;  %v1512_v24 = vadd.f32 %v5572_v41, %v1511_v31 }
 0x238   :  { %v3795_v4 = vpop.f32.mrf.mxu1 }
 0x239   :  { %4046 = vmatmul.mubr.msk.bf16.gmra.mxu0 %vm1167_vm2, %v2032_v57  ;;  %v1923_v53 = vmax.f32 %v1512_v24, 0.0 }
 0x23a   :  { %v1514_v15 = vpop.f32.mrf.mxu1  ;;  %4049 = vmatprep.mubr.msk.bf16.mxu0 %vm4507_vm0, %v4506_v0 }
 0x23b   :  { %v1515_v3 = vadd.f32 %v5572_v41, %v1514_v15 }
 0x23c   :  { %v3796_v7 = vpop.f32.mrf.mxu1 }
 0x23d   :  { %v1924_v42 = vmax.f32 %v1515_v3, 0.0 }
 0x23e   :  { %v1519_v56 = vpop.f32.mrf.mxu1  ;;  %3894 = vmatmul.mubr.msk.bf16.gmra.mxu1 %vm1167_vm2, %v5235_v38 }
 0x23f   :  { %v2033_v16 = vpack.c.bf16 %v1924_v42, %v1923_v53  ;;  %3897 = vmatprep.mubr.msk.bf16.mxu1 %vm4507_vm0, %v4506_v0  ;;  %v1520_v28 = vadd.f32 %v5572_v41, %v1519_v56 }
 0x240   :  { %v3799_v32 = vpop.f32.mrf.mxu1 }
 0x241   :  { %4050 = vmatmul.mubr.msk.bf16.gmra.mxu0 %vm1167_vm2, %v2033_v16  ;;  %v1925_v12 = vmax.f32 %v1520_v28, 0.0 }
 0x242   :  { %v1522_v46 = vpop.f32.mrf.mxu1  ;;  %4053 = vmatprep.mubr.msk.bf16.mxu0 %vm4507_vm0, %v4506_v0 }
 0x243   :  { %v1523_v59 = vadd.f32 %v5572_v41, %v1522_v46 }
 0x244   :  { %v3800_v33 = vpop.f32.mrf.mxu1 }
 0x245   :  { %v1926_v23 = vmax.f32 %v1523_v59, 0.0 }
 0x246   :  { %v1527_v35 = vpop.f32.mrf.mxu1  ;;  %3898 = vmatmul.mubr.msk.bf16.gmra.mxu1 %vm1167_vm2, %v5250_v2 }
 0x247   :  { %v2034_v38 = vpack.c.bf16 %v1926_v23, %v1925_v12  ;;  %3901 = vmatprep.mubr.msk.bf16.mxu1 %vm4507_vm0, %v4506_v0  ;;  %v1528_v26 = vadd.f32 %v5572_v41, %v1527_v35 }
 0x248   :  { %v3803_v52 = vpop.f32.mrf.mxu1 }
 0x249   :  { %4054 = vmatmul.mubr.msk.bf16.gmra.mxu0 %vm1167_vm2, %v2034_v38  ;;  %v1927_v40 = vmax.f32 %v1528_v26, 0.0 }
 0x24a   :  { %v1530_v48 = vpop.f32.mrf.mxu1  ;;  %4057 = vmatprep.mubr.msk.bf16.mxu0 %vm4507_vm0, %v4506_v0 }
 0x24b   :  { %v1531_v6 = vadd.f32 %v5572_v41, %v1530_v48 }
 0x24c   :  { %v3804_v1 = vpop.f32.mrf.mxu1 }
 0x24d   :  { %v1928_v61 = vmax.f32 %v1531_v6, 0.0 }
 0x24e   :  { %v1535_v49 = vpop.f32.mrf.mxu1  ;;  %3902 = vmatmul.mubr.msk.bf16.gmra.mxu1 %vm1167_vm2, %v5265_v22 }
 0x24f   :  { %v2035_v2 = vpack.c.bf16 %v1928_v61, %v1927_v40  ;;  %3905 = vmatprep.mubr.msk.bf16.mxu1 %vm4507_vm0, %v4506_v0  ;;  %v1536_v17 = vadd.f32 %v5572_v41, %v1535_v49 }
 0x250   :  { %v3807_v21 = vpop.f32.mrf.mxu1 }
 0x251   :  { %4058 = vmatmul.mubr.msk.bf16.gmra.mxu0 %vm1167_vm2, %v2035_v2  ;;  %v1929_v5 = vmax.f32 %v1536_v17, 0.0 }
 0x252   :  { %v1538_v51 = vpop.f32.mrf.mxu1  ;;  %4061 = vmatprep.mubr.msk.bf16.mxu0 %vm4507_vm0, %v4506_v0 }
 0x253   :  { %v1539_v29 = vadd.f32 %v5572_v41, %v1538_v51 }
 0x254   :  { %v3808_v30 = vpop.f32.mrf.mxu1 }
 0x255   :  { %v1930_v39 = vmax.f32 %v1539_v29, 0.0 }
 0x256   :  { %v1543_v45 = vpop.f32.mrf.mxu1  ;;  %3906 = vmatmul.mubr.msk.bf16.gmra.mxu1 %vm1167_vm2, %v5280_v47 }
 0x257   :  { %v2036_v22 = vpack.c.bf16 %v1930_v39, %v1929_v5  ;;  %3909 = vmatprep.mubr.msk.bf16.mxu1 %vm4507_vm0, %v4506_v0  ;;  %v1544_v58 = vadd.f32 %v5572_v41, %v1543_v45 }
 0x258   :  { %v3811_v8 = vpop.f32.mrf.mxu1 }
 0x259   :  { %4062 = vmatmul.mubr.msk.bf16.gmra.mxu0 %vm1167_vm2, %v2036_v22  ;;  %v1931_v57 = vmax.f32 %v1544_v58, 0.0 }
 0x25a   :  { %v1546_v60 = vpop.f32.mrf.mxu1  ;;  %4065 = vmatprep.mubr.msk.bf16.mxu0 %vm4507_vm0, %v4506_v0 }
 0x25b   :  { %v1547_v43 = vadd.f32 %v5572_v41, %v1546_v60 }
 0x25c   :  { %v3812_v31 = vpop.f32.mrf.mxu1 }
 0x25d   :  { %v1932_v4 = vmax.f32 %v1547_v43, 0.0 }
 0x25e   :  { %v1551_v24 = vpop.f32.mrf.mxu1  ;;  %3910 = vmatmul.mubr.msk.bf16.gmra.mxu1 %vm1167_vm2, %v5295_v9 }
 0x25f   :  { %v2037_v47 = vpack.c.bf16 %v1932_v4, %v1931_v57  ;;  %3913 = vmatprep.mubr.msk.bf16.mxu1 %vm4507_vm0, %v4506_v0  ;;  %v1552_v3 = vadd.f32 %v5572_v41, %v1551_v24  ;;  %v5821_v4 = vld [vmem:[%s6719_s6] ss:$0 sm:$0xff] }
 0x260   :  { %v3815_v15 = vpop.f32.mrf.mxu1 }
 0x261   :  { %4066 = vmatmul.mubr.msk.bf16.gmra.mxu0 %vm1167_vm2, %v2037_v47  ;;  %v1933_v56 = vmax.f32 %v1552_v3, 0.0 }
 0x262   :  { %v1554_v7 = vpop.f32.mrf.mxu1  ;;  %4069 = vmatprep.mubr.msk.bf16.mxu0 %vm4507_vm0, %v4506_v0 }
 0x263   :  { %v1555_v53 = vadd.f32 %v5572_v41, %v1554_v7 }
 0x264   :  { %v3816_v42 = vpop.f32.mrf.mxu1 }
 0x265   :  { %v1934_v16 = vmax.f32 %v1555_v53, 0.0 }
 0x266   :  { %v1559_v32 = vpop.f32.mrf.mxu1  ;;  %3914 = vmatmul.mubr.msk.bf16.gmra.mxu1 %vm1167_vm2, %v5310_v34 }
 0x267   :  { %v2038_v9 = vpack.c.bf16 %v1934_v16, %v1933_v56  ;;  %3917 = vmatprep.mubr.msk.bf16.mxu1 %vm4507_vm0, %v4506_v0  ;;  %v1560_v46 = vadd.f32 %v5572_v41, %v1559_v32 }
 0x268   :  { %v3819_v28 = vpop.f32.mrf.mxu1 }
 0x269   :  { %4070 = vmatmul.mubr.msk.bf16.gmra.mxu0 %vm1167_vm2, %v2038_v9  ;;  %v1935_v23 = vmax.f32 %v1560_v46, 0.0 }
 0x26a   :  { %v1562_v59 = vpop.f32.mrf.mxu1  ;;  %4073 = vmatprep.mubr.msk.bf16.mxu0 %vm4507_vm0, %v4506_v0 }
 0x26b   :  { %v1563_v33 = vadd.f32 %v5572_v41, %v1562_v59 }
 0x26c   :  { %v3820_v12 = vpop.f32.mrf.mxu1 }
 0x26d   :  { %v1936_v35 = vmax.f32 %v1563_v33, 0.0 }
 0x26e   :  { %v1567_v38 = vpop.f32.mrf.mxu1  ;;  %3918 = vmatmul.mubr.msk.bf16.gmra.mxu1 %vm1167_vm2, %v5325_v62 }
 0x26f   :  { %v2039_v34 = vpack.c.bf16 %v1936_v35, %v1935_v23  ;;  %3921 = vmatprep.mubr.msk.bf16.mxu1 %vm4507_vm0, %v4506_v0  ;;  %v1568_v26 = vadd.f32 %v5572_v41, %v1567_v38 }
 0x270   :  { %v3823_v52 = vpop.f32.mrf.mxu1 }
 0x271   :  { %4074 = vmatmul.mubr.msk.bf16.gmra.mxu0 %vm1167_vm2, %v2039_v34  ;;  %v1937_v40 = vmax.f32 %v1568_v26, 0.0 }
 0x272   :  { %v1570_v48 = vpop.f32.mrf.mxu1  ;;  %4077 = vmatprep.mubr.msk.bf16.mxu0 %vm4507_vm0, %v4506_v0 }
 0x273   :  { %v1571_v6 = vadd.f32 %v5572_v41, %v1570_v48 }
 0x274   :  { %v3824_v1 = vpop.f32.mrf.mxu1 }
 0x275   :  { %v1938_v61 = vmax.f32 %v1571_v6, 0.0 }
 0x276   :  { %v1575_v49 = vpop.f32.mrf.mxu1  ;;  %3922 = vmatmul.mubr.msk.bf16.gmra.mxu1 %vm1167_vm2, %v5340_v27 }
 0x277   :  { %v2040_v62 = vpack.c.bf16 %v1938_v61, %v1937_v40  ;;  %3925 = vmatprep.mubr.msk.bf16.mxu1 %vm4507_vm0, %v4506_v0  ;;  %v1576_v21 = vadd.f32 %v5572_v41, %v1575_v49 }
 0x278   :  { %v3827_v2 = vpop.f32.mrf.mxu1 }
 0x279   :  { %4078 = vmatmul.mubr.msk.bf16.gmra.mxu0 %vm1167_vm2, %v2040_v62  ;;  %v1939_v30 = vmax.f32 %v1576_v21, 0.0 }
 0x27a   :  { %v1578_v17 = vpop.f32.mrf.mxu1  ;;  %4081 = vmatprep.mubr.msk.bf16.mxu0 %vm4507_vm0, %v4506_v0 }
 0x27b   :  { %v1579_v51 = vadd.f32 %v5572_v41, %v1578_v17 }
 0x27c   :  { %v3828_v29 = vpop.f32.mrf.mxu1 }
 0x27d   :  { %v1940_v5 = vmax.f32 %v1579_v51, 0.0 }
 0x27e   :  { %v1583_v39 = vpop.f32.mrf.mxu1  ;;  %3926 = vmatmul.mubr.msk.bf16.gmra.mxu1 %vm1167_vm2, %v5355_v54 }
 0x27f   :  { %v2041_v27 = vpack.c.bf16 %v1940_v5, %v1939_v30  ;;  %3929 = vmatprep.mubr.msk.bf16.mxu1 %vm4507_vm0, %v4506_v0  ;;  %v1584_v22 = vadd.f32 %v5572_v41, %v1583_v39 }
 0x280   :  { %v3831_v45 = vpop.f32.mrf.mxu1 }
 0x281   :  { %4082 = vmatmul.mubr.msk.bf16.gmra.mxu0 %vm1167_vm2, %v2041_v27  ;;  %v1941_v43 = vmax.f32 %v1584_v22, 0.0 }
 0x282   :  { %v1586_v8 = vpop.f32.mrf.mxu1  ;;  %4085 = vmatprep.mubr.msk.bf16.mxu0 %vm4507_vm0, %v4506_v0 }
 0x283   :  { %v1587_v58 = vadd.f32 %v5572_v41, %v1586_v8 }
 0x284   :  { %v3832_v60 = vpop.f32.mrf.mxu1 }
 0x285   :  { %v1942_v31 = vmax.f32 %v1587_v58, 0.0 }
 0x286   :  { %v1591_v57 = vpop.f32.mrf.mxu1  ;;  %3930 = vmatmul.mubr.msk.bf16.gmra.mxu1 %vm1167_vm2, %v5370_v19 }
 0x287   :  { %v2042_v54 = vpack.c.bf16 %v1942_v31, %v1941_v43  ;;  %3933 = vmatprep.mubr.msk.bf16.mxu1 %vm4507_vm0, %v4506_v0  ;;  %v1592_v47 = vadd.f32 %v5572_v41, %v1591_v57 }
 0x288   :  { %v3835_v24 = vpop.f32.mrf.mxu1 }
 0x289   :  { %v2327_v15 = vpop.f32.mrf.mxu0  ;;  %4086 = vmatmul.mubr.msk.bf16.gmra.mxu0 %vm1167_vm2, %v2042_v54  ;;  %v1943_v56 = vmax.f32 %v1592_v47, 0.0 }
 0x28a   :  { %v2328_v3 = vadd.f32 %v5821_v4, %v2327_v15  ;;  %v1594_v7 = vpop.f32.mrf.mxu1  ;;  %4089 = vmatprep.mubr.msk.bf16.mxu0 %vm4507_vm0, %v4506_v0 }
 0x28b   :  { %v1595_v19 = vadd.f32 %v5572_v41, %v1594_v7  ;;  %v3991_v53 = vpop.f32.mrf.mxu0 }
 0x28c   :  { %4250 = vtanh.f32 %v2328_v3  ;;  %v3836_v42 = vpop.f32.mrf.mxu1 }
 0x28d   :  { %v1944_v16 = vmax.f32 %v1595_v19, 0.0  ;;  %v2330_v32 = vpop.f32.mrf.mxu0 }
 0x28e   :  { %v2331_v9 = vadd.f32 %v5821_v4, %v2330_v32  ;;  %v1599_v28 = vpop.f32.mrf.mxu1  ;;  %3934 = vmatmul.mubr.msk.bf16.gmra.mxu1 %vm1167_vm2, %v5385_v50 }
 0x28f   :  { %v2043_v46 = vpack.c.bf16 %v1944_v16, %v1943_v56  ;;  %v3992_v59 = vpop.f32.mrf.mxu0  ;;  %3937 = vmatprep.mubr.msk.bf16.mxu1 %vm4507_vm0, %v4506_v0  ;;  %v1600_v12 = vadd.f32 %v5572_v41, %v1599_v28 }
 0x290   :  { %4252 = vtanh.f32 %v2331_v9  ;;  %v3839_v33 = vpop.f32.mrf.mxu1 }
 0x291   :  { %v2335_v23 = vpop.f32.mrf.mxu0  ;;  %4090 = vmatmul.mubr.msk.bf16.gmra.mxu0 %vm1167_vm2, %v2043_v46  ;;  %v1945_v26 = vmax.f32 %v1600_v12, 0.0 }
 0x292   :  { %v2336_v35 = vadd.f32 %v5821_v4, %v2335_v23  ;;  %v1602_v38 = vpop.f32.mrf.mxu1  ;;  %4093 = vmatprep.mubr.msk.bf16.mxu0 %vm4507_vm0, %v4506_v0 }
 0x293   :  { %v1603_v50 = vadd.f32 %v5572_v41, %v1602_v38  ;;  %v3995_v34 = vpop.f32.mrf.mxu0 }
 0x294   :  { %4254 = vtanh.f32 %v2336_v35  ;;  %v3840_v52 = vpop.f32.mrf.mxu1 }
 0x295   :  { %v1946_v48 = vmax.f32 %v1603_v50, 0.0  ;;  %v2338_v6 = vpop.f32.mrf.mxu0 }
 0x296   :  { %v2339_v1 = vadd.f32 %v5821_v4, %v2338_v6  ;;  %v1607_v40 = vpop.f32.mrf.mxu1  ;;  %3938 = vmatmul.mubr.msk.bf16.gmra.mxu1 %vm1167_vm2, %v5400_v18 }
 0x297   :  { %v2044_v61 = vpack.c.bf16 %v1946_v48, %v1945_v26  ;;  %v3996_v49 = vpop.f32.mrf.mxu0  ;;  %3941 = vmatprep.mubr.msk.bf16.mxu1 %vm4507_vm0, %v4506_v0  ;;  %v1608_v21 = vadd.f32 %v5572_v41, %v1607_v40 }
 0x298   :  { %4256 = vtanh.f32 %v2339_v1  ;;  %v3843_v62 = vpop.f32.mrf.mxu1 }
 0x299   :  { %v4251_v2 = vpop.eup %4250  ;;  %v2343_v17 = vpop.f32.mrf.mxu0  ;;  %4094 = vmatmul.mubr.msk.bf16.gmra.mxu0 %vm1167_vm2, %v2044_v61  ;;  %v1947_v27 = vmax.f32 %v1608_v21, 0.0 }
 0x29a   :  { %2955 = vst.msk [vmem:[%s6720_s7] sm:$0xff] %vm2954_vm3, %v4251_v2  ;;  %v2344_v18 = vadd.f32 %v5821_v4, %v2343_v17  ;;  %v1610_v51 = vpop.f32.mrf.mxu1  ;;  %4097 = vmatprep.mubr.msk.bf16.mxu0 %vm4507_vm0, %v4506_v0 }
 0x29b   :  { %v1611_v29 = vadd.f32 %v5572_v41, %v1610_v51  ;;  %v3999_v30 = vpop.f32.mrf.mxu0 }
 0x29c   :  { %4258 = vtanh.f32 %v2344_v18  ;;  %v3844_v5 = vpop.f32.mrf.mxu1 }
 0x29d   :  { %v4253_v39 = vpop.eup %4252  ;;  %v1948_v45 = vmax.f32 %v1611_v29, 0.0  ;;  %v2346_v22 = vpop.f32.mrf.mxu0 }
 0x29e   :  { %2956 = vst.msk [vmem:[%s6720_s7 + $0x8] sm:$0xff] %vm2954_vm3, %v4253_v39  ;;  %v2347_v8 = vadd.f32 %v5821_v4, %v2346_v22  ;;  %v1615_v58 = vpop.f32.mrf.mxu1  ;;  %3942 = vmatmul.mubr.msk.bf16.gmra.mxu1 %vm1167_vm2, %v5415_v36 }
 0x29f   :  { %v2045_v60 = vpack.c.bf16 %v1948_v45, %v1947_v27  ;;  %v4000_v43 = vpop.f32.mrf.mxu0  ;;  %3945 = vmatprep.mubr.msk.bf16.mxu1 %vm4507_vm0, %v4506_v0  ;;  %v1616_v54 = vadd.f32 %v5572_v41, %v1615_v58 }
 0x2a0   :  { %4260 = vtanh.f32 %v2347_v8  ;;  %v3847_v31 = vpop.f32.mrf.mxu1  ;;  %v5926_v43 = vld [vmem:[%s6718_s4] ss:$0 sm:$0xff] }
 0x2a1   :  { %v4255_v57 = vpop.eup %4254  ;;  %v2351_v24 = vpop.f32.mrf.mxu0  ;;  %4098 = vmatmul.mubr.msk.bf16.gmra.mxu0 %vm1167_vm2, %v2045_v60  ;;  %v1949_v53 = vmax.f32 %v1616_v54, 0.0 }
 0x2a2   :  { %2957 = vst.msk [vmem:[%s6720_s7 + $0x10] sm:$0xff] %vm2954_vm3, %v4255_v57  ;;  %v2352_v36 = vadd.f32 %v5821_v4, %v2351_v24  ;;  %v1618_v47 = vpop.f32.mrf.mxu1  ;;  %4101 = vmatprep.mubr.msk.bf16.mxu0 %vm4507_vm0, %v4506_v0 }
 0x2a3   :  { %v1619_v15 = vadd.f32 %v5572_v41, %v1618_v47  ;;  %v4003_v3 = vpop.f32.mrf.mxu0 }
 0x2a4   :  { %4262 = vtanh.f32 %v2352_v36  ;;  %v3848_v7 = vpop.f32.mrf.mxu1 }
 0x2a5   :  { %v4257_v19 = vpop.eup %4256  ;;  %v1950_v42 = vmax.f32 %v1619_v15, 0.0  ;;  %v2354_v56 = vpop.f32.mrf.mxu0 }
 0x2a6   :  { %2958 = vst.msk [vmem:[%s6720_s7 + $0x18] sm:$0xff] %vm2954_vm3, %v4257_v19  ;;  %v2355_v16 = vadd.f32 %v5821_v4, %v2354_v56  ;;  %v1623_v32 = vpop.f32.mrf.mxu1  ;;  %3946 = vmatmul.mubr.msk.bf16.gmra.mxu1 %vm1167_vm2, %v5430_v25 }
 0x2a7   :  { %v2046_v9 = vpack.c.bf16 %v1950_v42, %v1949_v53  ;;  %v4004_v28 = vpop.f32.mrf.mxu0  ;;  %3949 = vmatprep.mubr.msk.bf16.mxu1 %vm4507_vm0, %v4506_v0  ;;  %v1624_v33 = vadd.f32 %v5572_v41, %v1623_v32 }
 0x2a8   :  { %4264 = vtanh.f32 %v2355_v16  ;;  %v3851_v46 = vpop.f32.mrf.mxu1 }
 0x2a9   :  { %v4259_v59 = vpop.eup %4258  ;;  %v2359_v12 = vpop.f32.mrf.mxu0  ;;  %4102 = vmatmul.mubr.msk.bf16.gmra.mxu0 %vm1167_vm2, %v2046_v9  ;;  %v1951_v52 = vmax.f32 %v1624_v33, 0.0 }
 0x2aa   :  { %2959 = vst.msk [vmem:[%s6720_s7 + $0x20] sm:$0xff] %vm2954_vm3, %v4259_v59  ;;  %v2360_v25 = vadd.f32 %v5821_v4, %v2359_v12  ;;  %v1626_v23 = vpop.f32.mrf.mxu1  ;;  %4105 = vmatprep.mubr.msk.bf16.mxu0 %vm4507_vm0, %v4506_v0 }
 0x2ab   :  { %v1627_v35 = vadd.f32 %v5572_v41, %v1626_v23  ;;  %v4007_v38 = vpop.f32.mrf.mxu0 }
 0x2ac   :  { %4266 = vtanh.f32 %v2360_v25  ;;  %v3852_v50 = vpop.f32.mrf.mxu1 }
 0x2ad   :  { %v4261_v34 = vpop.eup %4260  ;;  %v1952_v26 = vmax.f32 %v1627_v35, 0.0  ;;  %v2362_v48 = vpop.f32.mrf.mxu0 }
 0x2ae   :  { %2960 = vst.msk [vmem:[%s6720_s7 + $0x28] sm:$0xff] %vm2954_vm3, %v4261_v34  ;;  %v2363_v6 = vadd.f32 %v5821_v4, %v2362_v48  ;;  %v1631_v1 = vpop.f32.mrf.mxu1  ;;  %3950 = vmatmul.mubr.msk.bf16.gmra.mxu1 %vm1167_vm2, %v5445_v14 }
 0x2af   :  { %v2047_v40 = vpack.c.bf16 %v1952_v26, %v1951_v52  ;;  %v4008_v61 = vpop.f32.mrf.mxu0  ;;  %3953 = vmatprep.mubr.msk.bf16.mxu1 %vm4507_vm0, %v4506_v0  ;;  %v1632_v2 = vadd.f32 %v5572_v41, %v1631_v1 }
 0x2b0   :  { %4268 = vtanh.f32 %v2363_v6  ;;  %v3855_v49 = vpop.f32.mrf.mxu1 }
 0x2b1   :  { %v4263_v62 = vpop.eup %4262  ;;  %v2367_v21 = vpop.f32.mrf.mxu0  ;;  %4106 = vmatmul.mubr.msk.bf16.gmra.mxu0 %vm1167_vm2, %v2047_v40  ;;  %v1953_v5 = vmax.f32 %v1632_v2, 0.0 }
 0x2b2   :  { %2961 = vst.msk [vmem:[%s6720_s7 + $0x30] sm:$0xff] %vm2954_vm3, %v4263_v62  ;;  %v2368_v14 = vadd.f32 %v5821_v4, %v2367_v21  ;;  %v1634_v17 = vpop.f32.mrf.mxu1  ;;  %4109 = vmatprep.mubr.msk.bf16.mxu0 %vm4507_vm0, %v4506_v0 }
 0x2b3   :  { %v1635_v18 = vadd.f32 %v5572_v41, %v1634_v17  ;;  %v4011_v51 = vpop.f32.mrf.mxu0 }
 0x2b4   :  { %4270 = vtanh.f32 %v2368_v14  ;;  %v3856_v29 = vpop.f32.mrf.mxu1 }
 0x2b5   :  { %v4265_v30 = vpop.eup %4264  ;;  %v1954_v39 = vmax.f32 %v1635_v18, 0.0  ;;  %v2370_v27 = vpop.f32.mrf.mxu0 }
 0x2b6   :  { %2962 = vst.msk [vmem:[%s6720_s7 + $0x38] sm:$0xff] %vm2954_vm3, %v4265_v30  ;;  %v2371_v45 = vadd.f32 %v5821_v4, %v2370_v27  ;;  %v1639_v22 = vpop.f32.mrf.mxu1  ;;  %3954 = vmatmul.mubr.msk.bf16.gmra.mxu1 %vm1167_vm2, %v5460_v11 }
 0x2b7   :  { %v2048_v8 = vpack.c.bf16 %v1954_v39, %v1953_v5  ;;  %v4012_v41 = vpop.f32.mrf.mxu0  ;;  %3957 = vmatprep.mubr.msk.bf16.mxu1 %vm4507_vm0, %v4506_v0  ;;  %v1640_v31 = vadd.f32 %v5926_v43, %v1639_v22 }
 0x2b8   :  { %4272 = vtanh.f32 %v2371_v45  ;;  %v3859_v58 = vpop.f32.mrf.mxu1 }
 0x2b9   :  { %v4267_v60 = vpop.eup %4266  ;;  %v2375_v57 = vpop.f32.mrf.mxu0  ;;  %4110 = vmatmul.mubr.msk.bf16.gmra.mxu0 %vm1167_vm2, %v2048_v8  ;;  %v1955_v3 = vmax.f32 %v1640_v31, 0.0 }
 0x2ba   :  { %2963 = vst.msk [vmem:[%s6720_s7 + $0x40] sm:$0xff] %vm2954_vm3, %v4267_v60  ;;  %v2376_v11 = vadd.f32 %v5821_v4, %v2375_v57  ;;  %v1642_v54 = vpop.f32.mrf.mxu1  ;;  %4113 = vmatprep.mubr.msk.bf16.mxu0 %vm4507_vm0, %v4506_v0 }
 0x2bb   :  { %v1643_v24 = vadd.f32 %v5926_v43, %v1642_v54  ;;  %v4015_v36 = vpop.f32.mrf.mxu0 }
 0x2bc   :  { %4274 = vtanh.f32 %v2376_v11  ;;  %v3860_v47 = vpop.f32.mrf.mxu1 }
 0x2bd   :  { %v4269_v15 = vpop.eup %4268  ;;  %v1956_v7 = vmax.f32 %v1643_v24, 0.0  ;;  %v2378_v19 = vpop.f32.mrf.mxu0 }
 0x2be   :  { %2964 = vst.msk [vmem:[%s6720_s7 + $0x48] sm:$0xff] %vm2954_vm3, %v4269_v15  ;;  %v2379_v53 = vadd.f32 %v5821_v4, %v2378_v19  ;;  %v1647_v42 = vpop.f32.mrf.mxu1  ;;  %3958 = vmatmul.mubr.msk.bf16.gmra.mxu1 %vm1167_vm2, %v5480_v63 }
 0x2bf   :  { %v2049_v56 = vpack.c.bf16 %v1956_v7, %v1955_v3  ;;  %v4016_v16 = vpop.f32.mrf.mxu0  ;;  %3961 = vmatprep.mubr.msk.bf16.mxu1 %vm4507_vm0, %v4506_v0  ;;  %v1648_v28 = vadd.f32 %v5926_v43, %v1647_v42 }
 0x2c0   :  { %4276 = vtanh.f32 %v2379_v53  ;;  %v3863_v32 = vpop.f32.mrf.mxu1 }
 0x2c1   :  { %v4271_v9 = vpop.eup %4270  ;;  %v2383_v46 = vpop.f32.mrf.mxu0  ;;  %4114 = vmatmul.mubr.msk.bf16.gmra.mxu0 %vm1167_vm2, %v2049_v56  ;;  %v1957_v35 = vmax.f32 %v1648_v28, 0.0 }
 0x2c2   :  { %2965 = vst.msk [vmem:[%s6720_s7 + $0x50] sm:$0xff] %vm2954_vm3, %v4271_v9  ;;  %v2384_v63 = vadd.f32 %v5821_v4, %v2383_v46  ;;  %v1650_v59 = vpop.f32.mrf.mxu1  ;;  %4117 = vmatprep.mubr.msk.bf16.mxu0 %vm4507_vm0, %v4506_v0 }
 0x2c3   :  { %v1651_v33 = vadd.f32 %v5926_v43, %v1650_v59  ;;  %v4019_v12 = vpop.f32.mrf.mxu0 }
 0x2c4   :  { %4278 = vtanh.f32 %v2384_v63  ;;  %v3864_v25 = vpop.f32.mrf.mxu1 }
 0x2c5   :  { %v4273_v23 = vpop.eup %4272  ;;  %v1958_v38 = vmax.f32 %v1651_v33, 0.0  ;;  %v2386_v50 = vpop.f32.mrf.mxu0 }
 0x2c6   :  { %2966 = vst.msk [vmem:[%s6720_s7 + $0x58] sm:$0xff] %vm2954_vm3, %v4273_v23  ;;  %v2387_v34 = vadd.f32 %v5821_v4, %v2386_v50  ;;  %v1655_v52 = vpop.f32.mrf.mxu1  ;;  %3962 = vmatmul.mubr.msk.bf16.gmra.mxu1 %vm1167_vm2, %v5495_v37 }
 0x2c7   :  { %v2050_v26 = vpack.c.bf16 %v1958_v38, %v1957_v35  ;;  %v4020_v48 = vpop.f32.mrf.mxu0  ;;  %3965 = vmatprep.mubr.msk.bf16.mxu1 %vm4507_vm0, %v4506_v0  ;;  %v1656_v40 = vadd.f32 %v5926_v43, %v1655_v52 }
 0x2c8   :  { %4280 = vtanh.f32 %v2387_v34  ;;  %v3867_v6 = vpop.f32.mrf.mxu1 }
 0x2c9   :  { %v4275_v1 = vpop.eup %4274  ;;  %v2391_v61 = vpop.f32.mrf.mxu0  ;;  %4118 = vmatmul.mubr.msk.bf16.gmra.mxu0 %vm1167_vm2, %v2050_v26  ;;  %v1959_v17 = vmax.f32 %v1656_v40, 0.0  ;;  %v4502_v6 = vld [vmem:[%s6717_s2] ss:$0 sm:$0xff] }
 0x2ca   :  { %2967 = vst.msk [vmem:[%s6720_s7 + $0x60] sm:$0xff] %vm2954_vm3, %v4275_v1  ;;  %v2392_v37 = vadd.f32 %v5821_v4, %v2391_v61  ;;  %v1658_v49 = vpop.f32.mrf.mxu1  ;;  %4121 = vmatprep.mubr.msk.bf16.mxu0 %vm4507_vm0, %v4506_v0  ;;  %v951_v1 = vadd.f32 %v4502_v6, %v5554_v13 }
 0x2cb   :  { %v1659_v62 = vadd.f32 %v5926_v43, %v1658_v49  ;;  %v4023_v2 = vpop.f32.mrf.mxu0 }
 0x2cc   :  { %4282 = vtanh.f32 %v2392_v37  ;;  %v3868_v21 = vpop.f32.mrf.mxu1  ;;  %v1080_v13 = vmax.f32 %v951_v1, 0.0 }
 0x2cd   :  { %v4277_v14 = vpop.eup %4276  ;;  %v1960_v18 = vmax.f32 %v1659_v62, 0.0  ;;  %v2394_v51 = vpop.f32.mrf.mxu0 }
 0x2ce   :  { %2968 = vst.msk [vmem:[%s6720_s7 + $0x68] sm:$0xff] %vm2954_vm3, %v4277_v14  ;;  %v2395_v29 = vadd.f32 %v5821_v4, %v2394_v51  ;;  %v1663_v30 = vpop.f32.mrf.mxu1  ;;  %3966 = vmatmul.mubr.msk.bf16.gmra.mxu1 %vm1167_vm2, %v5510_v10 }
 0x2cf   :  { %v2051_v5 = vpack.c.bf16 %v1960_v18, %v1959_v17  ;;  %v4024_v39 = vpop.f32.mrf.mxu0  ;;  %3969 = vmatprep.mubr.msk.bf16.mxu1 %vm4507_vm0, %v4506_v0  ;;  %v1664_v22 = vadd.f32 %v5926_v43, %v1663_v30 }
 0x2d0   :  { %4284 = vtanh.f32 %v2395_v29  ;;  %v3871_v27 = vpop.f32.mrf.mxu1 }
 0x2d1   :  { %v4279_v45 = vpop.eup %4278  ;;  %v2399_v8 = vpop.f32.mrf.mxu0  ;;  %4122 = vmatmul.mubr.msk.bf16.gmra.mxu0 %vm1167_vm2, %v2051_v5  ;;  %v1961_v11 = vmax.f32 %v1664_v22, 0.0 }
 0x2d2   :  { %2969 = vst.msk [vmem:[%s6720_s7 + $0x70] sm:$0xff] %vm2954_vm3, %v4279_v45  ;;  %v2400_v10 = vadd.f32 %v5821_v4, %v2399_v8  ;;  %v1666_v41 = vpop.f32.mrf.mxu1  ;;  %4125 = vmatprep.mubr.msk.bf16.mxu0 %vm4507_vm0, %v4506_v0  ;;  %v1143_v45 = vpack.c.bf16 %v1080_v13, %v1080_v13 }
 0x2d3   :  { %v1667_v58 = vadd.f32 %v5926_v43, %v1666_v41  ;;  %v4027_v60 = vpop.f32.mrf.mxu0 }
 0x2d4   :  { %4286 = vtanh.f32 %v2400_v10  ;;  %v3872_v31 = vpop.f32.mrf.mxu1 }
 0x2d5   :  { %v4281_v57 = vpop.eup %4280  ;;  %v1962_v54 = vmax.f32 %v1667_v58, 0.0  ;;  %v2402_v24 = vpop.f32.mrf.mxu0 }
 0x2d6   :  { %2970 = vst.msk [vmem:[%s6720_s7 + $0x78] sm:$0xff] %vm2954_vm3, %v4281_v57  ;;  %v2403_v36 = vadd.f32 %v5821_v4, %v2402_v24  ;;  %v1671_v47 = vpop.f32.mrf.mxu1  ;;  %3970 = vmatmul.mubr.msk.bf16.gmra.mxu1 %vm1167_vm2, %v5525_v55 }
 0x2d7   :  { %v2052_v15 = vpack.c.bf16 %v1962_v54, %v1961_v11  ;;  %v4028_v3 = vpop.f32.mrf.mxu0  ;;  %3973 = vmatprep.mubr.msk.bf16.mxu1 %vm4507_vm0, %v4506_v0  ;;  %v1672_v53 = vadd.f32 %v5926_v43, %v1671_v47 }
 0x2d8   :  { %4288 = vtanh.f32 %v2403_v36  ;;  %v3875_v7 = vpop.f32.mrf.mxu1 }
 0x2d9   :  { %v4283_v19 = vpop.eup %4282  ;;  %v2407_v42 = vpop.f32.mrf.mxu0  ;;  %4126 = vmatmul.mubr.msk.bf16.gmra.mxu0 %vm1167_vm2, %v2052_v15  ;;  %v1963_v46 = vmax.f32 %v1672_v53, 0.0 }
 0x2da   :  { %2971 = vst.msk [vmem:[%s6720_s7 + $0x80] sm:$0xff] %vm2954_vm3, %v4283_v19  ;;  %v2408_v55 = vadd.f32 %v5821_v4, %v2407_v42  ;;  %v1674_v56 = vpop.f32.mrf.mxu1  ;;  %4129 = vmatprep.mubr.msk.bf16.mxu0 %vm4507_vm0, %v4506_v0 }
 0x2db   :  { %v1675_v16 = vadd.f32 %v5926_v43, %v1674_v56  ;;  %v4031_v32 = vpop.f32.mrf.mxu0 }
 0x2dc   :  { %4290 = vtanh.f32 %v2408_v55  ;;  %v3876_v9 = vpop.f32.mrf.mxu1 }
 0x2dd   :  { %v4285_v28 = vpop.eup %4284  ;;  %v1964_v63 = vmax.f32 %v1675_v16, 0.0  ;;  %v2410_v59 = vpop.f32.mrf.mxu0 }
 0x2de   :  { %2972 = vst.msk [vmem:[%s6720_s7 + $0x88] sm:$0xff] %vm2954_vm3, %v4285_v28  ;;  %v2411_v33 = vadd.f32 %v5821_v4, %v2410_v59  ;;  %v1679_v12 = vpop.f32.mrf.mxu1  ;;  %3974 = vmatmul.mubr.msk.bf16.gmra.mxu1 %vm1167_vm2, %v5540_v44 }
 0x2df   :  { %v2053_v25 = vpack.c.bf16 %v1964_v63, %v1963_v46  ;;  %v4032_v23 = vpop.f32.mrf.mxu0  ;;  %3977 = vmatprep.mubr.msk.bf16.mxu1 %vm4507_vm0, %v4506_v0  ;;  %v1680_v50 = vadd.f32 %v5926_v43, %v1679_v12 }
 0x2e0   :  { %4292 = vtanh.f32 %v2411_v33  ;;  %v3879_v35 = vpop.f32.mrf.mxu1 }
 0x2e1   :  { %v4287_v38 = vpop.eup %4286  ;;  %v2415_v34 = vpop.f32.mrf.mxu0  ;;  %4130 = vmatmul.mubr.msk.bf16.gmra.mxu0 %vm1167_vm2, %v2053_v25  ;;  %v1965_v37 = vmax.f32 %v1680_v50, 0.0 }
 0x2e2   :  { %2973 = vst.msk [vmem:[%s6720_s7 + $0x90] sm:$0xff] %vm2954_vm3, %v4287_v38  ;;  %v2416_v44 = vadd.f32 %v5821_v4, %v2415_v34  ;;  %v1682_v52 = vpop.f32.mrf.mxu1  ;;  %4133 = vmatprep.mubr.msk.bf16.mxu0 %vm4507_vm0, %v4506_v0 }
 0x2e3   :  { %v1683_v26 = vadd.f32 %v5926_v43, %v1682_v52  ;;  %v4035_v48 = vpop.f32.mrf.mxu0 }
 0x2e4   :  { %4294 = vtanh.f32 %v2416_v44  ;;  %v3880_v40 = vpop.f32.mrf.mxu1 }
 0x2e5   :  { %v4289_v61 = vpop.eup %4288  ;;  %v1966_v49 = vmax.f32 %v1683_v26, 0.0  ;;  %v2418_v62 = vpop.f32.mrf.mxu0 }
 0x2e6   :  { %2974 = vst.msk [vmem:[%s6720_s7 + $0x98] sm:$0xff] %vm2954_vm3, %v4289_v61  ;;  %v2419_v2 = vadd.f32 %v5821_v4, %v2418_v62  ;;  %v1687_v21 = vpop.f32.mrf.mxu1  ;;  %3978 = vmatmul.mubr.msk.bf16.gmra.mxu1 %vm1167_vm2, %v5557_v20 }
 0x2e7   :  { %v2054_v14 = vpack.c.bf16 %v1966_v49, %v1965_v37  ;;  %v4036_v17 = vpop.f32.mrf.mxu0  ;;  %3981 = vmatprep.mubr.msk.bf16.mxu1 %vm4507_vm0, %v4506_v0  ;;  %v1688_v29 = vadd.f32 %v5926_v43, %v1687_v21 }
 0x2e8   :  { %4296 = vtanh.f32 %v2419_v2  ;;  %v3883_v18 = vpop.f32.mrf.mxu1 }
 0x2e9   :  { %v4291_v51 = vpop.eup %4290  ;;  %v2423_v30 = vpop.f32.mrf.mxu0  ;;  %4134 = vmatmul.mubr.msk.bf16.gmra.mxu0 %vm1167_vm2, %v2054_v14  ;;  %v1967_v10 = vmax.f32 %v1688_v29, 0.0 }
 0x2ea   :  { %2975 = vst.msk [vmem:[%s6720_s7 + $0xa0] sm:$0xff] %vm2954_vm3, %v4291_v51  ;;  %v2424_v20 = vadd.f32 %v5821_v4, %v2423_v30  ;;  %v1690_v5 = vpop.f32.mrf.mxu1  ;;  %4137 = vmatprep.mubr.msk.bf16.mxu0 %vm4507_vm0, %v4506_v0 }
 0x2eb   :  { %v1691_v39 = vadd.f32 %v5926_v43, %v1690_v5  ;;  %v4039_v27 = vpop.f32.mrf.mxu0 }
 0x2ec   :  { %4298 = vtanh.f32 %v2424_v20  ;;  %v3884_v22 = vpop.f32.mrf.mxu1 }
 0x2ed   :  { %v4293_v8 = vpop.eup %4292  ;;  %v1968_v41 = vmax.f32 %v1691_v39, 0.0  ;;  %v2426_v58 = vpop.f32.mrf.mxu0 }
 0x2ee   :  { %2976 = vst.msk [vmem:[%s6720_s7 + $0xa8] sm:$0xff] %vm2954_vm3, %v4293_v8  ;;  %v2427_v60 = vadd.f32 %v5821_v4, %v2426_v58  ;;  %v1695_v31 = vpop.f32.mrf.mxu1  ;;  %3982 = vmatmul.mubr.msk.bf16.gmra.mxu1 %vm1167_vm2, %v1143_v45 }
 0x2ef   :  { %v2055_v57 = vpack.c.bf16 %v1968_v41, %v1967_v10  ;;  %v4040_v11 = vpop.f32.mrf.mxu0  ;;  %v1696_v36 = vadd.f32 %v5926_v43, %v1695_v31 }
 0x2f0   :  { %4300 = vtanh.f32 %v2427_v60  ;;  %v3887_v54 = vpop.f32.mrf.mxu1 }
 0x2f1   :  { %v4295_v24 = vpop.eup %4294  ;;  %v2431_v47 = vpop.f32.mrf.mxu0  ;;  %4138 = vmatmul.mubr.msk.bf16.gmra.mxu0 %vm1167_vm2, %v2055_v57  ;;  %v1969_v55 = vmax.f32 %v1696_v36, 0.0 }
 0x2f2   :  { %2977 = vst.msk [vmem:[%s6720_s7 + $0xb0] sm:$0xff] %vm2954_vm3, %v4295_v24  ;;  %v2432_v15 = vadd.f32 %v5821_v4, %v2431_v47  ;;  %v1698_v3 = vpop.f32.mrf.mxu1  ;;  %4141 = vmatprep.mubr.msk.bf16.mxu0 %vm4507_vm0, %v4506_v0 }
 0x2f3   :  { %v1699_v7 = vadd.f32 %v5926_v43, %v1698_v3  ;;  %v4043_v19 = vpop.f32.mrf.mxu0 }
 0x2f4   :  { %4302 = vtanh.f32 %v2432_v15  ;;  %v3888_v53 = vpop.f32.mrf.mxu1 }
 0x2f5   :  { %v4297_v42 = vpop.eup %4296  ;;  %v1970_v56 = vmax.f32 %v1699_v7, 0.0  ;;  %v2434_v16 = vpop.f32.mrf.mxu0 }
 0x2f6   :  { %2978 = vst.msk [vmem:[%s6720_s7 + $0xb8] sm:$0xff] %vm2954_vm3, %v4297_v42  ;;  %v2435_v32 = vadd.f32 %v5821_v4, %v2434_v16  ;;  %v1703_v9 = vpop.f32.mrf.mxu1 }
 0x2f7   :  { %v2056_v28 = vpack.c.bf16 %v1970_v56, %v1969_v55  ;;  %v4044_v46 = vpop.f32.mrf.mxu0  ;;  %v1704_v33 = vadd.f32 %v5926_v43, %v1703_v9 }
 0x2f8   :  { %4304 = vtanh.f32 %v2435_v32  ;;  %v3891_v63 = vpop.f32.mrf.mxu1 }
 0x2f9   :  { %v4299_v59 = vpop.eup %4298  ;;  %v2439_v12 = vpop.f32.mrf.mxu0  ;;  %4142 = vmatmul.mubr.msk.bf16.gmra.mxu0 %vm1167_vm2, %v2056_v28  ;;  %v1971_v44 = vmax.f32 %v1704_v33, 0.0 }
 0x2fa   :  { %2979 = vst.msk [vmem:[%s6720_s7 + $0xc0] sm:$0xff] %vm2954_vm3, %v4299_v59  ;;  %v2440_v25 = vadd.f32 %v5821_v4, %v2439_v12  ;;  %v1706_v23 = vpop.f32.mrf.mxu1  ;;  %4145 = vmatprep.mubr.msk.bf16.mxu0 %vm4507_vm0, %v4506_v0 }
 0x2fb   :  { %v1707_v35 = vadd.f32 %v5926_v43, %v1706_v23  ;;  %v4047_v38 = vpop.f32.mrf.mxu0 }
 0x2fc   :  { %4306 = vtanh.f32 %v2440_v25  ;;  %v3892_v50 = vpop.f32.mrf.mxu1 }
 0x2fd   :  { %v4301_v34 = vpop.eup %4300  ;;  %v1972_v52 = vmax.f32 %v1707_v35, 0.0  ;;  %v2442_v26 = vpop.f32.mrf.mxu0 }
 0x2fe   :  { %2980 = vst.msk [vmem:[%s6720_s7 + $0xc8] sm:$0xff] %vm2954_vm3, %v4301_v34  ;;  %v2443_v48 = vadd.f32 %v5821_v4, %v2442_v26  ;;  %v1711_v6 = vpop.f32.mrf.mxu1 }
 0x2ff   :  { %v2057_v1 = vpack.c.bf16 %v1972_v52, %v1971_v44  ;;  %v4048_v40 = vpop.f32.mrf.mxu0  ;;  %v1712_v49 = vadd.f32 %v5926_v43, %v1711_v6 }
 0x300   :  { %4308 = vtanh.f32 %v2443_v48  ;;  %v3895_v61 = vpop.f32.mrf.mxu1 }
 0x301   :  { %v4303_v37 = vpop.eup %4302  ;;  %v2447_v62 = vpop.f32.mrf.mxu0  ;;  %4146 = vmatmul.mubr.msk.bf16.gmra.mxu0 %vm1167_vm2, %v2057_v1  ;;  %v1973_v51 = vmax.f32 %v1712_v49, 0.0 }
 0x302   :  { %2981 = vst.msk [vmem:[%s6720_s7 + $0xd0] sm:$0xff] %vm2954_vm3, %v4303_v37  ;;  %v2448_v2 = vadd.f32 %v5821_v4, %v2447_v62  ;;  %v1714_v21 = vpop.f32.mrf.mxu1  ;;  %4149 = vmatprep.mubr.msk.bf16.mxu0 %vm4507_vm0, %v4506_v0 }
 0x303   :  { %v1715_v14 = vadd.f32 %v5926_v43, %v1714_v21  ;;  %v4051_v17 = vpop.f32.mrf.mxu0 }
 0x304   :  { %4310 = vtanh.f32 %v2448_v2  ;;  %v3896_v13 = vpop.f32.mrf.mxu1 }
 0x305   :  { %v4305_v18 = vpop.eup %4304  ;;  %v1974_v29 = vmax.f32 %v1715_v14, 0.0  ;;  %v2450_v30 = vpop.f32.mrf.mxu0 }
 0x306   :  { %2982 = vst.msk [vmem:[%s6720_s7 + $0xd8] sm:$0xff] %vm2954_vm3, %v4305_v18  ;;  %v2451_v20 = vadd.f32 %v5821_v4, %v2450_v30  ;;  %v1719_v5 = vpop.f32.mrf.mxu1 }
 0x307   :  { %v2058_v39 = vpack.c.bf16 %v1974_v29, %v1973_v51  ;;  %v4052_v27 = vpop.f32.mrf.mxu0  ;;  %v1720_v8 = vadd.f32 %v5926_v43, %v1719_v5 }
 0x308   :  { %4312 = vtanh.f32 %v2451_v20  ;;  %v3899_v45 = vpop.f32.mrf.mxu1 }
 0x309   :  { %v4307_v22 = vpop.eup %4306  ;;  %v2455_v10 = vpop.f32.mrf.mxu0  ;;  %4150 = vmatmul.mubr.msk.bf16.gmra.mxu0 %vm1167_vm2, %v2058_v39  ;;  %v1975_v54 = vmax.f32 %v1720_v8, 0.0 }
 0x30a   :  { %2983 = vst.msk [vmem:[%s6720_s7 + $0xe0] sm:$0xff] %vm2954_vm3, %v4307_v22  ;;  %v2456_v41 = vadd.f32 %v5821_v4, %v2455_v10  ;;  %v1722_v58 = vpop.f32.mrf.mxu1  ;;  %4153 = vmatprep.mubr.msk.bf16.mxu0 %vm4507_vm0, %v4506_v0 }
 0x30b   :  { %v1723_v60 = vadd.f32 %v5926_v43, %v1722_v58  ;;  %v4055_v31 = vpop.f32.mrf.mxu0 }
 0x30c   :  { %4314 = vtanh.f32 %v2456_v41  ;;  %v3900_v57 = vpop.f32.mrf.mxu1 }
 0x30d   :  { %v4309_v11 = vpop.eup %4308  ;;  %v1976_v24 = vmax.f32 %v1723_v60, 0.0  ;;  %v2458_v36 = vpop.f32.mrf.mxu0 }
 0x30e   :  { %2984 = vst.msk [vmem:[%s6720_s7 + $0xe8] sm:$0xff] %vm2954_vm3, %v4309_v11  ;;  %v2459_v47 = vadd.f32 %v5821_v4, %v2458_v36  ;;  %v1727_v15 = vpop.f32.mrf.mxu1 }
 0x30f   :  { %v2059_v3 = vpack.c.bf16 %v1976_v24, %v1975_v54  ;;  %v4056_v7 = vpop.f32.mrf.mxu0  ;;  %v1728_v42 = vadd.f32 %v5926_v43, %v1727_v15 }
 0x310   :  { %4316 = vtanh.f32 %v2459_v47  ;;  %v3903_v19 = vpop.f32.mrf.mxu1 }
 0x311   :  { %v4311_v53 = vpop.eup %4310  ;;  %v2463_v55 = vpop.f32.mrf.mxu0  ;;  %4154 = vmatmul.mubr.msk.bf16.gmra.mxu0 %vm1167_vm2, %v2059_v3  ;;  %v1977_v63 = vmax.f32 %v1728_v42, 0.0 }
 0x312   :  { %2985 = vst.msk [vmem:[%s6720_s7 + $0xf0] sm:$0xff] %vm2954_vm3, %v4311_v53  ;;  %v2464_v56 = vadd.f32 %v5821_v4, %v2463_v55  ;;  %v1730_v16 = vpop.f32.mrf.mxu1  ;;  %4157 = vmatprep.mubr.msk.bf16.mxu0 %vm4507_vm0, %v4506_v0 }
 0x313   :  { %v1731_v32 = vadd.f32 %v5926_v43, %v1730_v16  ;;  %v4059_v9 = vpop.f32.mrf.mxu0 }
 0x314   :  { %4318 = vtanh.f32 %v2464_v56  ;;  %v3904_v28 = vpop.f32.mrf.mxu1 }
 0x315   :  { %v4313_v46 = vpop.eup %4312  ;;  %v1978_v59 = vmax.f32 %v1731_v32, 0.0  ;;  %v2466_v33 = vpop.f32.mrf.mxu0 }
 0x316   :  { %2986 = vst.msk [vmem:[%s6720_s7 + $0xf8] sm:$0xff] %vm2954_vm3, %v4313_v46  ;;  %v2467_v12 = vadd.f32 %v5821_v4, %v2466_v33  ;;  %v1735_v25 = vpop.f32.mrf.mxu1 }
 0x317   :  { %v2060_v23 = vpack.c.bf16 %v1978_v59, %v1977_v63  ;;  %v4060_v35 = vpop.f32.mrf.mxu0  ;;  %v1736_v34 = vadd.f32 %v5926_v43, %v1735_v25 }
 0x318   :  { %4320 = vtanh.f32 %v2467_v12  ;;  %v3907_v38 = vpop.f32.mrf.mxu1 }
 0x319   :  { %v4315_v50 = vpop.eup %4314  ;;  %v2471_v44 = vpop.f32.mrf.mxu0  ;;  %4158 = vmatmul.mubr.msk.bf16.gmra.mxu0 %vm1167_vm2, %v2060_v23  ;;  %v1979_v61 = vmax.f32 %v1736_v34, 0.0 }
 0x31a   :  { %2987 = vst.msk [vmem:[%s6720_s7 + $0x100] sm:$0xff] %vm2954_vm3, %v4315_v50  ;;  %v2472_v52 = vadd.f32 %v5821_v4, %v2471_v44  ;;  %v1738_v26 = vpop.f32.mrf.mxu1  ;;  %4161 = vmatprep.mubr.msk.bf16.mxu0 %vm4507_vm0, %v4506_v0 }
 0x31b   :  { %v1739_v48 = vadd.f32 %v5926_v43, %v1738_v26  ;;  %v4063_v6 = vpop.f32.mrf.mxu0 }
 0x31c   :  { %4322 = vtanh.f32 %v2472_v52  ;;  %v3908_v1 = vpop.f32.mrf.mxu1 }
 0x31d   :  { %v4317_v40 = vpop.eup %4316  ;;  %v1980_v37 = vmax.f32 %v1739_v48, 0.0  ;;  %v2474_v49 = vpop.f32.mrf.mxu0 }
 0x31e   :  { %2988 = vst.msk [vmem:[%s6720_s7 + $0x108] sm:$0xff] %vm2954_vm3, %v4317_v40  ;;  %v2475_v62 = vadd.f32 %v5821_v4, %v2474_v49  ;;  %v1743_v2 = vpop.f32.mrf.mxu1 }
 0x31f   :  { %v2061_v21 = vpack.c.bf16 %v1980_v37, %v1979_v61  ;;  %v4064_v14 = vpop.f32.mrf.mxu0  ;;  %v1744_v18 = vadd.f32 %v5926_v43, %v1743_v2 }
 0x320   :  { %4324 = vtanh.f32 %v2475_v62  ;;  %v3911_v17 = vpop.f32.mrf.mxu1 }
 0x321   :  { %v4319_v13 = vpop.eup %4318  ;;  %v2479_v51 = vpop.f32.mrf.mxu0  ;;  %4162 = vmatmul.mubr.msk.bf16.gmra.mxu0 %vm1167_vm2, %v2061_v21  ;;  %v1981_v45 = vmax.f32 %v1744_v18, 0.0 }
 0x322   :  { %2989 = vst.msk [vmem:[%s6720_s7 + $0x110] sm:$0xff] %vm2954_vm3, %v4319_v13  ;;  %v2480_v29 = vadd.f32 %v5821_v4, %v2479_v51  ;;  %v1746_v30 = vpop.f32.mrf.mxu1  ;;  %4165 = vmatprep.mubr.msk.bf16.mxu0 %vm4507_vm0, %v4506_v0 }
 0x323   :  { %v1747_v20 = vadd.f32 %v5926_v43, %v1746_v30  ;;  %v4067_v5 = vpop.f32.mrf.mxu0 }
 0x324   :  { %4326 = vtanh.f32 %v2480_v29  ;;  %v3912_v39 = vpop.f32.mrf.mxu1 }
 0x325   :  { %v4321_v27 = vpop.eup %4320  ;;  %v1982_v22 = vmax.f32 %v1747_v20, 0.0  ;;  %v2482_v8 = vpop.f32.mrf.mxu0 }
 0x326   :  { %2990 = vst.msk [vmem:[%s6720_s7 + $0x118] sm:$0xff] %vm2954_vm3, %v4321_v27  ;;  %v2483_v10 = vadd.f32 %v5821_v4, %v2482_v8  ;;  %v1751_v41 = vpop.f32.mrf.mxu1 }
 0x327   :  { %v2062_v58 = vpack.c.bf16 %v1982_v22, %v1981_v45  ;;  %v4068_v60 = vpop.f32.mrf.mxu0  ;;  %v1752_v11 = vadd.f32 %v5926_v43, %v1751_v41 }
 0x328   :  { %4328 = vtanh.f32 %v2483_v10  ;;  %v3915_v31 = vpop.f32.mrf.mxu1 }
 0x329   :  { %v4323_v57 = vpop.eup %4322  ;;  %v2487_v54 = vpop.f32.mrf.mxu0  ;;  %4166 = vmatmul.mubr.msk.bf16.gmra.mxu0 %vm1167_vm2, %v2062_v58  ;;  %v1983_v19 = vmax.f32 %v1752_v11, 0.0 }
 0x32a   :  { %2991 = vst.msk [vmem:[%s6720_s7 + $0x120] sm:$0xff] %vm2954_vm3, %v4323_v57  ;;  %v2488_v24 = vadd.f32 %v5821_v4, %v2487_v54  ;;  %v1754_v36 = vpop.f32.mrf.mxu1  ;;  %4169 = vmatprep.mubr.msk.bf16.mxu0 %vm4507_vm0, %v4506_v0 }
 0x32b   :  { %v1755_v47 = vadd.f32 %v5926_v43, %v1754_v36  ;;  %v4071_v15 = vpop.f32.mrf.mxu0 }
 0x32c   :  { %4330 = vtanh.f32 %v2488_v24  ;;  %v3916_v3 = vpop.f32.mrf.mxu1 }
 0x32d   :  { %v4325_v7 = vpop.eup %4324  ;;  %v1984_v53 = vmax.f32 %v1755_v47, 0.0  ;;  %v2490_v42 = vpop.f32.mrf.mxu0 }
 0x32e   :  { %2992 = vst.msk [vmem:[%s6720_s7 + $0x128] sm:$0xff] %vm2954_vm3, %v4325_v7  ;;  %v2491_v55 = vadd.f32 %v5821_v4, %v2490_v42  ;;  %v1759_v56 = vpop.f32.mrf.mxu1  ;;  %v6191_v4 = vld [vmem:[%s6719_s6] ss:$0 sm:$0xff] }
 0x32f   :  { %v2063_v16 = vpack.c.bf16 %v1984_v53, %v1983_v19  ;;  %v4072_v32 = vpop.f32.mrf.mxu0  ;;  %v1760_v46 = vadd.f32 %v5926_v43, %v1759_v56 }
 0x330   :  { %4332 = vtanh.f32 %v2491_v55  ;;  %v3919_v9 = vpop.f32.mrf.mxu1 }
 0x331   :  { %v4327_v28 = vpop.eup %4326  ;;  %v2495_v63 = vpop.f32.mrf.mxu0  ;;  %4170 = vmatmul.mubr.msk.bf16.gmra.mxu0 %vm1167_vm2, %v2063_v16  ;;  %v1985_v38 = vmax.f32 %v1760_v46, 0.0 }
 0x332   :  { %2993 = vst.msk [vmem:[%s6720_s7 + $0x130] sm:$0xff] %vm2954_vm3, %v4327_v28  ;;  %v2496_v59 = vadd.f32 %v6191_v4, %v2495_v63  ;;  %v1762_v33 = vpop.f32.mrf.mxu1  ;;  %4173 = vmatprep.mubr.msk.bf16.mxu0 %vm4507_vm0, %v4506_v0 }
 0x333   :  { %v1763_v12 = vadd.f32 %v5926_v43, %v1762_v33  ;;  %v4075_v25 = vpop.f32.mrf.mxu0 }
 0x334   :  { %4334 = vtanh.f32 %v2496_v59  ;;  %v3920_v23 = vpop.f32.mrf.mxu1 }
 0x335   :  { %v4329_v35 = vpop.eup %4328  ;;  %v1986_v50 = vmax.f32 %v1763_v12, 0.0  ;;  %v2498_v34 = vpop.f32.mrf.mxu0 }
 0x336   :  { %2994 = vst.msk [vmem:[%s6720_s7 + $0x138] sm:$0xff] %vm2954_vm3, %v4329_v35  ;;  %v2499_v44 = vadd.f32 %v6191_v4, %v2498_v34  ;;  %v1767_v52 = vpop.f32.mrf.mxu1 }
 0x337   :  { %v2064_v26 = vpack.c.bf16 %v1986_v50, %v1985_v38  ;;  %v4076_v48 = vpop.f32.mrf.mxu0  ;;  %v1768_v40 = vadd.f32 %v5926_v43, %v1767_v52 }
 0x338   :  { %4336 = vtanh.f32 %v2499_v44  ;;  %v3923_v6 = vpop.f32.mrf.mxu1 }
 0x339   :  { %v4331_v1 = vpop.eup %4330  ;;  %v2503_v61 = vpop.f32.mrf.mxu0  ;;  %4174 = vmatmul.mubr.msk.bf16.gmra.mxu0 %vm1167_vm2, %v2064_v26  ;;  %v1987_v17 = vmax.f32 %v1768_v40, 0.0 }
 0x33a   :  { %2995 = vst.msk [vmem:[%s6720_s7 + $0x140] sm:$0xff] %vm2954_vm3, %v4331_v1  ;;  %v2504_v37 = vadd.f32 %v6191_v4, %v2503_v61  ;;  %v1770_v49 = vpop.f32.mrf.mxu1  ;;  %4177 = vmatprep.mubr.msk.bf16.mxu0 %vm4507_vm0, %v4506_v0 }
 0x33b   :  { %v1771_v62 = vadd.f32 %v5926_v43, %v1770_v49  ;;  %v4079_v2 = vpop.f32.mrf.mxu0 }
 0x33c   :  { %4338 = vtanh.f32 %v2504_v37  ;;  %v3924_v21 = vpop.f32.mrf.mxu1 }
 0x33d   :  { %v4333_v14 = vpop.eup %4332  ;;  %v1988_v13 = vmax.f32 %v1771_v62, 0.0  ;;  %v2506_v18 = vpop.f32.mrf.mxu0 }
 0x33e   :  { %2996 = vst.msk [vmem:[%s6720_s7 + $0x148] sm:$0xff] %vm2954_vm3, %v4333_v14  ;;  %v2507_v51 = vadd.f32 %v6191_v4, %v2506_v18  ;;  %v1775_v29 = vpop.f32.mrf.mxu1 }
 0x33f   :  { %v2065_v30 = vpack.c.bf16 %v1988_v13, %v1987_v17  ;;  %v4080_v20 = vpop.f32.mrf.mxu0  ;;  %v1776_v27 = vadd.f32 %v5926_v43, %v1775_v29 }
 0x340   :  { %4340 = vtanh.f32 %v2507_v51  ;;  %v3927_v5 = vpop.f32.mrf.mxu1 }
 0x341   :  { %v4335_v39 = vpop.eup %4334  ;;  %v2511_v45 = vpop.f32.mrf.mxu0  ;;  %4178 = vmatmul.mubr.msk.bf16.gmra.mxu0 %vm1167_vm2, %v2065_v30  ;;  %v1989_v31 = vmax.f32 %v1776_v27, 0.0 }
 0x342   :  { %2997 = vst.msk [vmem:[%s6720_s7 + $0x150] sm:$0xff] %vm2954_vm3, %v4335_v39  ;;  %v2512_v22 = vadd.f32 %v6191_v4, %v2511_v45  ;;  %v1778_v8 = vpop.f32.mrf.mxu1  ;;  %4181 = vmatprep.mubr.msk.bf16.mxu0 %vm4507_vm0, %v4506_v0 }
 0x343   :  { %v1779_v10 = vadd.f32 %v5926_v43, %v1778_v8  ;;  %v4083_v41 = vpop.f32.mrf.mxu0 }
 0x344   :  { %4342 = vtanh.f32 %v2512_v22  ;;  %v3928_v58 = vpop.f32.mrf.mxu1 }
 0x345   :  { %v4337_v60 = vpop.eup %4336  ;;  %v1990_v57 = vmax.f32 %v1779_v10, 0.0  ;;  %v2514_v11 = vpop.f32.mrf.mxu0 }
 0x346   :  { %2998 = vst.msk [vmem:[%s6720_s7 + $0x158] sm:$0xff] %vm2954_vm3, %v4337_v60  ;;  %v2515_v54 = vadd.f32 %v6191_v4, %v2514_v11  ;;  %v1783_v24 = vpop.f32.mrf.mxu1 }
 0x347   :  { %v2066_v36 = vpack.c.bf16 %v1990_v57, %v1989_v31  ;;  %v4084_v47 = vpop.f32.mrf.mxu0  ;;  %v1784_v7 = vadd.f32 %v5926_v43, %v1783_v24 }
 0x348   :  { %4344 = vtanh.f32 %v2515_v54  ;;  %v3931_v15 = vpop.f32.mrf.mxu1 }
 0x349   :  { %v4339_v3 = vpop.eup %4338  ;;  %v2519_v19 = vpop.f32.mrf.mxu0  ;;  %4182 = vmatmul.mubr.msk.bf16.gmra.mxu0 %vm1167_vm2, %v2066_v36  ;;  %v1991_v9 = vmax.f32 %v1784_v7, 0.0 }
 0x34a   :  { %2999 = vst.msk [vmem:[%s6720_s7 + $0x160] sm:$0xff] %vm2954_vm3, %v4339_v3  ;;  %v2520_v53 = vadd.f32 %v6191_v4, %v2519_v19  ;;  %v1786_v42 = vpop.f32.mrf.mxu1  ;;  %4185 = vmatprep.mubr.msk.bf16.mxu0 %vm4507_vm0, %v4506_v0 }
 0x34b   :  { %v1787_v55 = vadd.f32 %v5926_v43, %v1786_v42  ;;  %v4087_v56 = vpop.f32.mrf.mxu0 }
 0x34c   :  { %4346 = vtanh.f32 %v2520_v53  ;;  %v3932_v16 = vpop.f32.mrf.mxu1 }
 0x34d   :  { %v4341_v32 = vpop.eup %4340  ;;  %v1992_v28 = vmax.f32 %v1787_v55, 0.0  ;;  %v2522_v46 = vpop.f32.mrf.mxu0  ;;  %v6295_v16 = vld [vmem:[%s6718_s4] ss:$0 sm:$0xff] }
 0x34e   :  { %3000 = vst.msk [vmem:[%s6720_s7 + $0x168] sm:$0xff] %vm2954_vm3, %v4341_v32  ;;  %v2523_v63 = vadd.f32 %v6191_v4, %v2522_v46  ;;  %v1791_v59 = vpop.f32.mrf.mxu1 }
 0x34f   :  { %v2067_v33 = vpack.c.bf16 %v1992_v28, %v1991_v9  ;;  %v4088_v12 = vpop.f32.mrf.mxu0  ;;  %v1792_v35 = vadd.f32 %v5926_v43, %v1791_v59 }
 0x350   :  { %4348 = vtanh.f32 %v2523_v63  ;;  %v3935_v25 = vpop.f32.mrf.mxu1 }
 0x351   :  { %v4343_v23 = vpop.eup %4342  ;;  %v2527_v38 = vpop.f32.mrf.mxu0  ;;  %4186 = vmatmul.mubr.msk.bf16.gmra.mxu0 %vm1167_vm2, %v2067_v33  ;;  %v1993_v6 = vmax.f32 %v1792_v35, 0.0 }
 0x352   :  { %3001 = vst.msk [vmem:[%s6720_s7 + $0x170] sm:$0xff] %vm2954_vm3, %v4343_v23  ;;  %v2528_v50 = vadd.f32 %v6191_v4, %v2527_v38  ;;  %v1794_v34 = vpop.f32.mrf.mxu1  ;;  %4189 = vmatprep.mubr.msk.bf16.mxu0 %vm4507_vm0, %v4506_v0 }
 0x353   :  { %v1795_v44 = vadd.f32 %v5926_v43, %v1794_v34  ;;  %v4091_v52 = vpop.f32.mrf.mxu0 }
 0x354   :  { %4350 = vtanh.f32 %v2528_v50  ;;  %v3936_v26 = vpop.f32.mrf.mxu1 }
 0x355   :  { %v4345_v48 = vpop.eup %4344  ;;  %v1994_v1 = vmax.f32 %v1795_v44, 0.0  ;;  %v2530_v40 = vpop.f32.mrf.mxu0 }
 0x356   :  { %3002 = vst.msk [vmem:[%s6720_s7 + $0x178] sm:$0xff] %vm2954_vm3, %v4345_v48  ;;  %v2531_v61 = vadd.f32 %v6191_v4, %v2530_v40  ;;  %v1799_v37 = vpop.f32.mrf.mxu1 }
 0x357   :  { %v2068_v49 = vpack.c.bf16 %v1994_v1, %v1993_v6  ;;  %v4092_v62 = vpop.f32.mrf.mxu0  ;;  %v1800_v14 = vadd.f32 %v5926_v43, %v1799_v37 }
 0x358   :  { %4352 = vtanh.f32 %v2531_v61  ;;  %v3939_v2 = vpop.f32.mrf.mxu1 }
 0x359   :  { %v4347_v21 = vpop.eup %4346  ;;  %v2535_v17 = vpop.f32.mrf.mxu0  ;;  %4190 = vmatmul.mubr.msk.bf16.gmra.mxu0 %vm1167_vm2, %v2068_v49  ;;  %v1995_v5 = vmax.f32 %v1800_v14, 0.0 }
 0x35a   :  { %3003 = vst.msk [vmem:[%s6720_s7 + $0x180] sm:$0xff] %vm2954_vm3, %v4347_v21  ;;  %v2536_v13 = vadd.f32 %v6191_v4, %v2535_v17  ;;  %v1802_v18 = vpop.f32.mrf.mxu1  ;;  %4193 = vmatprep.mubr.msk.bf16.mxu0 %vm4507_vm0, %v4506_v0 }
 0x35b   :  { %v1803_v51 = vadd.f32 %v5926_v43, %v1802_v18  ;;  %v4095_v29 = vpop.f32.mrf.mxu0 }
 0x35c   :  { %4354 = vtanh.f32 %v2536_v13  ;;  %v3940_v30 = vpop.f32.mrf.mxu1 }
 0x35d   :  { %v4349_v20 = vpop.eup %4348  ;;  %v1996_v39 = vmax.f32 %v1803_v51, 0.0  ;;  %v2538_v27 = vpop.f32.mrf.mxu0 }
 0x35e   :  { %3004 = vst.msk [vmem:[%s6720_s7 + $0x188] sm:$0xff] %vm2954_vm3, %v4349_v20  ;;  %v2539_v45 = vadd.f32 %v6191_v4, %v2538_v27  ;;  %v1807_v22 = vpop.f32.mrf.mxu1 }
 0x35f   :  { %v2069_v8 = vpack.c.bf16 %v1996_v39, %v1995_v5  ;;  %v4096_v10 = vpop.f32.mrf.mxu0  ;;  %v1808_v60 = vadd.f32 %v5926_v43, %v1807_v22 }
 0x360   :  { %4356 = vtanh.f32 %v2539_v45  ;;  %v3943_v41 = vpop.f32.mrf.mxu1 }
 0x361   :  { %v4351_v58 = vpop.eup %4350  ;;  %v2543_v31 = vpop.f32.mrf.mxu0  ;;  %4194 = vmatmul.mubr.msk.bf16.gmra.mxu0 %vm1167_vm2, %v2069_v8  ;;  %v1997_v15 = vmax.f32 %v1808_v60, 0.0 }
 0x362   :  { %3005 = vst.msk [vmem:[%s6720_s7 + $0x190] sm:$0xff] %vm2954_vm3, %v4351_v58  ;;  %v2544_v57 = vadd.f32 %v6191_v4, %v2543_v31  ;;  %v1810_v11 = vpop.f32.mrf.mxu1  ;;  %4197 = vmatprep.mubr.msk.bf16.mxu0 %vm4507_vm0, %v4506_v0 }
 0x363   :  { %v1811_v54 = vadd.f32 %v5926_v43, %v1810_v11  ;;  %v4099_v24 = vpop.f32.mrf.mxu0 }
 0x364   :  { %4358 = vtanh.f32 %v2544_v57  ;;  %v3944_v36 = vpop.f32.mrf.mxu1 }
 0x365   :  { %v4353_v47 = vpop.eup %4352  ;;  %v1998_v3 = vmax.f32 %v1811_v54, 0.0  ;;  %v2546_v7 = vpop.f32.mrf.mxu0 }
 0x366   :  { %3006 = vst.msk [vmem:[%s6720_s7 + $0x198] sm:$0xff] %vm2954_vm3, %v4353_v47  ;;  %v2547_v19 = vadd.f32 %v6191_v4, %v2546_v7  ;;  %v1815_v53 = vpop.f32.mrf.mxu1 }
 0x367   :  { %v2070_v42 = vpack.c.bf16 %v1998_v3, %v1997_v15  ;;  %v4100_v55 = vpop.f32.mrf.mxu0  ;;  %v1816_v32 = vadd.f32 %v6295_v16, %v1815_v53 }
 0x368   :  { %4360 = vtanh.f32 %v2547_v19  ;;  %v3947_v56 = vpop.f32.mrf.mxu1 }
 0x369   :  { %v4355_v43 = vpop.eup %4354  ;;  %v2551_v9 = vpop.f32.mrf.mxu0  ;;  %4198 = vmatmul.mubr.msk.bf16.gmra.mxu0 %vm1167_vm2, %v2070_v42  ;;  %v1999_v25 = vmax.f32 %v1816_v32, 0.0 }
 0x36a   :  { %3007 = vst.msk [vmem:[%s6720_s7 + $0x1a0] sm:$0xff] %vm2954_vm3, %v4355_v43  ;;  %v2552_v28 = vadd.f32 %v6191_v4, %v2551_v9  ;;  %v1818_v46 = vpop.f32.mrf.mxu1  ;;  %4201 = vmatprep.mubr.msk.bf16.mxu0 %vm4507_vm0, %v4506_v0 }
 0x36b   :  { %v1819_v63 = vadd.f32 %v6295_v16, %v1818_v46  ;;  %v4103_v59 = vpop.f32.mrf.mxu0 }
 0x36c   :  { %4362 = vtanh.f32 %v2552_v28  ;;  %v3948_v33 = vpop.f32.mrf.mxu1 }
 0x36d   :  { %v4357_v12 = vpop.eup %4356  ;;  %v2000_v23 = vmax.f32 %v1819_v63, 0.0  ;;  %v2554_v35 = vpop.f32.mrf.mxu0 }
 0x36e   :  { %3008 = vst.msk [vmem:[%s6720_s7 + $0x1a8] sm:$0xff] %vm2954_vm3, %v4357_v12  ;;  %v2555_v38 = vadd.f32 %v6191_v4, %v2554_v35  ;;  %v1823_v50 = vpop.f32.mrf.mxu1 }
 0x36f   :  { %v2071_v34 = vpack.c.bf16 %v2000_v23, %v1999_v25  ;;  %v4104_v44 = vpop.f32.mrf.mxu0  ;;  %v1824_v48 = vadd.f32 %v6295_v16, %v1823_v50 }
 0x370   :  { %4364 = vtanh.f32 %v2555_v38  ;;  %v3951_v52 = vpop.f32.mrf.mxu1 }
 0x371   :  { %v4359_v26 = vpop.eup %4358  ;;  %v2559_v6 = vpop.f32.mrf.mxu0  ;;  %4202 = vmatmul.mubr.msk.bf16.gmra.mxu0 %vm1167_vm2, %v2071_v34  ;;  %v2001_v2 = vmax.f32 %v1824_v48, 0.0 }
 0x372   :  { %3009 = vst.msk [vmem:[%s6720_s7 + $0x1b0] sm:$0xff] %vm2954_vm3, %v4359_v26  ;;  %v2560_v1 = vadd.f32 %v6191_v4, %v2559_v6  ;;  %v1826_v40 = vpop.f32.mrf.mxu1  ;;  %4205 = vmatprep.mubr.msk.bf16.mxu0 %vm4507_vm0, %v4506_v0 }
 0x373   :  { %v1827_v61 = vadd.f32 %v6295_v16, %v1826_v40  ;;  %v4107_v37 = vpop.f32.mrf.mxu0 }
 0x374   :  { %4366 = vtanh.f32 %v2560_v1  ;;  %v3952_v49 = vpop.f32.mrf.mxu1 }
 0x375   :  { %v4361_v62 = vpop.eup %4360  ;;  %v2002_v21 = vmax.f32 %v1827_v61, 0.0  ;;  %v2562_v14 = vpop.f32.mrf.mxu0 }
 0x376   :  { %3010 = vst.msk [vmem:[%s6720_s7 + $0x1b8] sm:$0xff] %vm2954_vm3, %v4361_v62  ;;  %v2563_v17 = vadd.f32 %v6191_v4, %v2562_v14  ;;  %v1831_v13 = vpop.f32.mrf.mxu1 }
 0x377   :  { %v2072_v18 = vpack.c.bf16 %v2002_v21, %v2001_v2  ;;  %v4108_v51 = vpop.f32.mrf.mxu0  ;;  %v1832_v20 = vadd.f32 %v6295_v16, %v1831_v13 }
 0x378   :  { %4368 = vtanh.f32 %v2563_v17  ;;  %v3955_v29 = vpop.f32.mrf.mxu1 }
 0x379   :  { %v4363_v30 = vpop.eup %4362  ;;  %v2567_v5 = vpop.f32.mrf.mxu0  ;;  %4206 = vmatmul.mubr.msk.bf16.gmra.mxu0 %vm1167_vm2, %v2072_v18  ;;  %v2003_v41 = vmax.f32 %v1832_v20, 0.0 }
 0x37a   :  { %3011 = vst.msk [vmem:[%s6720_s7 + $0x1c0] sm:$0xff] %vm2954_vm3, %v4363_v30  ;;  %v2568_v39 = vadd.f32 %v6191_v4, %v2567_v5  ;;  %v1834_v27 = vpop.f32.mrf.mxu1  ;;  %4209 = vmatprep.mubr.msk.bf16.mxu0 %vm4507_vm0, %v4506_v0 }
 0x37b   :  { %v1835_v45 = vadd.f32 %v6295_v16, %v1834_v27  ;;  %v4111_v22 = vpop.f32.mrf.mxu0 }
 0x37c   :  { %4370 = vtanh.f32 %v2568_v39  ;;  %v3956_v8 = vpop.f32.mrf.mxu1 }
 0x37d   :  { %v4365_v10 = vpop.eup %4364  ;;  %v2004_v58 = vmax.f32 %v1835_v45, 0.0  ;;  %v2570_v60 = vpop.f32.mrf.mxu0 }
 0x37e   :  { %3012 = vst.msk [vmem:[%s6720_s7 + $0x1c8] sm:$0xff] %vm2954_vm3, %v4365_v10  ;;  %v2571_v31 = vadd.f32 %v6191_v4, %v2570_v60  ;;  %v1839_v57 = vpop.f32.mrf.mxu1 }
 0x37f   :  { %v2073_v11 = vpack.c.bf16 %v2004_v58, %v2003_v41  ;;  %v4112_v54 = vpop.f32.mrf.mxu0  ;;  %v1840_v47 = vadd.f32 %v6295_v16, %v1839_v57 }
 0x380   :  { %4372 = vtanh.f32 %v2571_v31  ;;  %v3959_v24 = vpop.f32.mrf.mxu1 }
 0x381   :  { %v4367_v36 = vpop.eup %4366  ;;  %v2575_v15 = vpop.f32.mrf.mxu0  ;;  %4210 = vmatmul.mubr.msk.bf16.gmra.mxu0 %vm1167_vm2, %v2073_v11  ;;  %v2005_v56 = vmax.f32 %v1840_v47, 0.0 }
 0x382   :  { %3013 = vst.msk [vmem:[%s6720_s7 + $0x1d0] sm:$0xff] %vm2954_vm3, %v4367_v36  ;;  %v2576_v3 = vadd.f32 %v6191_v4, %v2575_v15  ;;  %v1842_v7 = vpop.f32.mrf.mxu1  ;;  %4213 = vmatprep.mubr.msk.bf16.mxu0 %vm4507_vm0, %v4506_v0 }
 0x383   :  { %v1843_v19 = vadd.f32 %v6295_v16, %v1842_v7  ;;  %v4115_v53 = vpop.f32.mrf.mxu0 }
 0x384   :  { %4374 = vtanh.f32 %v2576_v3  ;;  %v3960_v42 = vpop.f32.mrf.mxu1 }
 0x385   :  { %v4369_v55 = vpop.eup %4368  ;;  %v2006_v43 = vmax.f32 %v1843_v19, 0.0  ;;  %v2578_v32 = vpop.f32.mrf.mxu0 }
 0x386   :  { %3014 = vst.msk [vmem:[%s6720_s7 + $0x1d8] sm:$0xff] %vm2954_vm3, %v4369_v55  ;;  %v2579_v9 = vadd.f32 %v6191_v4, %v2578_v32  ;;  %v1847_v28 = vpop.f32.mrf.mxu1 }
 0x387   :  { %v2074_v46 = vpack.c.bf16 %v2006_v43, %v2005_v56  ;;  %v4116_v63 = vpop.f32.mrf.mxu0  ;;  %v1848_v12 = vadd.f32 %v6295_v16, %v1847_v28 }
 0x388   :  { %4376 = vtanh.f32 %v2579_v9  ;;  %v3963_v59 = vpop.f32.mrf.mxu1 }
 0x389   :  { %v4371_v33 = vpop.eup %4370  ;;  %v2583_v25 = vpop.f32.mrf.mxu0  ;;  %4214 = vmatmul.mubr.msk.bf16.gmra.mxu0 %vm1167_vm2, %v2074_v46  ;;  %v2007_v52 = vmax.f32 %v1848_v12, 0.0 }
 0x38a   :  { %3015 = vst.msk [vmem:[%s6720_s7 + $0x1e0] sm:$0xff] %vm2954_vm3, %v4371_v33  ;;  %v2584_v23 = vadd.f32 %v6191_v4, %v2583_v25  ;;  %v1850_v35 = vpop.f32.mrf.mxu1  ;;  %4217 = vmatprep.mubr.msk.bf16.mxu0 %vm4507_vm0, %v4506_v0 }
 0x38b   :  { %v1851_v38 = vadd.f32 %v6295_v16, %v1850_v35  ;;  %v4119_v50 = vpop.f32.mrf.mxu0 }
 0x38c   :  { %4378 = vtanh.f32 %v2584_v23  ;;  %v3964_v34 = vpop.f32.mrf.mxu1 }
 0x38d   :  { %v4373_v44 = vpop.eup %4372  ;;  %v2008_v26 = vmax.f32 %v1851_v38, 0.0  ;;  %v2586_v48 = vpop.f32.mrf.mxu0 }
 0x38e   :  { %3016 = vst.msk [vmem:[%s6720_s7 + $0x1e8] sm:$0xff] %vm2954_vm3, %v4373_v44  ;;  %v2587_v6 = vadd.f32 %v6191_v4, %v2586_v48  ;;  %v1855_v1 = vpop.f32.mrf.mxu1 }
 0x38f   :  { %v2075_v40 = vpack.c.bf16 %v2008_v26, %v2007_v52  ;;  %v4120_v61 = vpop.f32.mrf.mxu0  ;;  %v1856_v62 = vadd.f32 %v6295_v16, %v1855_v1 }
 0x390   :  { %4380 = vtanh.f32 %v2587_v6  ;;  %v3967_v37 = vpop.f32.mrf.mxu1 }
 0x391   :  { %v4375_v49 = vpop.eup %4374  ;;  %v2591_v2 = vpop.f32.mrf.mxu0  ;;  %4218 = vmatmul.mubr.msk.bf16.gmra.mxu0 %vm1167_vm2, %v2075_v40  ;;  %v2009_v29 = vmax.f32 %v1856_v62, 0.0 }
 0x392   :  { %3017 = vst.msk [vmem:[%s6720_s7 + $0x1f0] sm:$0xff] %vm2954_vm3, %v4375_v49  ;;  %v2592_v21 = vadd.f32 %v6191_v4, %v2591_v2  ;;  %v1858_v14 = vpop.f32.mrf.mxu1  ;;  %4221 = vmatprep.mubr.msk.bf16.mxu0 %vm4507_vm0, %v4506_v0 }
 0x393   :  { %v1859_v17 = vadd.f32 %v6295_v16, %v1858_v14  ;;  %v4123_v13 = vpop.f32.mrf.mxu0 }
 0x394   :  { %4382 = vtanh.f32 %v2592_v21  ;;  %v3968_v18 = vpop.f32.mrf.mxu1 }
 0x395   :  { %v4377_v51 = vpop.eup %4376  ;;  %v2010_v30 = vmax.f32 %v1859_v17, 0.0  ;;  %v2594_v20 = vpop.f32.mrf.mxu0 }
 0x396   :  { %3018 = vst.msk [vmem:[%s6720_s7 + $0x1f8] sm:$0xff] %vm2954_vm3, %v4377_v51  ;;  %v2595_v5 = vadd.f32 %v6191_v4, %v2594_v20  ;;  %v1863_v39 = vpop.f32.mrf.mxu1 }
 0x397   :  { %v2076_v27 = vpack.c.bf16 %v2010_v30, %v2009_v29  ;;  %v4124_v45 = vpop.f32.mrf.mxu0  ;;  %v1864_v10 = vadd.f32 %v6295_v16, %v1863_v39 }
 0x398   :  { %4384 = vtanh.f32 %v2595_v5  ;;  %v3971_v22 = vpop.f32.mrf.mxu1 }
 0x399   :  { %v4379_v8 = vpop.eup %4378  ;;  %v2599_v41 = vpop.f32.mrf.mxu0  ;;  %4222 = vmatmul.mubr.msk.bf16.gmra.mxu0 %vm1167_vm2, %v2076_v27  ;;  %v2011_v24 = vmax.f32 %v1864_v10, 0.0 }
 0x39a   :  { %3019 = vst.msk [vmem:[%s6720_s7 + $0x200] sm:$0xff] %vm2954_vm3, %v4379_v8  ;;  %v2600_v58 = vadd.f32 %v6191_v4, %v2599_v41  ;;  %v1866_v60 = vpop.f32.mrf.mxu1  ;;  %4225 = vmatprep.mubr.msk.bf16.mxu0 %vm4507_vm0, %v4506_v0 }
 0x39b   :  { %v1867_v31 = vadd.f32 %v6295_v16, %v1866_v60  ;;  %v4127_v57 = vpop.f32.mrf.mxu0 }
 0x39c   :  { %4386 = vtanh.f32 %v2600_v58  ;;  %v3972_v11 = vpop.f32.mrf.mxu1 }
 0x39d   :  { %v4381_v54 = vpop.eup %4380  ;;  %v2012_v36 = vmax.f32 %v1867_v31, 0.0  ;;  %v2602_v47 = vpop.f32.mrf.mxu0 }
 0x39e   :  { %3020 = vst.msk [vmem:[%s6720_s7 + $0x208] sm:$0xff] %vm2954_vm3, %v4381_v54  ;;  %v2603_v15 = vadd.f32 %v6191_v4, %v2602_v47  ;;  %v1871_v3 = vpop.f32.mrf.mxu1 }
 0x39f   :  { %v2077_v7 = vpack.c.bf16 %v2012_v36, %v2011_v24  ;;  %v4128_v19 = vpop.f32.mrf.mxu0  ;;  %v1872_v55 = vadd.f32 %v6295_v16, %v1871_v3 }
 0x3a0   :  { %4388 = vtanh.f32 %v2603_v15  ;;  %v3975_v53 = vpop.f32.mrf.mxu1 }
 0x3a1   :  { %v4383_v42 = vpop.eup %4382  ;;  %v2607_v56 = vpop.f32.mrf.mxu0  ;;  %4226 = vmatmul.mubr.msk.bf16.gmra.mxu0 %vm1167_vm2, %v2077_v7  ;;  %v2013_v59 = vmax.f32 %v1872_v55, 0.0 }
 0x3a2   :  { %3021 = vst.msk [vmem:[%s6720_s7 + $0x210] sm:$0xff] %vm2954_vm3, %v4383_v42  ;;  %v2608_v43 = vadd.f32 %v6191_v4, %v2607_v56  ;;  %v1874_v32 = vpop.f32.mrf.mxu1  ;;  %4229 = vmatprep.mubr.msk.bf16.mxu0 %vm4507_vm0, %v4506_v0 }
 0x3a3   :  { %v1875_v9 = vadd.f32 %v6295_v16, %v1874_v32  ;;  %v4131_v28 = vpop.f32.mrf.mxu0 }
 0x3a4   :  { %4390 = vtanh.f32 %v2608_v43  ;;  %v3976_v46 = vpop.f32.mrf.mxu1 }
 0x3a5   :  { %v4385_v63 = vpop.eup %4384  ;;  %v2014_v33 = vmax.f32 %v1875_v9, 0.0  ;;  %v2610_v12 = vpop.f32.mrf.mxu0 }
 0x3a6   :  { %3022 = vst.msk [vmem:[%s6720_s7 + $0x218] sm:$0xff] %vm2954_vm3, %v4385_v63  ;;  %v2611_v25 = vadd.f32 %v6191_v4, %v2610_v12  ;;  %v1879_v23 = vpop.f32.mrf.mxu1 }
 0x3a7   :  { %v2078_v35 = vpack.c.bf16 %v2014_v33, %v2013_v59  ;;  %v4132_v38 = vpop.f32.mrf.mxu0  ;;  %v1880_v44 = vadd.f32 %v6295_v16, %v1879_v23 }
 0x3a8   :  { %4392 = vtanh.f32 %v2611_v25  ;;  %v3979_v50 = vpop.f32.mrf.mxu1 }
 0x3a9   :  { %v4387_v34 = vpop.eup %4386  ;;  %v2615_v52 = vpop.f32.mrf.mxu0  ;;  %4230 = vmatmul.mubr.msk.bf16.gmra.mxu0 %vm1167_vm2, %v2078_v35  ;;  %v2015_v37 = vmax.f32 %v1880_v44, 0.0 }
 0x3aa   :  { %3023 = vst.msk [vmem:[%s6720_s7 + $0x220] sm:$0xff] %vm2954_vm3, %v4387_v34  ;;  %v2616_v26 = vadd.f32 %v6191_v4, %v2615_v52  ;;  %v1882_v48 = vpop.f32.mrf.mxu1  ;;  %4233 = vmatprep.mubr.msk.bf16.mxu0 %vm4507_vm0, %v4506_v0 }
 0x3ab   :  { %v1883_v6 = vadd.f32 %v6295_v16, %v1882_v48  ;;  %v4135_v1 = vpop.f32.mrf.mxu0 }
 0x3ac   :  { %4394 = vtanh.f32 %v2616_v26  ;;  %v3980_v40 = vpop.f32.mrf.mxu1 }
 0x3ad   :  { %v4389_v61 = vpop.eup %4388  ;;  %v2016_v49 = vmax.f32 %v1883_v6, 0.0  ;;  %v2618_v62 = vpop.f32.mrf.mxu0 }
 0x3ae   :  { %3024 = vst.msk [vmem:[%s6720_s7 + $0x228] sm:$0xff] %vm2954_vm3, %v4389_v61  ;;  %v2619_v2 = vadd.f32 %v6191_v4, %v2618_v62  ;;  %v1887_v21 = vpop.f32.mrf.mxu1 }
 0x3af   :  { %v2079_v14 = vpack.c.bf16 %v2016_v49, %v2015_v37  ;;  %v1888_v17 = vadd.f32 %v6295_v16, %v1887_v21  ;;  %v4136_v13 = vpop.f32.mrf.mxu0 }
 0x3b0   :  { %4396 = vtanh.f32 %v2619_v2  ;;  %v3983_v18 = vpop.f32.mrf.mxu1 }
 0x3b1   :  { %v4391_v51 = vpop.eup %4390  ;;  %v2623_v29 = vpop.f32.mrf.mxu0  ;;  %4234 = vmatmul.mubr.msk.bf16.gmra.mxu0 %vm1167_vm2, %v2079_v14  ;;  %v2017_v5 = vmax.f32 %v1888_v17, 0.0 }
 0x3b2   :  { %3025 = vst.msk [vmem:[%s6720_s7 + $0x230] sm:$0xff] %vm2954_vm3, %v4391_v51  ;;  %v2624_v30 = vadd.f32 %v6191_v4, %v2623_v29  ;;  %v1890_v20 = vpop.f32.mrf.mxu1  ;;  %4237 = vmatprep.mubr.msk.bf16.mxu0 %vm4507_vm0, %v4506_v0 }
 0x3b3   :  { %v4139_v16 = vpop.f32.mrf.mxu0  ;;  %v2080_v8 = vpack.c.bf16 %v2017_v5, %v2017_v5 }
 0x3b4   :  { %4398 = vtanh.f32 %v2624_v30  ;;  %v3984_v39 = vpop.f32.mrf.mxu1 }
 0x3b5   :  { %v4393_v27 = vpop.eup %4392  ;;  %v2626_v45 = vpop.f32.mrf.mxu0 }
 0x3b6   :  { %3026 = vst.msk [vmem:[%s6720_s7 + $0x238] sm:$0xff] %vm2954_vm3, %v4393_v27  ;;  %v2627_v22 = vadd.f32 %v6191_v4, %v2626_v45 }
 0x3b7   :  { %v4140_v10 = vpop.f32.mrf.mxu0 }
 0x3b8   :  { %4400 = vtanh.f32 %v2627_v22 }
 0x3b9   :  { %v4395_v41 = vpop.eup %4394  ;;  %v2631_v58 = vpop.f32.mrf.mxu0  ;;  %4238 = vmatmul.mubr.msk.bf16.gmra.mxu0 %vm1167_vm2, %v2080_v8 }
 0x3ba   :  { %3027 = vst.msk [vmem:[%s6720_s7 + $0x240] sm:$0xff] %vm2954_vm3, %v4395_v41  ;;  %v2632_v0 = vadd.f32 %v6191_v4, %v2631_v58 }
 0x3bb   :  { %v4143_v60 = vpop.f32.mrf.mxu0 }
 0x3bc   :  { %4402 = vtanh.f32 %v2632_v0 }
 0x3bd   :  { %v4397_v31 = vpop.eup %4396  ;;  %v2634_v57 = vpop.f32.mrf.mxu0 }
 0x3be   :  { %3028 = vst.msk [vmem:[%s6720_s7 + $0x248] sm:$0xff] %vm2954_vm3, %v4397_v31  ;;  %v2635_v11 = vadd.f32 %v6191_v4, %v2634_v57 }
 0x3bf   :  { %v4144_v54 = vpop.f32.mrf.mxu0 }
 0x3c0   :  { %4404 = vtanh.f32 %v2635_v11 }
 0x3c1   :  { %v4399_v24 = vpop.eup %4398  ;;  %v2639_v36 = vpop.f32.mrf.mxu0 }
 0x3c2   :  { %3029 = vst.msk [vmem:[%s6720_s7 + $0x250] sm:$0xff] %vm2954_vm3, %v4399_v24  ;;  %v2640_v47 = vadd.f32 %v6191_v4, %v2639_v36 }
 0x3c3   :  { %v4147_v15 = vpop.f32.mrf.mxu0 }
 0x3c4   :  { %4406 = vtanh.f32 %v2640_v47 }
 0x3c5   :  { %v4401_v3 = vpop.eup %4400  ;;  %v2642_v7 = vpop.f32.mrf.mxu0 }
 0x3c6   :  { %3030 = vst.msk [vmem:[%s6720_s7 + $0x258] sm:$0xff] %vm2954_vm3, %v4401_v3  ;;  %v2643_v19 = vadd.f32 %v6191_v4, %v2642_v7 }
 0x3c7   :  { %v4148_v53 = vpop.f32.mrf.mxu0 }
 0x3c8   :  { %4408 = vtanh.f32 %v2643_v19 }
 0x3c9   :  { %v4403_v42 = vpop.eup %4402  ;;  %v2647_v55 = vpop.f32.mrf.mxu0 }
 0x3ca   :  { %3031 = vst.msk [vmem:[%s6720_s7 + $0x260] sm:$0xff] %vm2954_vm3, %v4403_v42  ;;  %v2648_v56 = vadd.f32 %v6191_v4, %v2647_v55 }
 0x3cb   :  { %v4151_v43 = vpop.f32.mrf.mxu0 }
 0x3cc   :  { %4410 = vtanh.f32 %v2648_v56 }
 0x3cd   :  { %v4405_v32 = vpop.eup %4404  ;;  %v2650_v9 = vpop.f32.mrf.mxu0 }
 0x3ce   :  { %3032 = vst.msk [vmem:[%s6720_s7 + $0x268] sm:$0xff] %vm2954_vm3, %v4405_v32  ;;  %v2651_v28 = vadd.f32 %v6191_v4, %v2650_v9 }
 0x3cf   :  { %v4152_v46 = vpop.f32.mrf.mxu0 }
 0x3d0   :  { %4412 = vtanh.f32 %v2651_v28  ;;  %v6559_v46 = vld [vmem:[%s6719_s6] ss:$0 sm:$0xff] }
 0x3d1   :  { %v4407_v63 = vpop.eup %4406  ;;  %v2655_v59 = vpop.f32.mrf.mxu0 }
 0x3d2   :  { %3033 = vst.msk [vmem:[%s6720_s7 + $0x270] sm:$0xff] %vm2954_vm3, %v4407_v63  ;;  %v2656_v33 = vadd.f32 %v6191_v4, %v2655_v59 }
 0x3d3   :  { %v4155_v12 = vpop.f32.mrf.mxu0 }
 0x3d4   :  { %4414 = vtanh.f32 %v2656_v33 }
 0x3d5   :  { %v4409_v25 = vpop.eup %4408  ;;  %v2658_v23 = vpop.f32.mrf.mxu0 }
 0x3d6   :  { %3034 = vst.msk [vmem:[%s6720_s7 + $0x278] sm:$0xff] %vm2954_vm3, %v4409_v25  ;;  %v2659_v35 = vadd.f32 %v6191_v4, %v2658_v23 }
 0x3d7   :  { %v4156_v38 = vpop.f32.mrf.mxu0 }
 0x3d8   :  { %4416 = vtanh.f32 %v2659_v35 }
 0x3d9   :  { %v4411_v50 = vpop.eup %4410  ;;  %v2663_v34 = vpop.f32.mrf.mxu0 }
 0x3da   :  { %3035 = vst.msk [vmem:[%s6720_s7 + $0x280] sm:$0xff] %vm2954_vm3, %v4411_v50  ;;  %v2664_v44 = vadd.f32 %v6191_v4, %v2663_v34 }
 0x3db   :  { %v4159_v52 = vpop.f32.mrf.mxu0 }
 0x3dc   :  { %4418 = vtanh.f32 %v2664_v44 }
 0x3dd   :  { %v4413_v26 = vpop.eup %4412  ;;  %v2666_v48 = vpop.f32.mrf.mxu0 }
 0x3de   :  { %3036 = vst.msk [vmem:[%s6720_s7 + $0x288] sm:$0xff] %vm2954_vm3, %v4413_v26  ;;  %v2667_v6 = vadd.f32 %v6191_v4, %v2666_v48 }
 0x3df   :  { %v4160_v1 = vpop.f32.mrf.mxu0 }
 0x3e0   :  { %4420 = vtanh.f32 %v2667_v6 }
 0x3e1   :  { %v4415_v40 = vpop.eup %4414  ;;  %v2671_v61 = vpop.f32.mrf.mxu0 }
 0x3e2   :  { %3037 = vst.msk [vmem:[%s6720_s7 + $0x290] sm:$0xff] %vm2954_vm3, %v4415_v40  ;;  %v2672_v37 = vadd.f32 %v6191_v4, %v2671_v61 }
 0x3e3   :  { %v4163_v49 = vpop.f32.mrf.mxu0 }
 0x3e4   :  { %4422 = vtanh.f32 %v2672_v37 }
 0x3e5   :  { %v4417_v62 = vpop.eup %4416  ;;  %v2674_v2 = vpop.f32.mrf.mxu0 }
 0x3e6   :  { %3038 = vst.msk [vmem:[%s6720_s7 + $0x298] sm:$0xff] %vm2954_vm3, %v4417_v62  ;;  %v2675_v21 = vadd.f32 %v6191_v4, %v2674_v2 }
 0x3e7   :  { %v4164_v14 = vpop.f32.mrf.mxu0 }
 0x3e8   :  { %4424 = vtanh.f32 %v2675_v21 }
 0x3e9   :  { %v4419_v17 = vpop.eup %4418  ;;  %v2679_v13 = vpop.f32.mrf.mxu0 }
 0x3ea   :  { %3039 = vst.msk [vmem:[%s6720_s7 + $0x2a0] sm:$0xff] %vm2954_vm3, %v4419_v17  ;;  %v2680_v18 = vadd.f32 %v6191_v4, %v2679_v13 }
 0x3eb   :  { %v4167_v51 = vpop.f32.mrf.mxu0 }
 0x3ec   :  { %4426 = vtanh.f32 %v2680_v18 }
 0x3ed   :  { %v4421_v29 = vpop.eup %4420  ;;  %v2682_v30 = vpop.f32.mrf.mxu0 }
 0x3ee   :  { %3040 = vst.msk [vmem:[%s6720_s7 + $0x2a8] sm:$0xff] %vm2954_vm3, %v4421_v29  ;;  %v2683_v20 = vadd.f32 %v6191_v4, %v2682_v30 }
 0x3ef   :  { %v4168_v5 = vpop.f32.mrf.mxu0 }
 0x3f0   :  { %4428 = vtanh.f32 %v2683_v20 }
 0x3f1   :  { %v4423_v16 = vpop.eup %4422  ;;  %v2687_v39 = vpop.f32.mrf.mxu0 }
 0x3f2   :  { %3041 = vst.msk [vmem:[%s6720_s7 + $0x2b0] sm:$0xff] %vm2954_vm3, %v4423_v16  ;;  %v2688_v27 = vadd.f32 %v6191_v4, %v2687_v39 }
 0x3f3   :  { %v4171_v45 = vpop.f32.mrf.mxu0 }
 0x3f4   :  { %4430 = vtanh.f32 %v2688_v27 }
 0x3f5   :  { %v4425_v22 = vpop.eup %4424  ;;  %v2690_v8 = vpop.f32.mrf.mxu0 }
 0x3f6   :  { %3042 = vst.msk [vmem:[%s6720_s7 + $0x2b8] sm:$0xff] %vm2954_vm3, %v4425_v22  ;;  %v2691_v10 = vadd.f32 %v6191_v4, %v2690_v8 }
 0x3f7   :  { %v4172_v41 = vpop.f32.mrf.mxu0 }
 0x3f8   :  { %4432 = vtanh.f32 %v2691_v10 }
 0x3f9   :  { %v4427_v58 = vpop.eup %4426  ;;  %v2695_v0 = vpop.f32.mrf.mxu0 }
 0x3fa   :  { %3043 = vst.msk [vmem:[%s6720_s7 + $0x2c0] sm:$0xff] %vm2954_vm3, %v4427_v58  ;;  %v2696_v60 = vadd.f32 %v6191_v4, %v2695_v0 }
 0x3fb   :  { %v4175_v31 = vpop.f32.mrf.mxu0 }
 0x3fc   :  { %4434 = vtanh.f32 %v2696_v60 }
 0x3fd   :  { %v4429_v57 = vpop.eup %4428  ;;  %v2698_v11 = vpop.f32.mrf.mxu0 }
 0x3fe   :  { %3044 = vst.msk [vmem:[%s6720_s7 + $0x2c8] sm:$0xff] %vm2954_vm3, %v4429_v57  ;;  %v2699_v54 = vadd.f32 %v6191_v4, %v2698_v11 }
 0x3ff   :  { %v4176_v24 = vpop.f32.mrf.mxu0 }
 0x400   :  { %4436 = vtanh.f32 %v2699_v54 }
 0x401   :  { %v4431_v36 = vpop.eup %4430  ;;  %v2703_v47 = vpop.f32.mrf.mxu0 }
 0x402   :  { %3045 = vst.msk [vmem:[%s6720_s7 + $0x2d0] sm:$0xff] %vm2954_vm3, %v4431_v36  ;;  %v2704_v15 = vadd.f32 %v6191_v4, %v2703_v47 }
 0x403   :  { %v4179_v3 = vpop.f32.mrf.mxu0 }
 0x404   :  { %4438 = vtanh.f32 %v2704_v15 }
 0x405   :  { %v4433_v7 = vpop.eup %4432  ;;  %v2706_v19 = vpop.f32.mrf.mxu0 }
 0x406   :  { %3046 = vst.msk [vmem:[%s6720_s7 + $0x2d8] sm:$0xff] %vm2954_vm3, %v4433_v7  ;;  %v2707_v53 = vadd.f32 %v6191_v4, %v2706_v19 }
 0x407   :  { %v4180_v42 = vpop.f32.mrf.mxu0 }
 0x408   :  { %4440 = vtanh.f32 %v2707_v53 }
 0x409   :  { %v4435_v55 = vpop.eup %4434  ;;  %v2711_v56 = vpop.f32.mrf.mxu0 }
 0x40a   :  { %3047 = vst.msk [vmem:[%s6720_s7 + $0x2e0] sm:$0xff] %vm2954_vm3, %v4435_v55  ;;  %v2712_v43 = vadd.f32 %v6191_v4, %v2711_v56 }
 0x40b   :  { %v4183_v32 = vpop.f32.mrf.mxu0 }
 0x40c   :  { %4442 = vtanh.f32 %v2712_v43 }
 0x40d   :  { %v4437_v9 = vpop.eup %4436  ;;  %v2714_v28 = vpop.f32.mrf.mxu0 }
 0x40e   :  { %3048 = vst.msk [vmem:[%s6720_s7 + $0x2e8] sm:$0xff] %vm2954_vm3, %v4437_v9  ;;  %v2715_v63 = vadd.f32 %v6559_v46, %v2714_v28 }
 0x40f   :  { %v4184_v59 = vpop.f32.mrf.mxu0 }
 0x410   :  { %4444 = vtanh.f32 %v2715_v63 }
 0x411   :  { %v4439_v33 = vpop.eup %4438  ;;  %v2719_v4 = vpop.f32.mrf.mxu0 }
 0x412   :  { %3049 = vst.msk [vmem:[%s6720_s7 + $0x2f0] sm:$0xff] %vm2954_vm3, %v4439_v33  ;;  %v2720_v12 = vadd.f32 %v6559_v46, %v2719_v4 }
 0x413   :  { %v4187_v25 = vpop.f32.mrf.mxu0 }
 0x414   :  { %4446 = vtanh.f32 %v2720_v12 }
 0x415   :  { %v4441_v23 = vpop.eup %4440  ;;  %v2722_v35 = vpop.f32.mrf.mxu0 }
 0x416   :  { %3050 = vst.msk [vmem:[%s6720_s7 + $0x2f8] sm:$0xff] %vm2954_vm3, %v4441_v23  ;;  %v2723_v38 = vadd.f32 %v6559_v46, %v2722_v35 }
 0x417   :  { %v4188_v50 = vpop.f32.mrf.mxu0 }
 0x418   :  { %4448 = vtanh.f32 %v2723_v38 }
 0x419   :  { %v4443_v34 = vpop.eup %4442  ;;  %v2727_v44 = vpop.f32.mrf.mxu0 }
 0x41a   :  { %3051 = vst.msk [vmem:[%s6720_s7 + $0x300] sm:$0xff] %vm2954_vm3, %v4443_v34  ;;  %v2728_v52 = vadd.f32 %v6559_v46, %v2727_v44 }
 0x41b   :  { %v4191_v26 = vpop.f32.mrf.mxu0 }
 0x41c   :  { %4450 = vtanh.f32 %v2728_v52 }
 0x41d   :  { %v4445_v48 = vpop.eup %4444  ;;  %v2730_v6 = vpop.f32.mrf.mxu0 }
 0x41e   :  { %3052 = vst.msk [vmem:[%s6720_s7 + $0x308] sm:$0xff] %vm2954_vm3, %v4445_v48  ;;  %v2731_v1 = vadd.f32 %v6559_v46, %v2730_v6 }
 0x41f   :  { %v4192_v40 = vpop.f32.mrf.mxu0 }
 0x420   :  { %4452 = vtanh.f32 %v2731_v1 }
 0x421   :  { %v4447_v61 = vpop.eup %4446  ;;  %v2735_v37 = vpop.f32.mrf.mxu0 }
 0x422   :  { %3053 = vst.msk [vmem:[%s6720_s7 + $0x310] sm:$0xff] %vm2954_vm3, %v4447_v61  ;;  %v2736_v49 = vadd.f32 %v6559_v46, %v2735_v37 }
 0x423   :  { %v4195_v62 = vpop.f32.mrf.mxu0 }
 0x424   :  { %4454 = vtanh.f32 %v2736_v49 }
 0x425   :  { %v4449_v2 = vpop.eup %4448  ;;  %v2738_v21 = vpop.f32.mrf.mxu0 }
 0x426   :  { %3054 = vst.msk [vmem:[%s6720_s7 + $0x318] sm:$0xff] %vm2954_vm3, %v4449_v2  ;;  %v2739_v14 = vadd.f32 %v6559_v46, %v2738_v21 }
 0x427   :  { %v4196_v17 = vpop.f32.mrf.mxu0 }
 0x428   :  { %4456 = vtanh.f32 %v2739_v14 }
 0x429   :  { %v4451_v13 = vpop.eup %4450  ;;  %v2743_v18 = vpop.f32.mrf.mxu0 }
 0x42a   :  { %3055 = vst.msk [vmem:[%s6720_s7 + $0x320] sm:$0xff] %vm2954_vm3, %v4451_v13  ;;  %v2744_v51 = vadd.f32 %v6559_v46, %v2743_v18 }
 0x42b   :  { %v4199_v29 = vpop.f32.mrf.mxu0 }
 0x42c   :  { %4458 = vtanh.f32 %v2744_v51 }
 0x42d   :  { %v4453_v30 = vpop.eup %4452  ;;  %v2746_v20 = vpop.f32.mrf.mxu0 }
 0x42e   :  { %3056 = vst.msk [vmem:[%s6720_s7 + $0x328] sm:$0xff] %vm2954_vm3, %v4453_v30  ;;  %v2747_v5 = vadd.f32 %v6559_v46, %v2746_v20 }
 0x42f   :  { %v4200_v16 = vpop.f32.mrf.mxu0 }
 0x430   :  { %4460 = vtanh.f32 %v2747_v5 }
 0x431   :  { %v4455_v39 = vpop.eup %4454  ;;  %v2751_v27 = vpop.f32.mrf.mxu0 }
 0x432   :  { %3057 = vst.msk [vmem:[%s6720_s7 + $0x330] sm:$0xff] %vm2954_vm3, %v4455_v39  ;;  %v2752_v45 = vadd.f32 %v6559_v46, %v2751_v27 }
 0x433   :  { %v4203_v22 = vpop.f32.mrf.mxu0 }
 0x434   :  { %4462 = vtanh.f32 %v2752_v45 }
 0x435   :  { %v4457_v8 = vpop.eup %4456  ;;  %v2754_v10 = vpop.f32.mrf.mxu0 }
 0x436   :  { %3058 = vst.msk [vmem:[%s6720_s7 + $0x338] sm:$0xff] %vm2954_vm3, %v4457_v8  ;;  %v2755_v41 = vadd.f32 %v6559_v46, %v2754_v10 }
 0x437   :  { %v4204_v58 = vpop.f32.mrf.mxu0 }
 0x438   :  { %4464 = vtanh.f32 %v2755_v41 }
 0x439   :  { %v4459_v0 = vpop.eup %4458  ;;  %v2759_v60 = vpop.f32.mrf.mxu0 }
 0x43a   :  { %3059 = vst.msk [vmem:[%s6720_s7 + $0x340] sm:$0xff] %vm2954_vm3, %v4459_v0  ;;  %v2760_v31 = vadd.f32 %v6559_v46, %v2759_v60 }
 0x43b   :  { %v4207_v57 = vpop.f32.mrf.mxu0 }
 0x43c   :  { %4466 = vtanh.f32 %v2760_v31 }
 0x43d   :  { %v4461_v11 = vpop.eup %4460  ;;  %v2762_v54 = vpop.f32.mrf.mxu0 }
 0x43e   :  { %3060 = vst.msk [vmem:[%s6720_s7 + $0x348] sm:$0xff] %vm2954_vm3, %v4461_v11  ;;  %v2763_v24 = vadd.f32 %v6559_v46, %v2762_v54 }
 0x43f   :  { %v4208_v36 = vpop.f32.mrf.mxu0 }
 0x440   :  { %4468 = vtanh.f32 %v2763_v24 }
 0x441   :  { %v4463_v47 = vpop.eup %4462  ;;  %v2767_v15 = vpop.f32.mrf.mxu0 }
 0x442   :  { %3061 = vst.msk [vmem:[%s6720_s7 + $0x350] sm:$0xff] %vm2954_vm3, %v4463_v47  ;;  %v2768_v3 = vadd.f32 %v6559_v46, %v2767_v15 }
 0x443   :  { %v4211_v7 = vpop.f32.mrf.mxu0 }
 0x444   :  { %4470 = vtanh.f32 %v2768_v3 }
 0x445   :  { %v4465_v19 = vpop.eup %4464  ;;  %v2770_v53 = vpop.f32.mrf.mxu0 }
 0x446   :  { %3062 = vst.msk [vmem:[%s6720_s7 + $0x358] sm:$0xff] %vm2954_vm3, %v4465_v19  ;;  %v2771_v42 = vadd.f32 %v6559_v46, %v2770_v53 }
 0x447   :  { %v4212_v55 = vpop.f32.mrf.mxu0 }
 0x448   :  { %4472 = vtanh.f32 %v2771_v42 }
 0x449   :  { %v4467_v56 = vpop.eup %4466  ;;  %v2775_v43 = vpop.f32.mrf.mxu0 }
 0x44a   :  { %3063 = vst.msk [vmem:[%s6720_s7 + $0x360] sm:$0xff] %vm2954_vm3, %v4467_v56  ;;  %v2776_v32 = vadd.f32 %v6559_v46, %v2775_v43 }
 0x44b   :  { %v4215_v9 = vpop.f32.mrf.mxu0 }
 0x44c   :  { %4474 = vtanh.f32 %v2776_v32 }
 0x44d   :  { %v4469_v28 = vpop.eup %4468  ;;  %v2778_v63 = vpop.f32.mrf.mxu0 }
 0x44e   :  { %3064 = vst.msk [vmem:[%s6720_s7 + $0x368] sm:$0xff] %vm2954_vm3, %v4469_v28  ;;  %v2779_v59 = vadd.f32 %v6559_v46, %v2778_v63 }
 0x44f   :  { %v4216_v33 = vpop.f32.mrf.mxu0 }
 0x450   :  { %4476 = vtanh.f32 %v2779_v59 }
 0x451   :  { %v4471_v4 = vpop.eup %4470  ;;  %v2783_v12 = vpop.f32.mrf.mxu0 }
 0x452   :  { %3065 = vst.msk [vmem:[%s6720_s7 + $0x370] sm:$0xff] %vm2954_vm3, %v4471_v4  ;;  %v2784_v25 = vadd.f32 %v6559_v46, %v2783_v12 }
 0x453   :  { %v4219_v23 = vpop.f32.mrf.mxu0 }
 0x454   :  { %4478 = vtanh.f32 %v2784_v25 }
 0x455   :  { %v4473_v35 = vpop.eup %4472  ;;  %v2786_v38 = vpop.f32.mrf.mxu0 }
 0x456   :  { %3066 = vst.msk [vmem:[%s6720_s7 + $0x378] sm:$0xff] %vm2954_vm3, %v4473_v35  ;;  %v2787_v50 = vadd.f32 %v6559_v46, %v2786_v38 }
 0x457   :  { %v4220_v34 = vpop.f32.mrf.mxu0 }
 0x458   :  { %4480 = vtanh.f32 %v2787_v50 }
 0x459   :  { %v4475_v44 = vpop.eup %4474  ;;  %v2791_v52 = vpop.f32.mrf.mxu0 }
 0x45a   :  { %3067 = vst.msk [vmem:[%s6720_s7 + $0x380] sm:$0xff] %vm2954_vm3, %v4475_v44  ;;  %v2792_v26 = vadd.f32 %v6559_v46, %v2791_v52 }
 0x45b   :  { %v4223_v48 = vpop.f32.mrf.mxu0 }
 0x45c   :  { %4482 = vtanh.f32 %v2792_v26 }
 0x45d   :  { %v4477_v6 = vpop.eup %4476  ;;  %v2794_v1 = vpop.f32.mrf.mxu0 }
 0x45e   :  { %3068 = vst.msk [vmem:[%s6720_s7 + $0x388] sm:$0xff] %vm2954_vm3, %v4477_v6  ;;  %v2795_v40 = vadd.f32 %v6559_v46, %v2794_v1 }
 0x45f   :  { %v4224_v61 = vpop.f32.mrf.mxu0 }
 0x460   :  { %4484 = vtanh.f32 %v2795_v40 }
 0x461   :  { %v4479_v37 = vpop.eup %4478  ;;  %v2799_v49 = vpop.f32.mrf.mxu0 }
 0x462   :  { %3069 = vst.msk [vmem:[%s6720_s7 + $0x390] sm:$0xff] %vm2954_vm3, %v4479_v37  ;;  %v2800_v62 = vadd.f32 %v6559_v46, %v2799_v49 }
 0x463   :  { %v4227_v2 = vpop.f32.mrf.mxu0 }
 0x464   :  { %4486 = vtanh.f32 %v2800_v62 }
 0x465   :  { %v4481_v21 = vpop.eup %4480  ;;  %v2802_v14 = vpop.f32.mrf.mxu0 }
 0x466   :  { %3070 = vst.msk [vmem:[%s6720_s7 + $0x398] sm:$0xff] %vm2954_vm3, %v4481_v21  ;;  %v2803_v17 = vadd.f32 %v6559_v46, %v2802_v14 }
 0x467   :  { %v4228_v13 = vpop.f32.mrf.mxu0 }
 0x468   :  { %4488 = vtanh.f32 %v2803_v17 }
 0x469   :  { %v4483_v18 = vpop.eup %4482  ;;  %v2807_v51 = vpop.f32.mrf.mxu0 }
 0x46a   :  { %3071 = vst.msk [vmem:[%s6720_s7 + $0x3a0] sm:$0xff] %vm2954_vm3, %v4483_v18  ;;  %v2808_v29 = vadd.f32 %v6559_v46, %v2807_v51 }
 0x46b   :  { %v4231_v30 = vpop.f32.mrf.mxu0 }
 0x46c   :  { %4490 = vtanh.f32 %v2808_v29 }
 0x46d   :  { %v4485_v20 = vpop.eup %4484  ;;  %v2810_v5 = vpop.f32.mrf.mxu0 }
 0x46e   :  { %3072 = vst.msk [vmem:[%s6720_s7 + $0x3a8] sm:$0xff] %vm2954_vm3, %v4485_v20  ;;  %v2811_v16 = vadd.f32 %v6559_v46, %v2810_v5 }
 0x46f   :  { %v4232_v39 = vpop.f32.mrf.mxu0 }
 0x470   :  { %4492 = vtanh.f32 %v2811_v16 }
 0x471   :  { %v4487_v27 = vpop.eup %4486  ;;  %v2815_v45 = vpop.f32.mrf.mxu0 }
 0x472   :  { %3073 = vst.msk [vmem:[%s6720_s7 + $0x3b0] sm:$0xff] %vm2954_vm3, %v4487_v27  ;;  %v2816_v22 = vadd.f32 %v6559_v46, %v2815_v45 }
 0x473   :  { %v4235_v8 = vpop.f32.mrf.mxu0 }
 0x474   :  { %4494 = vtanh.f32 %v2816_v22 }
 0x475   :  { %v4489_v10 = vpop.eup %4488  ;;  %v2818_v41 = vpop.f32.mrf.mxu0 }
 0x476   :  { %3074 = vst.msk [vmem:[%s6720_s7 + $0x3b8] sm:$0xff] %vm2954_vm3, %v4489_v10  ;;  %v2819_v58 = vadd.f32 %v6559_v46, %v2818_v41 }
 0x477   :  { %v4236_v0 = vpop.f32.mrf.mxu0 }
 0x478   :  { %4496 = vtanh.f32 %v2819_v58 }
 0x479   :  { %v4491_v60 = vpop.eup %4490  ;;  %v2823_v31 = vpop.f32.mrf.mxu0 }
 0x47a   :  { %3075 = vst.msk [vmem:[%s6720_s7 + $0x3c0] sm:$0xff] %vm2954_vm3, %v4491_v60  ;;  %v2824_v57 = vadd.f32 %v6559_v46, %v2823_v31 }
 0x47b   :  { %v4239_v11 = vpop.f32.mrf.mxu0 }
 0x47c   :  { %4498 = vtanh.f32 %v2824_v57 }
 0x47d   :  { %v4493_v54 = vpop.eup %4492  ;;  %v2826_v24 = vpop.f32.mrf.mxu0 }
 0x47e   :  { %3076 = vst.msk [vmem:[%s6720_s7 + $0x3c8] sm:$0xff] %vm2954_vm3, %v4493_v54 }
 0x47f   :  { %v4240_v36 = vpop.f32.mrf.mxu0 }
 0x481   :  { %v4495_v47 = vpop.eup %4494 }
 0x482   :  { %3077 = vst.msk [vmem:[%s6720_s7 + $0x3d0] sm:$0xff] %vm2954_vm3, %v4495_v47 }
 0x485   :  { %v4497_v15 = vpop.eup %4496 }
 0x486   :  { %3078 = vst.msk [vmem:[%s6720_s7 + $0x3d8] sm:$0xff] %vm2954_vm3, %v4497_v15 }
 0x489   :  { %v4499_v46 = vpop.eup %4498 }
 0x48a   :  { %3079 = vst.msk [vmem:[%s6720_s7 + $0x3e0] sm:$0xff] %vm2954_vm3, %v4499_v46 }

</bundles_post_ra>
